<compile_context>
chip_gen: v6e
topology: v6e:2x2x1
jax: 0.10.0
libtpu: 0.0.40
codegen_flags: <defaults>
</compile_context>

<pallas_src>
import math

import jax
import jax.numpy as jnp
from jax import lax
from jax.experimental import pallas as pl
from jax.experimental.pallas import tpu as pltpu

BN_EPS = 1e-5
PW = 16   # left/right halo pad of the W axis -> bf16 sublane-tile aligned writes


def _conv_block_kernel(xcol_ref, w1_ref, b1_ref, w2_ref, b2_ref,
                       o_ref, h1_ref, hp_ref):
    """One batch block per grid step.

    xcol_ref : (Bblk, H*W, 9*Cin)    bf16  pre-im2col'ed conv1 input
    w1_ref   : (9*Cin, Cout)         bf16  conv1 weights (BN1 folded)
    b1_ref   : (1, Cout)             f32   conv1 folded BN shift
    w2_ref   : (9*Cout, Cout)        bf16  conv2 weights (BN2 folded)
    b2_ref   : (1, Cout)             f32   conv2 folded BN shift
    o_ref    : (Bblk, Ho, Wo*Cout)   f32   lane-dense pooled output
    h1_ref   : (H+2, W+2*PW, Cout)   bf16  scratch: zero-padded conv1 act.
    hp_ref   : (Ho, W, Cout)         f32   scratch: H-pooled conv2 act.
    """
    bblk, hw, _ = xcol_ref.shape
    cout = w1_ref.shape[1]
    H = h1_ref.shape[0] - 2
    W = h1_ref.shape[1] - 2 * PW
    Ho, Wo = H // 2, W // 2
    c0 = PW - 1                       # column of conv2 tap dx = 0

    # ---- conv1: single bf16 im2col matmul (K = 9*Cin) + bias + ReLU ---------
    acc1 = jnp.dot(xcol_ref[...].reshape(bblk * hw, -1), w1_ref[...],
                   preferred_element_type=jnp.float32)
    a1 = jnp.maximum(acc1 + b1_ref[...], 0.0)             # (bblk*hw, cout) f32
    a1 = a1.reshape(bblk, H, W, cout)

    # ---- zero only the halo border of the scratch (interior is overwritten) -
    zrow = jnp.zeros((1, W + 2 * PW, cout), h1_ref.dtype)
    zcol = jnp.zeros((H + 2, 1, cout), h1_ref.dtype)
    h1_ref[0:1, :, :] = zrow
    h1_ref[H + 1:H + 2, :, :] = zrow
    h1_ref[:, c0:c0 + 1, :] = zcol
    h1_ref[:, c0 + W + 1:c0 + W + 2, :] = zcol

    for i in range(bblk):
        # -- stash padded bf16 activation in VMEM (sublane-tile aligned store)
        h1_ref[1:H + 1, PW:PW + W, :] = a1[i].astype(h1_ref.dtype)

        # -- conv2: one fused K=9*Cout bf16 matmul over an im2col buffer ------
        patches = jnp.concatenate(
            [h1_ref[dy:dy + H, c0 + dx:c0 + dx + W, :].reshape(hw, cout)
             for dy in range(3) for dx in range(3)], axis=-1)   # (hw, 9*cout)
        acc2 = jnp.dot(patches, w2_ref[...],
                       preferred_element_type=jnp.float32)
        a2 = jnp.maximum(acc2 + b2_ref[...], 0.0)               # (hw, cout)

        # -- 2x2 average pool on the VPU (no pooling matrix) ------------------
        a2r = a2.reshape(Ho, 2, W, cout)
        hp_ref[...] = a2r[:, 0] + a2r[:, 1]                     # pool over H
        out2d = jnp.concatenate(                                # pool over W +
            [jnp.sum(hp_ref[:, 2 * wo:2 * wo + 2, :], axis=1)   # lane-dense pack
             for wo in range(Wo)], axis=-1) * 0.25              # (Ho, Wo*cout)
        o_ref[i] = out2d.astype(o_ref.dtype)


def _pick_batch_block(B):
    # Amortize per-grid-step overhead, but keep >= 2 grid steps when possible
    # so v7x's two TensorCores both receive work along the "parallel" axis.
    for bblk in (8, 4, 2):
        if B % bblk == 0 and B // bblk >= 2:
            return bblk
    return 1


@jax.jit
def conv_block_forward(x_nchw, params):
    B, Cin, H, W = x_nchw.shape
    assert H % 2 == 0 and W % 2 == 0, "avg_pool2d(2,2) needs even H, W"
    Cout = params["b1"].shape[-1]
    Ho, Wo = H // 2, W // 2
    hw = H * W

    # NHWC + wrapper-side im2col for conv1 (layout plumbing only).
    x_nhwc = jnp.transpose(x_nchw, (0, 2, 3, 1)).astype(jnp.float32)
    xpad = jnp.pad(x_nhwc, ((0, 0), (1, 1), (1, 1), (0, 0)))
    xcol = jnp.concatenate(
        [xpad[:, dy:dy + H, dx:dx + W, :] for dy in range(3) for dx in range(3)],
        axis=-1).reshape(B, hw, 9 * Cin).astype(jnp.bfloat16)

    w1f = params["w1"].reshape(9 * Cin, Cout).astype(jnp.bfloat16)
    w2f = params["w2"].reshape(9 * Cout, Cout).astype(jnp.bfloat16)

    bblk = _pick_batch_block(B)
    grid = (B // bblk,)

    flops = 2 * B * hw * (9 * Cin + 9 * Cout) * Cout + 4 * B * hw * Cout
    bytes_accessed = (xcol.size * 2 + w1f.size * 2 + w2f.size * 2
                      + params["b1"].size * 4 + params["b2"].size * 4
                      + B * Ho * Wo * Cout * 4)

    out = pl.pallas_call(
        _conv_block_kernel,
        out_shape=jax.ShapeDtypeStruct((B, Ho, Wo * Cout), jnp.float32),
        grid=grid,
        in_specs=[
            pl.BlockSpec((bblk, hw, 9 * Cin), lambda i: (i, 0, 0)),
            pl.BlockSpec((9 * Cin, Cout), lambda i: (0, 0)),     # VMEM-resident
            pl.BlockSpec((1, Cout), lambda i: (0, 0)),
            pl.BlockSpec((9 * Cout, Cout), lambda i: (0, 0)),
            pl.BlockSpec((1, Cout), lambda i: (0, 0)),
        ],
        out_specs=pl.BlockSpec((bblk, Ho, Wo * Cout), lambda i: (i, 0, 0)),
        scratch_shapes=[
            pltpu.VMEM((H + 2, W + 2 * PW, Cout), jnp.bfloat16),
            pltpu.VMEM((Ho, W, Cout), jnp.float32),
        ],
        compiler_params=pltpu.CompilerParams(dimension_semantics=("parallel",)),
        cost_estimate=pl.CostEstimate(flops=int(flops), transcendentals=0,
                                      bytes_accessed=int(bytes_accessed)),
    )(xcol, w1f, params["b1"], w2f, params["b2"])

    # (B, Ho, Wo*Cout) lane-dense slab -> NCHW to match the PyTorch module.
    return jnp.transpose(out.reshape(B, Ho, Wo, Cout), (0, 3, 1, 2))


def init_params(key, cin, cout):
    """Synthetic parameters matching ConvBlock's init (kaiming conv, init_bn BN).

    BatchNorm (eval mode) is folded into per-output-channel scale/shift:
    bn1 into (w1, b1), bn2 into (w2, b2) — two independent BN layers.
    """
    k1, k2 = jax.random.split(key)

    def kaiming_uniform(k, shape, fan_in):
        bound = math.sqrt(2.0) * math.sqrt(3.0 / fan_in)
        return jax.random.uniform(k, shape, jnp.float32, -bound, bound)

    # torch Conv2d weight (cout, cin, 3, 3) stored as (9, cin, cout), k = 3*dy+dx.
    w1 = kaiming_uniform(k1, (9, cin, cout), 9 * cin)
    w2 = kaiming_uniform(k2, (9, cout, cout), 9 * cout)

    def bn_fold():
        gamma = jnp.ones((cout,), jnp.float32)
        beta = jnp.zeros((cout,), jnp.float32)
        mean = jnp.zeros((cout,), jnp.float32)
        var = jnp.ones((cout,), jnp.float32)
        scale = gamma * lax.rsqrt(var + BN_EPS)
        shift = beta - mean * scale
        return scale, shift

    s1, t1 = bn_fold()   # bn1
    s2, t2 = bn_fold()   # bn2

    return dict(
        w1=(w1 * s1[None, None, :]).astype(jnp.float32),
        b1=t1.reshape(1, cout).astype(jnp.float32),
        w2=(w2 * s2[None, None, :]).astype(jnp.float32),
        b2=t2.reshape(1, cout).astype(jnp.float32),
    )


def conv_block_reference(x_nchw, params):
    """Plain-JAX reference, bf16-consistent with the kernel (f32 accumulation)."""
    B, Cin, H, W = x_nchw.shape
    cout = params["b1"].shape[-1]
    dn = ("NHWC", "HWIO", "NHWC")

    x = jnp.transpose(x_nchw, (0, 2, 3, 1)).astype(jnp.bfloat16)
    w1 = params["w1"].astype(jnp.bfloat16).reshape(3, 3, Cin, cout)
    w2 = params["w2"].astype(jnp.bfloat16).reshape(3, 3, cout, cout)

    y = lax.conv_general_dilated(x, w1, (1, 1), "SAME", dimension_numbers=dn,
                                 preferred_element_type=jnp.float32)
    y = jnp.maximum(y + params["b1"].reshape(1, 1, 1, cout), 0.0)
    y = lax.conv_general_dilated(y.astype(jnp.bfloat16), w2, (1, 1), "SAME",
                                 dimension_numbers=dn,
                                 preferred_element_type=jnp.float32)
    y = jnp.maximum(y + params["b2"].reshape(1, 1, 1, cout), 0.0)
    y = y.reshape(B, H // 2, 2, W // 2, 2, cout).mean(axis=(2, 4))
    return jnp.transpose(y, (0, 3, 1, 2))


if __name__ == "__main__":
    key = jax.random.PRNGKey(0)
    k_x, k_p = jax.random.split(key)

    B, CIN, COUT, H, W = 2, 4, 64, 16, 16
    x = jax.random.normal(k_x, (B, CIN, H, W), jnp.float32)
    params = init_params(k_p, CIN, COUT)

    out = jax.block_until_ready(conv_block_forward(x, params))
    ref = conv_block_reference(x, params)

    assert out.shape == (B, COUT, H // 2, W // 2), out.shape
    max_err = float(jnp.max(jnp.abs(out - ref)))
    assert jnp.allclose(out, ref, atol=2e-2, rtol=2e-2), max_err

    print("KERNEL_OK")
</pallas_src>

<mosaic_0001>
module attributes {stable_mosaic.version = 11 : i64} {
  func.func @_conv_block_kernel(%arg0: i32, %arg1: memref<1x256x36xbf16, #tpu.memory_space<vmem>>, %arg2: memref<36x64xbf16, #tpu.memory_space<vmem>>, %arg3: memref<1x64xf32, #tpu.memory_space<vmem>>, %arg4: memref<576x64xbf16, #tpu.memory_space<vmem>>, %arg5: memref<1x64xf32, #tpu.memory_space<vmem>>, %arg6: memref<1x8x512xf32, #tpu.memory_space<vmem>>, %arg7: memref<18x48x64xbf16, #tpu.memory_space<vmem>>, %arg8: memref<8x16x64xf32, #tpu.memory_space<vmem>>) attributes {dimension_semantics = [#tpu.dimension_semantics<parallel>], iteration_bounds = array<i64: 2>, scalar_prefetch = 0 : i64, scratch_operands = 2 : i64, tpu.core_type = #tpu.core_type<tc>, window_params = [{transform_indices = @transform_0, window_bounds = array<i64: 1, 256, 36>}, {pipeline_mode = #tpu.pipeline_mode<synchronous>, transform_indices = @transform_1, window_bounds = array<i64: 36, 64>}, {pipeline_mode = #tpu.pipeline_mode<synchronous>, transform_indices = @transform_2, window_bounds = array<i64: 1, 64>}, {pipeline_mode = #tpu.pipeline_mode<synchronous>, transform_indices = @transform_3, window_bounds = array<i64: 576, 64>}, {pipeline_mode = #tpu.pipeline_mode<synchronous>, transform_indices = @transform_4, window_bounds = array<i64: 1, 64>}, {transform_indices = @transform_5, window_bounds = array<i64: 1, 8, 512>}]} {
    %c0 = arith.constant 0 : index
    %c0_0 = arith.constant 0 : index
    %c0_1 = arith.constant 0 : index
    %0 = vector.load %arg1[%c0, %c0_0, %c0_1] : memref<1x256x36xbf16, #tpu.memory_space<vmem>>, vector<1x256x36xbf16>
    %1 = vector.shape_cast %0 : vector<1x256x36xbf16> to vector<256x36xbf16>
    %c0_2 = arith.constant 0 : index
    %c0_3 = arith.constant 0 : index
    %2 = vector.load %arg2[%c0_2, %c0_3] : memref<36x64xbf16, #tpu.memory_space<vmem>>, vector<36x64xbf16>
    %cst = arith.constant dense<0.000000e+00> : vector<256x64xf32>
    %3 = tpu.matmul %1, %2, %cst {dimension_numbers = #tpu.dot_dimension_numbers<[1], [0], [0], [1], [0, 0, 1, 1], [], []>} : vector<256x36xbf16>, vector<36x64xbf16>, vector<256x64xf32> -> vector<256x64xf32>
    %c0_4 = arith.constant 0 : index
    %c0_5 = arith.constant 0 : index
    %4 = vector.load %arg3[%c0_4, %c0_5] : memref<1x64xf32, #tpu.memory_space<vmem>>, vector<1x64xf32>
    %5 = vector.broadcast %4 : vector<1x64xf32> to vector<256x64xf32>
    %6 = arith.addf %3, %5 : vector<256x64xf32>
    %cst_6 = arith.constant 0.000000e+00 : f32
    %7 = vector.broadcast %cst_6 : f32 to vector<256x64xf32>
    %8 = arith.maximumf %6, %7 : vector<256x64xf32>
    %9 = vector.shape_cast %8 : vector<256x64xf32> to vector<1x16x16x64xf32>
    %cst_7 = arith.constant 0.000000e+00 : bf16
    %10 = vector.broadcast %cst_7 : bf16 to vector<1x48x64xbf16>
    %cst_8 = arith.constant 0.000000e+00 : bf16
    %11 = vector.broadcast %cst_8 : bf16 to vector<18x1x64xbf16>
    %c0_9 = arith.constant 0 : index
    %c0_10 = arith.constant 0 : index
    %c0_11 = arith.constant 0 : index
    %12 = vector.load %arg7[%c0_9, %c0_10, %c0_11] : memref<18x48x64xbf16, #tpu.memory_space<vmem>>, vector<1x48x64xbf16>
    tpu.vector_store %arg7[%c0_9, %c0_10, %c0_11], %10 {strides = array<i32>} : memref<18x48x64xbf16, #tpu.memory_space<vmem>>, vector<1x48x64xbf16>,
    %c17 = arith.constant 17 : index
    %c0_12 = arith.constant 0 : index
    %c0_13 = arith.constant 0 : index
    %13 = vector.load %arg7[%c17, %c0_12, %c0_13] : memref<18x48x64xbf16, #tpu.memory_space<vmem>>, vector<1x48x64xbf16>
    tpu.vector_store %arg7[%c17, %c0_12, %c0_13], %10 {strides = array<i32>} : memref<18x48x64xbf16, #tpu.memory_space<vmem>>, vector<1x48x64xbf16>,
    %c0_14 = arith.constant 0 : index
    %c15 = arith.constant 15 : index
    %c0_15 = arith.constant 0 : index
    %14 = vector.load %arg7[%c0_14, %c15, %c0_15] : memref<18x48x64xbf16, #tpu.memory_space<vmem>>, vector<18x1x64xbf16>
    tpu.vector_store %arg7[%c0_14, %c15, %c0_15], %11 {strides = array<i32>} : memref<18x48x64xbf16, #tpu.memory_space<vmem>>, vector<18x1x64xbf16>,
    %c0_16 = arith.constant 0 : index
    %c32 = arith.constant 32 : index
    %c0_17 = arith.constant 0 : index
    %15 = vector.load %arg7[%c0_16, %c32, %c0_17] : memref<18x48x64xbf16, #tpu.memory_space<vmem>>, vector<18x1x64xbf16>
    tpu.vector_store %arg7[%c0_16, %c32, %c0_17], %11 {strides = array<i32>} : memref<18x48x64xbf16, #tpu.memory_space<vmem>>, vector<18x1x64xbf16>,
    %16 = vector.shape_cast %9 : vector<1x16x16x64xf32> to vector<16x16x64xf32>
    %17 = arith.truncf %16 : vector<16x16x64xf32> to vector<16x16x64xbf16>
    %c1 = arith.constant 1 : index
    %c16 = arith.constant 16 : index
    %c0_18 = arith.constant 0 : index
    %18 = vector.load %arg7[%c1, %c16, %c0_18] : memref<18x48x64xbf16, #tpu.memory_space<vmem>>, vector<16x16x64xbf16>
    tpu.vector_store %arg7[%c1, %c16, %c0_18], %17 {strides = array<i32>} : memref<18x48x64xbf16, #tpu.memory_space<vmem>>, vector<16x16x64xbf16>,
    %c0_19 = arith.constant 0 : index
    %c15_20 = arith.constant 15 : index
    %c0_21 = arith.constant 0 : index
    %19 = vector.load %arg7[%c0_19, %c15_20, %c0_21] : memref<18x48x64xbf16, #tpu.memory_space<vmem>>, vector<16x16x64xbf16>
    %20 = vector.shape_cast %19 : vector<16x16x64xbf16> to vector<256x64xbf16>
    %c0_22 = arith.constant 0 : index
    %c16_23 = arith.constant 16 : index
    %c0_24 = arith.constant 0 : index
    %21 = vector.load %arg7[%c0_22, %c16_23, %c0_24] : memref<18x48x64xbf16, #tpu.memory_space<vmem>>, vector<16x16x64xbf16>
    %22 = vector.shape_cast %21 : vector<16x16x64xbf16> to vector<256x64xbf16>
    %c0_25 = arith.constant 0 : index
    %c17_26 = arith.constant 17 : index
    %c0_27 = arith.constant 0 : index
    %23 = vector.load %arg7[%c0_25, %c17_26, %c0_27] : memref<18x48x64xbf16, #tpu.memory_space<vmem>>, vector<16x16x64xbf16>
    %24 = vector.shape_cast %23 : vector<16x16x64xbf16> to vector<256x64xbf16>
    %c1_28 = arith.constant 1 : index
    %c15_29 = arith.constant 15 : index
    %c0_30 = arith.constant 0 : index
    %25 = vector.load %arg7[%c1_28, %c15_29, %c0_30] : memref<18x48x64xbf16, #tpu.memory_space<vmem>>, vector<16x16x64xbf16>
    %26 = vector.shape_cast %25 : vector<16x16x64xbf16> to vector<256x64xbf16>
    %c1_31 = arith.constant 1 : index
    %c16_32 = arith.constant 16 : index
    %c0_33 = arith.constant 0 : index
    %27 = vector.load %arg7[%c1_31, %c16_32, %c0_33] : memref<18x48x64xbf16, #tpu.memory_space<vmem>>, vector<16x16x64xbf16>
    %28 = vector.shape_cast %27 : vector<16x16x64xbf16> to vector<256x64xbf16>
    %c1_34 = arith.constant 1 : index
    %c17_35 = arith.constant 17 : index
    %c0_36 = arith.constant 0 : index
    %29 = vector.load %arg7[%c1_34, %c17_35, %c0_36] : memref<18x48x64xbf16, #tpu.memory_space<vmem>>, vector<16x16x64xbf16>
    %30 = vector.shape_cast %29 : vector<16x16x64xbf16> to vector<256x64xbf16>
    %c2 = arith.constant 2 : index
    %c15_37 = arith.constant 15 : index
    %c0_38 = arith.constant 0 : index
    %31 = vector.load %arg7[%c2, %c15_37, %c0_38] : memref<18x48x64xbf16, #tpu.memory_space<vmem>>, vector<16x16x64xbf16>
    %32 = vector.shape_cast %31 : vector<16x16x64xbf16> to vector<256x64xbf16>
    %c2_39 = arith.constant 2 : index
    %c16_40 = arith.constant 16 : index
    %c0_41 = arith.constant 0 : index
    %33 = vector.load %arg7[%c2_39, %c16_40, %c0_41] : memref<18x48x64xbf16, #tpu.memory_space<vmem>>, vector<16x16x64xbf16>
    %34 = vector.shape_cast %33 : vector<16x16x64xbf16> to vector<256x64xbf16>
    %c2_42 = arith.constant 2 : index
    %c17_43 = arith.constant 17 : index
    %c0_44 = arith.constant 0 : index
    %35 = vector.load %arg7[%c2_42, %c17_43, %c0_44] : memref<18x48x64xbf16, #tpu.memory_space<vmem>>, vector<16x16x64xbf16>
    %36 = vector.shape_cast %35 : vector<16x16x64xbf16> to vector<256x64xbf16>
    %37 = tpu.concatenate %20, %22, %24, %26, %28, %30, %32, %34, %36 in 1 : vector<256x64xbf16>, vector<256x64xbf16>, vector<256x64xbf16>, vector<256x64xbf16>, vector<256x64xbf16>, vector<256x64xbf16>, vector<256x64xbf16>, vector<256x64xbf16>, vector<256x64xbf16> -> vector<256x576xbf16>
    %c0_45 = arith.constant 0 : index
    %c0_46 = arith.constant 0 : index
    %38 = vector.load %arg4[%c0_45, %c0_46] : memref<576x64xbf16, #tpu.memory_space<vmem>>, vector<576x64xbf16>
    %cst_47 = arith.constant dense<0.000000e+00> : vector<256x64xf32>
    %39 = tpu.matmul %37, %38, %cst_47 {dimension_numbers = #tpu.dot_dimension_numbers<[1], [0], [0], [1], [0, 0, 1, 1], [], []>} : vector<256x576xbf16>, vector<576x64xbf16>, vector<256x64xf32> -> vector<256x64xf32>
    %c0_48 = arith.constant 0 : index
    %c0_49 = arith.constant 0 : index
    %40 = vector.load %arg5[%c0_48, %c0_49] : memref<1x64xf32, #tpu.memory_space<vmem>>, vector<1x64xf32>
    %41 = vector.broadcast %40 : vector<1x64xf32> to vector<256x64xf32>
    %42 = arith.addf %39, %41 : vector<256x64xf32>
    %cst_50 = arith.constant 0.000000e+00 : f32
    %43 = vector.broadcast %cst_50 : f32 to vector<256x64xf32>
    %44 = arith.maximumf %42, %43 : vector<256x64xf32>
    %45 = vector.shape_cast %44 : vector<256x64xf32> to vector<8x2x16x64xf32>
    %46 = vector.extract_strided_slice %45 {offsets = [0, 0, 0, 0], sizes = [8, 1, 16, 64], strides = [1, 1, 1, 1]} : vector<8x2x16x64xf32> to vector<8x1x16x64xf32>
    %47 = vector.shape_cast %46 : vector<8x1x16x64xf32> to vector<8x16x64xf32>
    %48 = vector.extract_strided_slice %45 {offsets = [0, 1, 0, 0], sizes = [8, 1, 16, 64], strides = [1, 1, 1, 1]} : vector<8x2x16x64xf32> to vector<8x1x16x64xf32>
    %49 = vector.shape_cast %48 : vector<8x1x16x64xf32> to vector<8x16x64xf32>
    %50 = arith.addf %47, %49 : vector<8x16x64xf32>
    %c0_51 = arith.constant 0 : index
    %c0_52 = arith.constant 0 : index
    %c0_53 = arith.constant 0 : index
    %51 = vector.load %arg8[%c0_51, %c0_52, %c0_53] : memref<8x16x64xf32, #tpu.memory_space<vmem>>, vector<8x16x64xf32>
    tpu.vector_store %arg8[%c0_51, %c0_52, %c0_53], %50 {strides = array<i32>} : memref<8x16x64xf32, #tpu.memory_space<vmem>>, vector<8x16x64xf32>,
    %c0_54 = arith.constant 0 : index
    %c0_55 = arith.constant 0 : index
    %c0_56 = arith.constant 0 : index
    %52 = vector.load %arg8[%c0_54, %c0_55, %c0_56] : memref<8x16x64xf32, #tpu.memory_space<vmem>>, vector<8x2x64xf32>
    %cst_57 = arith.constant dense<0.000000e+00> : vector<8x64xf32>
    %53 = vector.multi_reduction <add>, %52, %cst_57 [1] : vector<8x2x64xf32> to vector<8x64xf32>
    %c0_58 = arith.constant 0 : index
    %c2_59 = arith.constant 2 : index
    %c0_60 = arith.constant 0 : index
    %54 = vector.load %arg8[%c0_58, %c2_59, %c0_60] : memref<8x16x64xf32, #tpu.memory_space<vmem>>, vector<8x2x64xf32>
    %cst_61 = arith.constant dense<0.000000e+00> : vector<8x64xf32>
    %55 = vector.multi_reduction <add>, %54, %cst_61 [1] : vector<8x2x64xf32> to vector<8x64xf32>
    %c0_62 = arith.constant 0 : index
    %c4 = arith.constant 4 : index
    %c0_63 = arith.constant 0 : index
    %56 = vector.load %arg8[%c0_62, %c4, %c0_63] : memref<8x16x64xf32, #tpu.memory_space<vmem>>, vector<8x2x64xf32>
    %cst_64 = arith.constant dense<0.000000e+00> : vector<8x64xf32>
    %57 = vector.multi_reduction <add>, %56, %cst_64 [1] : vector<8x2x64xf32> to vector<8x64xf32>
    %c0_65 = arith.constant 0 : index
    %c6 = arith.constant 6 : index
    %c0_66 = arith.constant 0 : index
    %58 = vector.load %arg8[%c0_65, %c6, %c0_66] : memref<8x16x64xf32, #tpu.memory_space<vmem>>, vector<8x2x64xf32>
    %cst_67 = arith.constant dense<0.000000e+00> : vector<8x64xf32>
    %59 = vector.multi_reduction <add>, %58, %cst_67 [1] : vector<8x2x64xf32> to vector<8x64xf32>
    %c0_68 = arith.constant 0 : index
    %c8 = arith.constant 8 : index
    %c0_69 = arith.constant 0 : index
    %60 = vector.load %arg8[%c0_68, %c8, %c0_69] : memref<8x16x64xf32, #tpu.memory_space<vmem>>, vector<8x2x64xf32>
    %cst_70 = arith.constant dense<0.000000e+00> : vector<8x64xf32>
    %61 = vector.multi_reduction <add>, %60, %cst_70 [1] : vector<8x2x64xf32> to vector<8x64xf32>
    %c0_71 = arith.constant 0 : index
    %c10 = arith.constant 10 : index
    %c0_72 = arith.constant 0 : index
    %62 = vector.load %arg8[%c0_71, %c10, %c0_72] : memref<8x16x64xf32, #tpu.memory_space<vmem>>, vector<8x2x64xf32>
    %cst_73 = arith.constant dense<0.000000e+00> : vector<8x64xf32>
    %63 = vector.multi_reduction <add>, %62, %cst_73 [1] : vector<8x2x64xf32> to vector<8x64xf32>
    %c0_74 = arith.constant 0 : index
    %c12 = arith.constant 12 : index
    %c0_75 = arith.constant 0 : index
    %64 = vector.load %arg8[%c0_74, %c12, %c0_75] : memref<8x16x64xf32, #tpu.memory_space<vmem>>, vector<8x2x64xf32>
    %cst_76 = arith.constant dense<0.000000e+00> : vector<8x64xf32>
    %65 = vector.multi_reduction <add>, %64, %cst_76 [1] : vector<8x2x64xf32> to vector<8x64xf32>
    %c0_77 = arith.constant 0 : index
    %c14 = arith.constant 14 : index
    %c0_78 = arith.constant 0 : index
    %66 = vector.load %arg8[%c0_77, %c14, %c0_78] : memref<8x16x64xf32, #tpu.memory_space<vmem>>, vector<8x2x64xf32>
    %cst_79 = arith.constant dense<0.000000e+00> : vector<8x64xf32>
    %67 = vector.multi_reduction <add>, %66, %cst_79 [1] : vector<8x2x64xf32> to vector<8x64xf32>
    %68 = tpu.concatenate %53, %55, %57, %59, %61, %63, %65, %67 in 1 : vector<8x64xf32>, vector<8x64xf32>, vector<8x64xf32>, vector<8x64xf32>, vector<8x64xf32>, vector<8x64xf32>, vector<8x64xf32>, vector<8x64xf32> -> vector<8x512xf32>
    %cst_80 = arith.constant 2.500000e-01 : f32
    %69 = vector.broadcast %cst_80 : f32 to vector<8x512xf32>
    %70 = arith.mulf %68, %69 : vector<8x512xf32>
    %c0_81 = arith.constant 0 : index
    %c0_82 = arith.constant 0 : index
    %c0_83 = arith.constant 0 : index
    %71 = vector.load %arg6[%c0_81, %c0_82, %c0_83] : memref<1x8x512xf32, #tpu.memory_space<vmem>>, vector<1x8x512xf32>
    %72 = vector.shape_cast %71 : vector<1x8x512xf32> to vector<8x512xf32>
    %73 = vector.shape_cast %70 : vector<8x512xf32> to vector<1x8x512xf32>
    tpu.vector_store %arg6[%c0_81, %c0_82, %c0_83], %73 {strides = array<i32>} : memref<1x8x512xf32, #tpu.memory_space<vmem>>, vector<1x8x512xf32>,
    return
  }
  func.func @transform_0(%arg0: i32) -> (i32, i32, i32) {
    %c0_i32 = arith.constant 0 : i32
    %c0_i32_0 = arith.constant 0 : i32
    %c0_i32_1 = arith.constant 0 : i32
    return %arg0, %c0_i32, %c0_i32_0 : i32, i32, i32
  }
  func.func @transform_1(%arg0: i32) -> (i32, i32) {
    %c0_i32 = arith.constant 0 : i32
    %c0_i32_0 = arith.constant 0 : i32
    %c0_i32_1 = arith.constant 0 : i32
    return %c0_i32, %c0_i32_0 : i32, i32
  }
  func.func @transform_2(%arg0: i32) -> (i32, i32) {
    %c0_i32 = arith.constant 0 : i32
    %c0_i32_0 = arith.constant 0 : i32
    %c0_i32_1 = arith.constant 0 : i32
    return %c0_i32, %c0_i32_0 : i32, i32
  }
  func.func @transform_3(%arg0: i32) -> (i32, i32) {
    %c0_i32 = arith.constant 0 : i32
    %c0_i32_0 = arith.constant 0 : i32
    %c0_i32_1 = arith.constant 0 : i32
    return %c0_i32, %c0_i32_0 : i32, i32
  }
  func.func @transform_4(%arg0: i32) -> (i32, i32) {
    %c0_i32 = arith.constant 0 : i32
    %c0_i32_0 = arith.constant 0 : i32
    %c0_i32_1 = arith.constant 0 : i32
    return %c0_i32, %c0_i32_0 : i32, i32
  }
  func.func @transform_5(%arg0: i32) -> (i32, i32, i32) {
    %c0_i32 = arith.constant 0 : i32
    %c0_i32_0 = arith.constant 0 : i32
    %c0_i32_1 = arith.constant 0 : i32
    return %arg0, %c0_i32, %c0_i32_0 : i32, i32, i32
  }
}

</mosaic_0001>

<bundles_post_ra>
// kernel: conv_block_forward.1
= control target key start
LH: loop header
LB: loop body
LE: loop exit
PB: predicated region body
PF: predicated region fallthrough
CT: control target
= control target key end

     0   :  { %s6236_s18 = smov 0   ;;  %s9327_s0 = inlined_call_operand.vmem [shape: bf16[2,256,36], index: 0, kind: input, shape index: {}]   ;;  %s9328_s1 = inlined_call_operand.vmem [shape: bf16[36,64], index: 1, kind: input, shape index: {}]   ;;  %s9329_s2 = inlined_call_operand.vmem [shape: f32[1,64], index: 2, kind: input, shape index: {}]   ;;  %s9330_s3 = inlined_call_operand.vmem [shape: bf16[576,64], index: 3, kind: input, shape index: {}]   ;;  %s9331_s4 = inlined_call_operand.vmem [shape: f32[1,64], index: 4, kind: input, shape index: {}]   ;;  %s9332_s5 = inlined_call_operand.vmem [shape: f32[2,8,512], index: 5, kind: output, shape index: {}]  }
   0x1 LB: > { %s5352_s19 = sadd.s32 4294967295, %s6202_s18   ;;  %p5356_p0 = scmp.ge.s32.totalorder %s6202_s18, 1  ;;  %s6202_s18 = sphi %s6236_s18, %s15_s18  }
   0x2   : > { %p187_p1 = scmp.lt.s32.totalorder %s6202_s18, 3 }
   0x4   : > { %p188_p2 = pnand %p5356_p0, %p187_p1 }
   0x6   : > { %191 = sbr.rel (%p188_p2) target bundleno = 1042 (0x412), region = 40 }
   0xb   : > { %v6070_v0 = vld [vmem:[%s9328_s1 + $0x10] ss:$0 sps:$4 sm:$0x33]   ;;  %vm414_vm0 = vcmask 1041408   ;;  %v6071_v1 = vld [vmem:[%s9328_s1 + $0x8] sm:$0xff]   ;;  %p215_p3 = scmp.lt.s32.totalorder %s5352_s19, 1 }
   0xc   : > { %6059 = vmatprep.subr.msk.bf16.mxu0 %vm414_vm0, %v6070_v0  ;;  %v416_v2 = vsel %vm414_vm0, %v6070_v0, 0  ;;  %v6072_v3 = vld [vmem:[%s9328_s1] sm:$0xff]   ;;  %vm365_vm1 = vcmask 293888   ;;  %vm625_vm2 = vcmask 519171   ;;  %vm626_vm3 = vsmask.f32 7950 }
   0xd   : > { %5974 = vmatpush3.bf16.msra.mxu0 %v416_v2  ;;  %s10065_s19 = smov (!%p215_p3, %s5352_s19), 1  ;;  %vm6293_vm4 = vmand %vm625_vm2, %vm626_vm3  ;;  %v9484_v20 = vmov 0  ;;  %v634_v21 = vld [vmem:[#allocation2 + $0x34] sm:$0x8]  ;;  %v631_v23 = vld [vmem:[#allocation2 + $0x1c] sm:$0x8] }
   0xe   : > { %5975 = vmatprep.subr.bf16.mxu0 %v6071_v1  ;;  %s5676_s26 = sshll.u32 %s10065_s19, 7  ;;  %v9485_v20 = vsel %vm6293_vm4, 4294967295, %v9484_v20  ;;  %v635_v22 = vsel %vm6293_vm4, 0, %v634_v21  ;;  %v632_v24 = vsel %vm6293_vm4, 0, %v631_v23  ;;  %vm683_vm5 = vsmask.f32 256 }
   0xf   : > { %s6259_s29 = scalar_lea.vmem %s9327_s0, %s5676_s26  ;;  %9486 = vst [vmem:[#allocation4_spill] sm:$0xff] %v9485_v20  ;;  %636 = vst [vmem:[#allocation2 + $0x34] sm:$0x8] %v635_v22  ;;  %vm682_vm6 = vcmask 516096   ;;  %v9487_v25 = vmov 0  ;;  %vm611_vm8 = vcmask 519168  }
  0x10   : > { %v6073_v4 = vld [vmem:[%s6259_s29] sm:$0xff]   ;;  %v6074_v5 = vld [vmem:[%s6259_s29 + $0x8] sm:$0xff]   ;;  %v6075_v6 = vld [vmem:[%s6259_s29 + $0x10] sm:$0xff]   ;;  %633 = vst [vmem:[#allocation2 + $0x1c] sm:$0x8] %v632_v24  ;;  %v6204_v28 = vmov 0  }
  0x11   : > { %5976 = vmatpush3.bf16.msra.mxu0 %v6071_v1  ;;  %5979 = vmatprep.mubr.msk.bf16.mxu0 %vm365_vm1, %v6073_v4  ;;  %v6076_v7 = vld [vmem:[%s6259_s29 + $0x18] sm:$0xff]   ;;  %v6077_v8 = vld [vmem:[%s6259_s29 + $0x20] sm:$0xff]   ;;  %v6078_v9 = vld [vmem:[%s6259_s29 + $0x28] sm:$0xff]   ;;  %614 = vst.msk [vmem:[#allocation2 + $0x8] sm:$0xf] %vm611_vm8, %v6204_v28  ;;  %s6205_s7 = smov 64  }
  0x12   : > { %5977 = vmatprep.subr.bf16.mxu0 %v6072_v3  ;;  %v6079_v10 = vld [vmem:[%s6259_s29 + $0x30] sm:$0xff]   ;;  %v6080_v11 = vld [vmem:[%s6259_s29 + $0x38] sm:$0xff]   ;;  %v6081_v12 = vld [vmem:[%s6259_s29 + $0x40] sm:$0xff]   ;;  %615 = vst.msk [vmem:[#allocation2 + $0xc] sm:$0xf] %vm611_vm8, %v6204_v28  ;;  %vm3482_vm14 = vcmask 523264  }
  0x13   : > { %v6082_v13 = vld [vmem:[%s6259_s29 + $0x48] sm:$0xff]   ;;  %v6083_v14 = vld [vmem:[%s6259_s29 + $0x50] sm:$0xff]   ;;  %v6084_v15 = vld [vmem:[%s6259_s29 + $0x58] sm:$0xff]   ;;  %613 = vst.msk [vmem:[#allocation2 + $0x4] sm:$0xf] %vm611_vm8, %v6204_v28  ;;  %vm4637_vm15 = vcmask 517120  }
  0x14   : > { %v6085_v16 = vld [vmem:[%s6259_s29 + $0x60] sm:$0xff]   ;;  %v6086_v17 = vld [vmem:[%s6259_s29 + $0x68] sm:$0xff]   ;;  %v6087_v18 = vld [vmem:[%s6259_s29 + $0x70] sm:$0xff]   ;;  %616 = vst.msk [vmem:[#allocation2 + $0x10] sm:$0xf] %vm611_vm8, %v6204_v28  ;;  %vm5150_vm0 = vcmask 1041409  }
  0x15   : > { %5978 = vmatpush3.bf16.msra.mxu0 %v6072_v3  ;;  %v6088_v19 = vld [vmem:[%s6259_s29 + $0x78] sm:$0xff]   ;;  %vm6302_vm7 = vmand %vm682_vm6, %vm683_vm5  ;;  %v688_v26 = vld [vmem:[#allocation2 + $0x28] sm:$0x1]  ;;  %620 = vst.msk [vmem:[#allocation2 + $0x19c] sm:$0xf] %vm611_vm8, %v6204_v28  ;;  %vm5154_vm2 = vcmask 1043459  }
  0x16   : > { %v9488_v25 = vsel %vm6302_vm7, 4294967295, %v9487_v25  ;;  %v689_v27 = vsel %vm6302_vm7, 0, %v688_v26  ;;  %621 = vst.msk [vmem:[#allocation2 + $0x1a0] sm:$0xf] %vm611_vm8, %v6204_v28  ;;  %622 = vst.msk [vmem:[#allocation2 + $0x1a4] sm:$0xf] %vm611_vm8, %v6204_v28 }
  0x17   : > { %9489 = vst [vmem:[#allocation5_spill] sm:$0xff] %v9488_v25  ;;  %690 = vst [vmem:[#allocation2 + $0x28] sm:$0x1] %v689_v27  ;;  %v637_v29 = vld [vmem:[#allocation2 + $0x4c] sm:$0x8]  ;;  %vm5156_vm3 = vcmask 1044484  }
  0x18   : > { %5980 = vmatmul.mubr.msk.bf16.vlgmr.msra.gmra.mxu0 %vm365_vm1, %v6074_v5  ;;  %623 = vst.msk [vmem:[#allocation2 + $0x1a8] sm:$0xf] %vm611_vm8, %v6204_v28  ;;  %v638_v30 = vsel %vm6293_vm4, 0, %v637_v29  ;;  %v640_v31 = vld [vmem:[#allocation2 + $0x64] sm:$0x8]  ;;  %vm5162_vm6 = vcmask 1047559  }
  0x19   : > { %5983 = vmatprep.mubr.msk.bf16.mxu0 %vm365_vm1, %v6075_v6  ;;  %639 = vst [vmem:[#allocation2 + $0x4c] sm:$0x8] %v638_v30  ;;  %v641_v32 = vsel %vm6293_vm4, 0, %v640_v31  ;;  %v643_v33 = vld [vmem:[#allocation2 + $0x7c] sm:$0x8] }
  0x1a   : > { %642 = vst [vmem:[#allocation2 + $0x64] sm:$0x8] %v641_v32  ;;  %v644_v34 = vsel %vm6293_vm4, 0, %v643_v33  ;;  %v646_v35 = vld [vmem:[#allocation2 + $0x94] sm:$0x8] }
  0x1b   : > { %645 = vst [vmem:[#allocation2 + $0x7c] sm:$0x8] %v644_v34  ;;  %v647_v36 = vsel %vm6293_vm4, 0, %v646_v35  ;;  %v691_v37 = vld [vmem:[#allocation2 + $0x40] sm:$0x1] }
  0x1c   : > { %648 = vst [vmem:[#allocation2 + $0x94] sm:$0x8] %v647_v36  ;;  %v692_v38 = vsel %vm6302_vm7, 0, %v691_v37  ;;  %v649_v39 = vld [vmem:[#allocation2 + $0xac] sm:$0x8] }
  0x1d   : > { %693 = vst [vmem:[#allocation2 + $0x40] sm:$0x1] %v692_v38  ;;  %v650_v40 = vsel %vm6293_vm4, 0, %v649_v39  ;;  %v694_v41 = vld [vmem:[#allocation2 + $0x58] sm:$0x1] }
  0x1e   : > { %651 = vst [vmem:[#allocation2 + $0xac] sm:$0x8] %v650_v40  ;;  %v695_v42 = vsel %vm6302_vm7, 0, %v694_v41  ;;  %v697_v43 = vld [vmem:[#allocation2 + $0x70] sm:$0x1] }
  0x1f   : > { %696 = vst [vmem:[#allocation2 + $0x58] sm:$0x1] %v695_v42  ;;  %v698_v44 = vsel %vm6302_vm7, 0, %v697_v43  ;;  %v652_v45 = vld [vmem:[#allocation2 + $0xc4] sm:$0x8] }
  0x20   : > { %5984 = vmatmul.mubr.msk.bf16.gmra.mxu0 %vm365_vm1, %v6076_v7  ;;  %699 = vst [vmem:[#allocation2 + $0x70] sm:$0x1] %v698_v44  ;;  %v653_v46 = vsel %vm6293_vm4, 0, %v652_v45  ;;  %v655_v47 = vld [vmem:[#allocation2 + $0xdc] sm:$0x8] }
  0x21   : > { %5987 = vmatprep.mubr.msk.bf16.mxu0 %vm365_vm1, %v6077_v8  ;;  %654 = vst [vmem:[#allocation2 + $0xc4] sm:$0x8] %v653_v46  ;;  %v656_v48 = vsel %vm6293_vm4, 0, %v655_v47  ;;  %v700_v49 = vld [vmem:[#allocation2 + $0x88] sm:$0x1] }
  0x22   : > { %657 = vst [vmem:[#allocation2 + $0xdc] sm:$0x8] %v656_v48  ;;  %v701_v50 = vsel %vm6302_vm7, 0, %v700_v49  ;;  %v703_v51 = vld [vmem:[#allocation2 + $0xa0] sm:$0x1] }
  0x23   : > { %702 = vst [vmem:[#allocation2 + $0x88] sm:$0x1] %v701_v50  ;;  %v704_v52 = vsel %vm6302_vm7, 0, %v703_v51  ;;  %v1548_v53 = vld [vmem:[#allocation2 + $0x34] sm:$0x8] }
  0x24   : > { %705 = vst [vmem:[#allocation2 + $0xa0] sm:$0x1] %v704_v52  ;;  %v1545_v54 = vld [vmem:[#allocation2 + $0x1c] sm:$0x8]  ;;  %v658_v55 = vld [vmem:[#allocation2 + $0xf4] sm:$0x8] }
  0x25   : > { %v1616_v56 = vshrl.u32 %v1548_v53, 16  ;;  %v659_v57 = vsel %vm6293_vm4, 0, %v658_v55  ;;  %v1594_v58 = vshrl.u32 %v1545_v54, 16  ;;  %v6342_v59 = vld [vmem:[#allocation2 + $0x8] sm:$0xf] }
  0x26   : > { %660 = vst [vmem:[#allocation2 + $0xf4] sm:$0x8] %v659_v57  ;;  %v6344_v60 = vld [vmem:[#allocation2 + $0xc] sm:$0xf]  ;;  %v6349_v61 = vld [vmem:[%s9329_s2] ss:$0 sm:$0xff] }
  0x27   : > { %v6351_v62 = vrot.slane %v1616_v56, 11  ;;  %v956_v63 = vshrl.u32 %v6342_v59, 16  ;;  %v965_v0 = vshrl.u32 %v6344_v60, 16  ;;  %v1551_v1 = vld [vmem:[#allocation2 + $0x4c] sm:$0x8]  ;;  %v6355_v5 = vrot.slane %v1594_v58, 11 }
  0x28   : > { %5988 = vmatmul.mubr.msk.bf16.gmra.mxu0 %vm365_vm1, %v6078_v9  ;;  %v1554_v2 = vld [vmem:[#allocation2 + $0x64] sm:$0x8]  ;;  %v1557_v3 = vld [vmem:[#allocation2 + $0x7c] sm:$0x8]  ;;  %v959_v6 = vshll.u32 %v6342_v59, 16  ;;  %v5493_v47 = vcombine.low %v6342_v59, %v6344_v60 }
  0x29   : > { %5991 = vmatprep.mubr.msk.bf16.mxu0 %vm365_vm1, %v6079_v10  ;;  %v1560_v7 = vld [vmem:[#allocation2 + $0x94] sm:$0x8]  ;;  %v1945_v8 = vld [vmem:[#allocation2 + $0x28] sm:$0x1]  ;;  %v6359_v10 = vrot.slane %v956_v63, 7  ;;  %v6370_v34 = vrot.slane %v965_v0, 4 }
  0x2a   : > { %v1704_v22 = vshrl.u32 %v1560_v7, 16  ;;  %v1563_v23 = vld [vmem:[#allocation2 + $0xac] sm:$0x8]  ;;  %v6365_v27 = vrot.slane %v959_v6, 5  ;;  %v1971_v28 = vshll.u32 %v1945_v8, 16 }
  0x2b   : > { %v661_v24 = vld [vmem:[#allocation2 + $0x10c] sm:$0x8]  ;;  %v1726_v39 = vshrl.u32 %v1563_v23, 16  ;;  %v2587_v40 = vld [vmem:[#allocation2 + $0x58] sm:$0x1] }
  0x2c   : > { %v662_v30 = vsel %vm6293_vm4, 0, %v661_v24  ;;  %v6380_v44 = vrot.slane %v1704_v22, 11  ;;  %v1947_v45 = vld [vmem:[#allocation2 + $0x58] sm:$0x1]  ;;  %v6384_v48 = vrot.slane %v1971_v28, 5  ;;  %v2626_v55 = vshll.u32 %v2587_v40, 16 }
  0x2d   : > { %663 = vst [vmem:[#allocation2 + $0x10c] sm:$0x8] %v662_v30  ;;  %v1566_v50 = vld [vmem:[#allocation2 + $0xc4] sm:$0x8]  ;;  %v1948_v51 = vld [vmem:[#allocation2 + $0x70] sm:$0x1] }
  0x2e   : > { %v1569_v56 = vld [vmem:[#allocation2 + $0xdc] sm:$0x8]  ;;  %v2589_v57 = vld [vmem:[#allocation2 + $0x88] sm:$0x1]  ;;  %vm948_vm9 = vsmask.f32 4368 }
  0x2f   : > { %v6405_v24 = vrot.slane %v2626_v55, 5  ;;  %vm6455_vm10 = vmor %vm683_vm5, %vm948_vm9  ;;  %vm1318_vm11 = vsmask.f32 3328  ;;  %vm1319_vm12 = vsmask.f32 7440  ;;  %vm5160_vm5 = vcmask 1046534  }
  0x30   : > { %5992 = vmatmul.mubr.msk.bf16.gmra.mxu0 %vm365_vm1, %v6080_v11  ;;  %v967_v11 = vrot.slane %v965_v0, 7  ;;  %vm6714_vm13 = vmor %vm1318_vm11, %vm1319_vm12 }
  0x31   : > { %5995 = vmatprep.mubr.msk.bf16.mxu0 %vm365_vm1, %v6081_v12  ;;  %v9333_v12 = vshll.u32 %v6344_v60, 16 }
  0x33   : > { %v6395_v0 = vor.u32 %v9333_v12, %v967_v11  ;;  %v1748_v11 = vshrl.u32 %v1566_v50, 16 }
  0x34   : > { %v6428_v55 = vld [vmem:[#allocation2 + $0x10c] sm:$0x8] }
  0x35   : > { %9491 = vst [vmem:[#allocation7_spill] sm:$0xff] %v6395_v0 }
  0x38   : > { %5996 = vmatmul.mubr.msk.bf16.gmra.mxu0 %vm365_vm1, %v6082_v13  ;;  %v1946_v13 = vld [vmem:[#allocation2 + $0x40] sm:$0x1] }
  0x39   : > { %5999 = vmatprep.mubr.msk.bf16.mxu0 %vm365_vm1, %v6083_v14  ;;  %v1985_v29 = vshll.u32 %v1946_v13, 16  ;;  %v1572_v13 = vld [vmem:[#allocation2 + $0xf4] sm:$0x8] }
  0x3a   : > { %v1792_v30 = vshrl.u32 %v1572_v13, 16 }
  0x3b   : > { %v6386_v49 = vrot.slane %v1985_v29, 5 }
  0x40   : > { %6000 = vmatmul.mubr.msk.bf16.gmra.mxu0 %vm365_vm1, %v6084_v15  ;;  %v6362_v15 = vrot.slane %v956_v63, 4  ;;  %v6391_v63 = vor.u32 %v959_v6, %v6359_v10 }
  0x41   : > { %6003 = vmatprep.mubr.msk.bf16.mxu0 %vm365_vm1, %v6085_v16  ;;  %v1638_v16 = vshrl.u32 %v1551_v1, 16  ;;  %v6397_v1 = vrot.slane %v1726_v39, 11 }
  0x42   : > { %9490 = vst [vmem:[#allocation6_spill] sm:$0xff] %v6391_v63 }
  0x43   : > { %v6372_v36 = vrot.slane %v1638_v16, 11 }
  0x48   : > { %6004 = vmatmul.mubr.msk.bf16.gmra.mxu0 %vm365_vm1, %v6086_v17  ;;  %v1660_v17 = vshrl.u32 %v1554_v2, 16  ;;  %v1999_v2 = vshll.u32 %v1947_v45, 16 }
  0x49   : > { %6007 = vmatprep.mubr.msk.bf16.mxu0 %vm365_vm1, %v6087_v18  ;;  %v1682_v18 = vshrl.u32 %v1557_v3, 16  ;;  %v1949_v3 = vld [vmem:[#allocation2 + $0x88] sm:$0x1] }
  0x4a   : > { %v6374_v37 = vrot.slane %v1660_v17, 11  ;;  %v1770_v17 = vshrl.u32 %v1569_v56, 16  ;;  %v6409_v29 = vrot.slane %v1999_v2, 5  ;;  %v6433_v2 = vrot.slane %v1792_v30, 11 }
  0x4b   : > { %v6376_v38 = vrot.slane %v1682_v18, 11  ;;  %v2013_v18 = vshll.u32 %v1948_v51, 16 }
  0x4c   : > { %v6418_v45 = vrot.slane %v1770_v17, 11 }
  0x50   : > { %6008 = vmatmul.mubr.msk.bf16.gmra.mxu0 %vm365_vm1, %v6088_v19  ;;  %vm5152_vm1 = vcmask 1042434  }
  0xd8   : > { %v5981_v4 = vpop.f32.mrf.mxu0 }
  0xd9   : > { %v461_v9 = vadd.f32 %v5981_v4, %v6349_v61  ;;  %v706_v4 = vld [vmem:[#allocation2 + $0xb8] sm:$0x1] }
  0xda   : > { %v452_v14 = vpop.f32.mrf.mxu0  ;;  %v707_v6 = vsel %vm6302_vm7, 0, %v706_v4 }
  0xdb   : > { %v581_v19 = vmax.f32 %v461_v9, 0.0  ;;  %v453_v21 = vadd.f32 %v6349_v61, %v452_v14  ;;  %v1950_v14 = vld [vmem:[#allocation2 + $0xa0] sm:$0x1]  ;;  %708 = vst [vmem:[#allocation2 + $0xb8] sm:$0x1] %v707_v6 }
  0xdc   : > { %v5982_v26 = vpop.f32.mrf.mxu0 }
  0xdd   : > { %v5680_v31 = vpack.c.bf16 %v581_v19, %v581_v19  ;;  %v579_v32 = vmax.f32 %v453_v21, 0.0  ;;  %v464_v33 = vadd.f32 %v5982_v26, %v6349_v61  ;;  %v2654_v19 = vshll.u32 %v2589_v57, 16 }
  0xde   : > { %v455_v35 = vpop.f32.mrf.mxu0 }
  0xdf   : > { %870 = vst.msk [vmem:[#allocation2 + $0x38] sm:$0xf] %vm611_vm8, %v5680_v31  ;;  %v5678_v41 = vpack.c.bf16 %v579_v32, %v579_v32  ;;  %v582_v42 = vmax.f32 %v464_v33, 0.0  ;;  %v456_v43 = vadd.f32 %v6349_v61, %v455_v35  ;;  %v2027_v31 = vshll.u32 %v1949_v3, 16 }
  0xe0   : > { %v5985_v46 = vpop.f32.mrf.mxu0  ;;  %v2041_v32 = vshll.u32 %v1950_v14, 16  ;;  %v6422_v50 = vrot.slane %v2654_v19, 5 }
  0xe1   : > { %868 = vst.msk [vmem:[#allocation2 + $0x20] sm:$0xf] %vm611_vm8, %v5678_v41  ;;  %v5681_v52 = vpack.c.bf16 %v582_v42, %v582_v42  ;;  %v580_v53 = vmax.f32 %v456_v43, 0.0  ;;  %v477_v54 = vadd.f32 %v5985_v46, %v6349_v61  ;;  %v6416_v43 = vrot.slane %v1748_v11, 11 }
  0xe2   : > { %v468_v58 = vpop.f32.mrf.mxu0  ;;  %v6420_v46 = vrot.slane %v2013_v18, 5  ;;  %v6435_v3 = vrot.slane %v2027_v31, 5  ;;  %v6437_v4 = vrot.slane %v2041_v32, 5 }
  0xe3   : > { %871 = vst.msk [vmem:[#allocation2 + $0x3c] sm:$0xf] %vm611_vm8, %v5681_v52  ;;  %v5679_v7 = vpack.c.bf16 %v580_v53, %v580_v53  ;;  %v585_v8 = vmax.f32 %v477_v54, 0.0  ;;  %v469_v9 = vadd.f32 %v6349_v61, %v468_v58 }
  0xe4   : > { %v5986_v16 = vpop.f32.mrf.mxu0 }
  0xe5   : > { %869 = vst.msk [vmem:[#allocation2 + $0x24] sm:$0xf] %vm611_vm8, %v5679_v7  ;;  %v5684_v21 = vpack.c.bf16 %v585_v8, %v585_v8  ;;  %v583_v22 = vmax.f32 %v469_v9, 0.0  ;;  %v480_v23 = vadd.f32 %v5986_v16, %v6349_v61 }
  0xe6   : > { %v471_v26 = vpop.f32.mrf.mxu0  ;;  %v6407_v28 = vld [vmem:[#allocation2 + $0x38] sm:$0xf] }
  0xe7   : > { %874 = vst.msk [vmem:[#allocation2 + $0x68] sm:$0xf] %vm611_vm8, %v5684_v21  ;;  %v5682_v33 = vpack.c.bf16 %v583_v22, %v583_v22  ;;  %v586_v35 = vmax.f32 %v480_v23, 0.0  ;;  %v472_v39 = vadd.f32 %v6349_v61, %v471_v26  ;;  %v9336_v40 = vshrl.u32 %v6407_v28, 16 }
  0xe8   : > { %v5989_v41 = vpop.f32.mrf.mxu0  ;;  %v6414_v42 = vld [vmem:[#allocation2 + $0x20] sm:$0xf]  ;;  %v1624_v13 = vshll.u32 %v6407_v28, 16 }
  0xe9   : > { %872 = vst.msk [vmem:[#allocation2 + $0x50] sm:$0xf] %vm611_vm8, %v5682_v33  ;;  %v5685_v51 = vpack.c.bf16 %v586_v35, %v586_v35  ;;  %v584_v52 = vmax.f32 %v472_v39, 0.0  ;;  %v493_v53 = vadd.f32 %v5989_v41, %v6349_v61  ;;  %v1623_v54 = vrot.slane %v9336_v40, 7  ;;  %v6442_v14 = vld [vmem:[#allocation2 + $0x20] sm:$0xf] }
  0xea   : > { %v484_v56 = vpop.f32.mrf.mxu0  ;;  %v6430_v57 = vld [vmem:[#allocation2 + $0x3c] sm:$0xf]  ;;  %v9339_v58 = vshrl.u32 %v6414_v42, 16  ;;  %v1602_v18 = vshll.u32 %v6414_v42, 16  ;;  %v978_v39 = vshrl.u32 %v6442_v14, 16 }
  0xeb   : > { %875 = vst.msk [vmem:[#allocation2 + $0x6c] sm:$0xf] %vm611_vm8, %v5685_v51  ;;  %v5683_v7 = vpack.c.bf16 %v584_v52, %v584_v52  ;;  %v589_v8 = vmax.f32 %v493_v53, 0.0  ;;  %v485_v9 = vadd.f32 %v6349_v61, %v484_v56  ;;  %v9334_v16 = vshrl.u32 %v6430_v57, 16 }
  0xec   : > { %v5990_v6 = vpop.f32.mrf.mxu0  ;;  %v6445_v11 = vld [vmem:[#allocation2 + $0x24] sm:$0xf]  ;;  %v1601_v17 = vrot.slane %v9339_v58, 7  ;;  %v1626_v26 = vor.u32 %v1624_v13, %v1623_v54  ;;  %v9335_v33 = vshll.u32 %v6430_v57, 16  ;;  %v1628_v53 = vrot.slane %v1623_v54, 4 }
  0xed   : > { %873 = vst.msk [vmem:[#allocation2 + $0x54] sm:$0xf] %vm611_vm8, %v5683_v7  ;;  %v5688_v21 = vpack.c.bf16 %v589_v8, %v589_v8  ;;  %v587_v22 = vmax.f32 %v485_v9, 0.0  ;;  %v496_v23 = vadd.f32 %v5990_v6, %v6349_v61  ;;  %v1632_v32 = vrot.slane %v9334_v16, 7  ;;  %v905_v56 = vld [vmem:[#allocation2 + $0x24] sm:$0xf] }
  0xee   : > { %v487_v30 = vpop.f32.mrf.mxu0  ;;  %v9337_v35 = vshrl.u32 %v6445_v11, 16  ;;  %v1604_v9 = vor.u32 %v1602_v18, %v1601_v17  ;;  %v9338_v12 = vshll.u32 %v6445_v11, 16  ;;  %v1627_v54 = vsel %vm6455_vm10, %v6351_v62, %v1626_v26 }
  0xef   : > { %878 = vst.msk [vmem:[#allocation2 + $0x98] sm:$0xf] %vm611_vm8, %v5688_v21  ;;  %v5686_v41 = vpack.c.bf16 %v587_v22, %v587_v22  ;;  %v590_v51 = vmax.f32 %v496_v23, 0.0  ;;  %v488_v52 = vadd.f32 %v6349_v61, %v487_v30  ;;  %v1635_v7 = vor.u32 %v9335_v33, %v1632_v32  ;;  %v6478_v30 = vld [vmem:[#allocation2 + $0x38] sm:$0xf] }
  0xf0   : > { %v5993_v8 = vpop.f32.mrf.mxu0  ;;  %v1610_v6 = vrot.slane %v9337_v35, 7  ;;  %v1606_v16 = vrot.slane %v1601_v17, 4  ;;  %v987_v40 = vshrl.u32 %v905_v56, 16  ;;  %v1605_v26 = vsel %vm6455_vm10, %v6355_v5, %v1604_v9 }
  0xf1   : > { %876 = vst.msk [vmem:[#allocation2 + $0x80] sm:$0xf] %vm611_vm8, %v5686_v41  ;;  %v5689_v21 = vpack.c.bf16 %v590_v51, %v590_v51  ;;  %v588_v22 = vmax.f32 %v488_v52, 0.0  ;;  %v509_v23 = vadd.f32 %v5993_v8, %v6349_v61  ;;  %v1636_v32 = vsel %vm6455_vm10, %v1628_v53, %v1635_v7 }
  0xf2   : > { %v500_v19 = vpop.f32.mrf.mxu0  ;;  %v1613_v33 = vor.u32 %v9338_v12, %v1610_v6  ;;  %v5526_v51 = vcombine.low %v1627_v54, %v1636_v32  ;;  %v990_v17 = vshll.u32 %v905_v56, 16  ;;  %v1000_v8 = vshrl.u32 %v6478_v30, 16  ;;  %v908_v54 = vld [vmem:[#allocation2 + $0x3c] sm:$0xf]  ;;  %v6563_v63 = vld [vmem:[#allocation2 + $0x6c] sm:$0xf] }
  0xf3   : > { %879 = vst.msk [vmem:[#allocation2 + $0x9c] sm:$0xf] %vm611_vm8, %v5689_v21  ;;  %v5687_v41 = vpack.c.bf16 %v588_v22, %v588_v22  ;;  %v593_v52 = vmax.f32 %v509_v23, 0.0  ;;  %v501_v62 = vadd.f32 %v6349_v61, %v500_v19  ;;  %v6495_v23 = vrot.slane %v1624_v13, 5 }
  0xf4   : > { %v1614_v53 = vsel %vm6455_vm10, %v1606_v16, %v1613_v33  ;;  %v5994_v7 = vpop.f32.mrf.mxu0  ;;  %3084 = vrot.lane.b32.xlu1 %v5526_v51, %s6205_s7  ;;  %v989_v5 = vrot.slane %v987_v40, 7  ;;  %v6499_v16 = vrot.slane %v978_v39, 7  ;;  %v981_v33 = vshll.u32 %v6442_v14, 16 }
  0xf5   : > { %877 = vst.msk [vmem:[#allocation2 + $0x84] sm:$0xf] %vm611_vm8, %v5687_v41  ;;  %v5692_v6 = vpack.c.bf16 %v593_v52, %v593_v52  ;;  %v591_v21 = vmax.f32 %v501_v62, 0.0  ;;  %v5525_v22 = vcombine.low %v1605_v26, %v1614_v53  ;;  %v512_v19 = vadd.f32 %v5994_v7, %v6349_v61  ;;  %v6514_v7 = vld [vmem:[#allocation2 + $0x50] sm:$0xf] }
  0xf6   : > { %9494 = vst [vmem:[#allocation8_spill] sm:$0xff] %v6499_v16  ;;  %v503_v9 = vpop.f32.mrf.mxu0  ;;  %v5494_v51 = vcombine.low %v6442_v14, %v905_v56  ;;  %v6508_v13 = vrot.slane %v1602_v18, 5  ;;  %v6510_v62 = vrot.slane %v990_v17, 5  ;;  %v6512_v26 = vrot.slane %v987_v40, 4 }
  0xf7   : > { %882 = vst.msk [vmem:[#allocation2 + $0xc8] sm:$0xf] %vm611_vm8, %v5692_v6  ;;  %v5690_v32 = vpack.c.bf16 %v591_v21, %v591_v21  ;;  %3082 = vrot.lane.b32.xlu0 %v5525_v22, %s6205_s7  ;;  %v594_v41 = vmax.f32 %v512_v19, 0.0  ;;  %v504_v52 = vadd.f32 %v6349_v61, %v503_v9  ;;  %v1009_v53 = vshrl.u32 %v908_v54, 16  ;;  %v6521_v19 = vld [vmem:[#allocation2 + $0x54] sm:$0xf] }
  0xf8   : > { %9495 = vst [vmem:[#allocation9_spill] sm:$0xff] %v6510_v62  ;;  %9496 = vst [vmem:[#allocation10_spill] sm:$0xff] %v6512_v26  ;;  %2956 = vrot.lane.b32.xlu1 %v5494_v51, %s6205_s7  ;;  %v6518_v56 = vrot.slane %v1000_v8, 7  ;;  %v1003_v22 = vshll.u32 %v6478_v30, 16  ;;  %v6523_v18 = vor.u32 %v990_v17, %v989_v5  ;;  %v6526_v40 = vor.u32 %v981_v33, %v6499_v16 }
  0xf9   : > { %880 = vst.msk [vmem:[#allocation2 + $0xb0] sm:$0xf] %vm611_vm8, %v5690_v32  ;;  %v5693_v6 = vpack.c.bf16 %v594_v41, %v594_v41  ;;  %v592_v21 = vmax.f32 %v504_v52, 0.0  ;;  %v6530_v9 = vrot.slane %v978_v39, 4  ;;  %v6532_v32 = vrot.slane %v981_v33, 5 }
  0xfa   : > { %9497 = vst [vmem:[#allocation11_spill] sm:$0xff] %v6518_v56  ;;  %9498 = vst [vmem:[#allocation12_spill] sm:$0xff] %v6523_v18  ;;  %v1012_v51 = vshll.u32 %v908_v54, 16  ;;  %v5495_v17 = vcombine.low %v6478_v30, %v908_v54  ;;  %v9341_v5 = vshrl.u32 %v6514_v7, 16  ;;  %v910_v52 = vld [vmem:[#allocation2 + $0x50] sm:$0xf] }
  0xfb   : > { %9499 = vst [vmem:[#allocation13_spill] sm:$0xff] %v6526_v40  ;;  %9500 = vst [vmem:[#allocation14_spill] sm:$0xff] %v6532_v32  ;;  %v5691_v41 = vpack.c.bf16 %v592_v21, %v592_v21  ;;  %2954 = vrot.lane.b32.xlu0 %v5493_v47, %s6205_s7  ;;  %v1011_v35 = vrot.slane %v1009_v53, 7  ;;  %v9343_v14 = vshll.u32 %v6514_v7, 16  ;;  %v9342_v39 = vshrl.u32 %v6521_v19, 16 }
  0xfc   : > { %883 = vst.msk [vmem:[#allocation2 + $0xcc] sm:$0xf] %vm611_vm8, %v5693_v6  ;;  %v911_v6 = vld [vmem:[#allocation2 + $0x54] sm:$0xf]  ;;  %v6546_v21 = vor.u32 %v1003_v22, %v6518_v56  ;;  %v6548_v59 = vrot.slane %v1000_v8, 4  ;;  %v6550_v47 = vrot.slane %v1003_v22, 5  ;;  %2958 = vrot.lane.b32.xlu1 %v5495_v17, %s6205_s7 }
  0xfd   : > { %881 = vst.msk [vmem:[#allocation2 + $0xb4] sm:$0xf] %vm611_vm8, %v5691_v41  ;;  %v1645_v30 = vrot.slane %v9341_v5, 7  ;;  %v6555_v54 = vld [vmem:[#allocation2 + $0x68] sm:$0xf]  ;;  %v6557_v12 = vrot.slane %v1009_v53, 4  ;;  %v5496_v56 = vcombine.low %v910_v52, %v911_v6  ;;  %v6565_v17 = vor.u32 %v1012_v51, %v1011_v35 }
  0xfe   : > { %9501 = vst [vmem:[#allocation15_spill] sm:$0xff] %v6546_v21  ;;  %9502 = vst [vmem:[#allocation16_spill] sm:$0xff] %v6548_v59  ;;  %v1654_v58 = vrot.slane %v9342_v39, 7  ;;  %v1022_v41 = vshrl.u32 %v910_v52, 16  ;;  %v1025_v33 = vshll.u32 %v910_v52, 16  ;;  %v1031_v22 = vshrl.u32 %v911_v6, 16  ;;  %v5997_v52 = vpop.f32.mrf.mxu0 }
  0xff   : > { %9503 = vst [vmem:[#allocation17_spill] sm:$0xff] %v6550_v47  ;;  %9504 = vst [vmem:[#allocation18_spill] sm:$0xff] %v6557_v12  ;;  %v1648_v8 = vor.u32 %v9343_v14, %v1645_v30  ;;  %v1650_v21 = vrot.slane %v1645_v30, 4  ;;  %v6567_v5 = vrot.slane %v1012_v51, 5  ;;  %v9507_v53 = vshll.u32 %v6521_v19, 16 }
 0x100   : > { %9505 = vst [vmem:[#allocation19_spill] sm:$0xff] %v6565_v17  ;;  %v9345_v40 = vshrl.u32 %v6555_v54, 16  ;;  %v6575_v12 = vrot.slane %v1022_v41, 7  ;;  %v1033_v30 = vrot.slane %v1031_v22, 7  ;;  %v1034_v14 = vshll.u32 %v911_v6, 16  ;;  %2960 = vrot.lane.b32.xlu1 %v5496_v56, %s6205_s7 }
 0x101   : > { %9506 = vst [vmem:[#allocation20_spill] sm:$0xff] %v6567_v5  ;;  %v1657_v18 = vor.u32 %v9507_v53, %v1654_v58  ;;  %v1649_v39 = vsel %vm6455_vm10, %v6372_v36, %v1648_v8  ;;  %v9346_v58 = vshll.u32 %v6555_v54, 16  ;;  %v9347_v53 = vshrl.u32 %v6563_v63, 16  ;;  %v913_v17 = vld [vmem:[#allocation2 + $0x68] sm:$0xf] }
 0x102   : > { %9508 = vst [vmem:[#allocation21_spill] sm:$0xff] %v6575_v12  ;;  %v1667_v51 = vrot.slane %v9345_v40, 7  ;;  %v6584_v36 = vrot.slane %v1022_v41, 4  ;;  %v6586_v8 = vrot.slane %v1025_v33, 5  ;;  %v525_v6 = vadd.f32 %v5997_v52, %v6349_v61  ;;  %v914_v40 = vld [vmem:[#allocation2 + $0x6c] sm:$0xf]  ;;  %v516_v52 = vpop.f32.mrf.mxu0 }
 0x103   : > { %v1658_v35 = vsel %vm6455_vm10, %v1650_v21, %v1657_v18  ;;  %v1676_v18 = vrot.slane %v9347_v53, 7  ;;  %v9350_v21 = vshll.u32 %v6563_v63, 16  ;;  %v6598_v41 = vrot.slane %v1034_v14, 5 }
 0x104   : > { %v5527_v5 = vcombine.low %v1649_v39, %v1658_v35  ;;  %9509 = vst [vmem:[#allocation22_spill] sm:$0xff] %v6584_v36  ;;  %9510 = vst [vmem:[#allocation23_spill] sm:$0xff] %v6586_v8  ;;  %v1670_v56 = vor.u32 %v9346_v58, %v1667_v51  ;;  %v1672_v47 = vrot.slane %v1667_v51, 4  ;;  %v6596_v39 = vor.u32 %v1025_v33, %v6575_v12 }
 0x105   : > { %9512 = vst [vmem:[#allocation25_spill] sm:$0xff] %v6598_v41  ;;  %v597_v35 = vmax.f32 %v525_v6, 0.0  ;;  %v1044_v8 = vshrl.u32 %v913_v17, 16  ;;  %v6600_v36 = vor.u32 %v1034_v14, %v1033_v30  ;;  %v6602_v58 = vrot.slane %v1031_v22, 4  ;;  %v6613_v41 = vld [vmem:[#allocation2 + $0x84] sm:$0xf] }
 0x106   : > { %3086 = vrot.lane.b32.xlu0 %v5527_v5, %s6205_s7  ;;  %9511 = vst [vmem:[#allocation24_spill] sm:$0xff] %v6596_v39  ;;  %v1671_v51 = vsel %vm6455_vm10, %v6374_v37, %v1670_v56  ;;  %v1679_v53 = vor.u32 %v9350_v21, %v1676_v18  ;;  %v6609_v5 = vld [vmem:[#allocation2 + $0x80] sm:$0xf]  ;;  %v1047_v12 = vshll.u32 %v913_v17, 16  ;;  %v1053_v6 = vshrl.u32 %v914_v40, 16  ;;  %v5998_v21 = vpop.f32.mrf.mxu0 }
 0x107   : > { %9513 = vst [vmem:[#allocation26_spill] sm:$0xff] %v6600_v36  ;;  %9514 = vst [vmem:[#allocation27_spill] sm:$0xff] %v6602_v58  ;;  %v5696_v33 = vpack.c.bf16 %v597_v35, %v597_v35  ;;  %v6611_v39 = vrot.slane %v1044_v8, 7  ;;  %v1056_v22 = vshll.u32 %v914_v40, 16  ;;  %v5497_v30 = vcombine.low %v913_v17, %v914_v40  ;;  %v6625_v17 = vld [vmem:[#allocation2 + $0x80] sm:$0xf] }
 0x108   : > { %v1680_v14 = vsel %vm6455_vm10, %v1672_v47, %v1679_v53  ;;  %v517_v36 = vadd.f32 %v6349_v61, %v516_v52  ;;  %v1055_v56 = vrot.slane %v1053_v6, 7  ;;  %v9351_v18 = vshrl.u32 %v6609_v5, 16 }
 0x109   : > { %9515 = vst [vmem:[#allocation28_spill] sm:$0xff] %v6611_v39  ;;  %v5528_v37 = vcombine.low %v1671_v51, %v1680_v14  ;;  %886 = vst.msk [vmem:[#allocation2 + $0xf8] sm:$0xf] %vm611_vm8, %v5696_v33  ;;  %v9355_v35 = vshll.u32 %v6609_v5, 16  ;;  %2962 = vrot.lane.b32.xlu1 %v5497_v30, %s6205_s7  ;;  %v9354_v59 = vshrl.u32 %v6613_v41, 16  ;;  %v528_v40 = vadd.f32 %v5998_v21, %v6349_v61 }
 0x10a   : > { %v595_v58 = vmax.f32 %v517_v36, 0.0  ;;  %v6629_v53 = vor.u32 %v1047_v12, %v6611_v39  ;;  %v6631_v52 = vrot.slane %v1044_v8, 4  ;;  %v6633_v51 = vrot.slane %v1047_v12, 5  ;;  %v6637_v33 = vld [vmem:[#allocation2 + $0x84] sm:$0xf] }
 0x10b   : > { %3088 = vrot.lane.b32.xlu0 %v5528_v37, %s6205_s7  ;;  %v1689_v36 = vrot.slane %v9351_v18, 7  ;;  %v6639_v14 = vrot.slane %v1056_v22, 5  ;;  %v1698_v21 = vrot.slane %v9354_v59, 7  ;;  %v598_v47 = vmax.f32 %v528_v40, 0.0  ;;  %v519_v18 = vpop.f32.mrf.mxu0 }
 0x10c   : > { %9516 = vst [vmem:[#allocation29_spill] sm:$0xff] %v6629_v53  ;;  %9517 = vst [vmem:[#allocation30_spill] sm:$0xff] %v6631_v52  ;;  %v5694_v30 = vpack.c.bf16 %v595_v58, %v595_v58  ;;  %v6643_v37 = vrot.slane %v1053_v6, 4  ;;  %v1066_v53 = vshrl.u32 %v6625_v17, 16  ;;  %v6648_v39 = vor.u32 %v1056_v22, %v1055_v56  ;;  %v6656_v6 = vld [vmem:[#allocation2 + $0x9c] sm:$0xf] }
 0x10d   : > { %9518 = vst [vmem:[#allocation31_spill] sm:$0xff] %v6633_v51  ;;  %9519 = vst [vmem:[#allocation32_spill] sm:$0xff] %v6639_v14  ;;  %v1692_v12 = vor.u32 %v9355_v35, %v1689_v36  ;;  %v1694_v8 = vrot.slane %v1689_v36, 4  ;;  %v9522_v58 = vshll.u32 %v6613_v41, 16  ;;  %v5697_v59 = vpack.c.bf16 %v598_v47, %v598_v47  ;;  %v6654_v51 = vld [vmem:[#allocation2 + $0x98] sm:$0xf] }
 0x10e   : > { %9520 = vst [vmem:[#allocation33_spill] sm:$0xff] %v6643_v37  ;;  %9521 = vst [vmem:[#allocation34_spill] sm:$0xff] %v6648_v39  ;;  %v9356_v40 = vshrl.u32 %v6637_v33, 16  ;;  %v6661_v35 = vrot.slane %v1066_v53, 7  ;;  %v1069_v22 = vshll.u32 %v6625_v17, 16  ;;  %v1078_v56 = vshll.u32 %v6637_v33, 16 }
 0x10f   : > { %884 = vst.msk [vmem:[#allocation2 + $0xe0] sm:$0xf] %vm611_vm8, %v5694_v30  ;;  %v1701_v14 = vor.u32 %v9522_v58, %v1698_v21  ;;  %v1693_v36 = vsel %vm6455_vm10, %v6376_v38, %v1692_v12  ;;  %887 = vst.msk [vmem:[#allocation2 + $0xfc] sm:$0xf] %vm611_vm8, %v5697_v59  ;;  %v5498_v21 = vcombine.low %v6625_v17, %v6637_v33  ;;  %v6673_v38 = vld [vmem:[#allocation2 + $0x38] sm:$0xf] }
 0x110   : > { %9523 = vst [vmem:[#allocation35_spill] sm:$0xff] %v6661_v35  ;;  %v1077_v47 = vrot.slane %v9356_v40, 7  ;;  %v520_v58 = vadd.f32 %v6349_v61, %v519_v18  ;;  %v9358_v39 = vshrl.u32 %v6654_v51, 16  ;;  %v9360_v52 = vshrl.u32 %v6656_v6, 16 }
 0x111   : > { %v1702_v30 = vsel %vm6455_vm10, %v1694_v8, %v1701_v14  ;;  %v6678_v14 = vld [vmem:[#allocation2 + $0x3c] sm:$0xf]  ;;  %2964 = vrot.lane.b32.xlu1 %v5498_v21, %s6205_s7  ;;  %v9524_v17 = vshrl.u32 %v6414_v42, 16  ;;  %v9525_v18 = vshll.u32 %v6445_v11, 16  ;;  %v9526_v37 = vshrl.u32 %v6445_v11, 16 }
 0x112   : > { %v5529_v12 = vcombine.low %v1693_v36, %v1702_v30  ;;  %v596_v59 = vmax.f32 %v520_v58, 0.0  ;;  %v1711_v36 = vrot.slane %v9358_v39, 7  ;;  %v1720_v30 = vrot.slane %v9360_v52, 7 }
 0x113   : > { %v1961_v40 = vrot.slane %v9524_v17, 4  ;;  %v1965_v16 = vrot.slane %v9525_v18, 5  ;;  %v1967_v21 = vrot.slane %v9526_v37, 4  ;;  %v2240_v58 = vshrl.u32 %v6673_v38, 16 }
 0x114   : > { %3090 = vrot.lane.b32.xlu0 %v5529_v12, %s6205_s7  ;;  %v5695_v8 = vpack.c.bf16 %v596_v59, %v596_v59  ;;  %v2243_v17 = vshll.u32 %v6673_v38, 16  ;;  %v2249_v18 = vshrl.u32 %v6678_v14, 16  ;;  %v9527_v12 = vshll.u32 %v6654_v51, 16 }
 0x115   : > { %v1963_v42 = vor.u32 %v6508_v13, %v1961_v40  ;;  %v1716_v26 = vrot.slane %v1711_v36, 4  ;;  %v9528_v39 = vshll.u32 %v6656_v6, 16  ;;  %v1968_v52 = vor.u32 %v1967_v21, %v1965_v16 }
 0x116   : > { %v1714_v0 = vor.u32 %v9527_v12, %v1711_v36  ;;  %v6701_v32 = vrot.slane %v1066_v53, 4  ;;  %v6703_v11 = vrot.slane %v1069_v22, 5  ;;  %885 = vst.msk [vmem:[#allocation2 + $0xe4] sm:$0xf] %vm611_vm8, %v5695_v8  ;;  %v2252_v13 = vshll.u32 %v6678_v14, 16 }
 0x117   : > { %v1723_v62 = vor.u32 %v9528_v39, %v1720_v30  ;;  %v1964_v37 = vrot.slane %v1963_v42, 4  ;;  %v1969_v53 = vrot.slane %v1968_v52, 4  ;;  %v6718_v36 = vrot.slane %v2240_v58, 4 }
 0x118   : > { %9529 = vst [vmem:[#allocation36_spill] sm:$0xff] %v6701_v32  ;;  %9530 = vst [vmem:[#allocation37_spill] sm:$0xff] %v6703_v11  ;;  %v1715_v40 = vsel %vm6455_vm10, %v6380_v44, %v1714_v0  ;;  %v6722_v21 = vrot.slane %v2240_v58, 7  ;;  %v2251_v42 = vrot.slane %v2249_v18, 7  ;;  %v6724_v44 = vld [vmem:[#allocation2 + $0x98] sm:$0xf]  ;;  %v6742_v12 = vor.u32 %v1069_v22, %v6661_v35 }
 0x119   : > { %v1724_v59 = vsel %vm6455_vm10, %v1716_v26, %v1723_v62  ;;  %9533 = vst [vmem:[#allocation38_spill] sm:$0xff] %v6718_v36  ;;  %v1966_v30 = vsel %vm6714_vm13, %v1964_v37, %v1965_v16  ;;  %v6111_v0 = vld [vmem:[%s9330_s3 + $0x78] sm:$0xff]   ;;  %v1974_v26 = vsel %vm6714_vm13, %v1969_v53, %v6384_v48  ;;  %v6735_v52 = vrot.slane %v2243_v17, 5  ;;  %v6751_v32 = vld [vmem:[#allocation2 + $0xb0] sm:$0xf] }
 0x11a   : > { %v5530_v8 = vcombine.low %v1715_v40, %v1724_v59  ;;  %v6112_v62 = vld [vmem:[%s9330_s3 + $0x38] sm:$0xff]   ;;  %v6737_v16 = vrot.slane %v2252_v13, 5  ;;  %v6739_v58 = vrot.slane %v2249_v18, 4  ;;  %9537 = vst [vmem:[#allocation42_spill] sm:$0xff] %v6742_v12  ;;  %v6744_v37 = vor.u32 %v1078_v56, %v1077_v47  ;;  %5729 = vmatprep.subr.bf16.mxu1 %v6111_v0  ;;  %v6762_v18 = vld [vmem:[#allocation2 + $0xb4] sm:$0xf] }
 0x11b   : > { %9534 = vst [vmem:[#allocation39_spill] sm:$0xff] %v6735_v52  ;;  %v6746_v40 = vrot.slane %v1078_v56, 5  ;;  %v5557_v59 = vcombine.low %v1966_v30, %v1974_v26  ;;  %v6749_v11 = vld [vmem:[#allocation2 + $0x9c] sm:$0xf]  ;;  %v9540_v48 = vshrl.u32 %v6637_v33, 16  ;;  %v1088_v56 = vshrl.u32 %v6724_v44, 16  ;;  %5730 = vmatpush3.bf16.msra.mxu1 %v6112_v62 }
 0x11c   : > { %9535 = vst [vmem:[#allocation40_spill] sm:$0xff] %v6737_v16  ;;  %9536 = vst [vmem:[#allocation41_spill] sm:$0xff] %v6739_v58  ;;  %3092 = vrot.lane.b32.xlu0 %v5530_v8, %s6205_s7  ;;  %v6001_v8 = vpop.f32.mrf.mxu0  ;;  %v6115_v30 = vld [vmem:[%s9330_s3 + $0x70] sm:$0xff]   ;;  %v6772_v0 = vor.u32 %v2243_v17, %v6722_v21  ;;  %v6774_v26 = vor.u32 %v2252_v13, %v2251_v42  ;;  %v9365_v58 = vshrl.u32 %v6751_v32, 16  ;;  %v9547_v36 = vshrl.u32 %v6430_v57, 16 }
 0x11d   : > { %9538 = vst [vmem:[#allocation43_spill] sm:$0xff] %v6744_v37  ;;  %9539 = vst [vmem:[#allocation44_spill] sm:$0xff] %v6746_v40  ;;  %v6755_v53 = vrot.slane %v9540_v48, 4  ;;  %v6116_v33 = vld [vmem:[%s9330_s3 + $0x30] sm:$0xff]   ;;  %3242 = vrot.lane.b32.xlu1 %v5557_v59, %s6205_s7  ;;  %v5589_v48 = vcombine.low %v6673_v38, %v6678_v14  ;;  %v6779_v47 = vrot.slane %v1088_v56, 7  ;;  %5731 = vmatprep.subr.bf16.mxu1 %v6115_v30  ;;  %v9367_v38 = vshrl.u32 %v6762_v18, 16 }
 0x11e   : > { %9542 = vst [vmem:[#allocation46_spill] sm:$0xff] %v6772_v0  ;;  %v5499_v17 = vcombine.low %v6724_v44, %v6749_v11  ;;  %v6790_v42 = vrot.slane %v1088_v56, 4  ;;  %v1733_v59 = vrot.slane %v9365_v58, 7  ;;  %v541_v16 = vadd.f32 %v6001_v8, %v6349_v61  ;;  %v6797_v22 = vld [vmem:[#allocation2 + $0x50] sm:$0xf] }
 0x11f   : > { %9541 = vst [vmem:[#allocation45_spill] sm:$0xff] %v6755_v53  ;;  %9543 = vst [vmem:[#allocation47_spill] sm:$0xff] %v6779_v47  ;;  %v9545_v30 = vshrl.u32 %v6407_v28, 16  ;;  %5732 = vmatpush3.bf16.msra.mxu1 %v6116_v33  ;;  %v1742_v13 = vrot.slane %v9367_v38, 7  ;;  %v9546_v56 = vshll.u32 %v6430_v57, 16  ;;  %v1981_v58 = vrot.slane %v9547_v36, 4 }
 0x120   : > { %3402 = vrot.lane.b32.xlu0 %v5589_v48, %s6205_s7  ;;  %9544 = vst [vmem:[#allocation48_spill] sm:$0xff] %v6790_v42  ;;  %v532_v48 = vpop.f32.mrf.mxu0  ;;  %v9548_v28 = vshll.u32 %v6751_v32, 16  ;;  %v1738_v52 = vrot.slane %v1733_v59, 4  ;;  %v601_v12 = vmax.f32 %v541_v16, 0.0  ;;  %v2191_v35 = vld [vmem:[#allocation2 + $0x54] sm:$0xf] }
 0x121   : > { %v1975_v62 = vrot.slane %v9545_v30, 4  ;;  %2966 = vrot.lane.b32.xlu1 %v5499_v17, %s6205_s7  ;;  %v1979_v14 = vrot.slane %v9546_v56, 5  ;;  %v533_v8 = vadd.f32 %v6349_v61, %v532_v48  ;;  %v9549_v17 = vshll.u32 %v6762_v18, 16 }
 0x122   : > { %v1736_v30 = vor.u32 %v9548_v28, %v1733_v59  ;;  %v2262_v56 = vshrl.u32 %v6797_v22, 16  ;;  %v5700_v36 = vpack.c.bf16 %v601_v12, %v601_v12  ;;  %v2265_v28 = vshll.u32 %v6797_v22, 16  ;;  %v6118_v12 = vld [vmem:[%s9330_s3 + $0x28] sm:$0xff]  }
 0x123   : > { %v1977_v33 = vor.u32 %v6495_v23, %v1975_v62  ;;  %v1745_v37 = vor.u32 %v9549_v17, %v1742_v13  ;;  %v1982_v42 = vor.u32 %v1981_v58, %v1979_v14  ;;  %v599_v38 = vmax.f32 %v533_v8, 0.0 }
 0x124   : > { %v1737_v57 = vsel %vm6455_vm10, %v6397_v1, %v1736_v30  ;;  %v9550_v16 = vshrl.u32 %v6749_v11, 16  ;;  %890 = vst.msk [vmem:[#allocation2 + $0x128] sm:$0xf] %vm611_vm8, %v5700_v36  ;;  %v6822_v8 = vrot.slane %v2262_v56, 7  ;;  %v2271_v17 = vshrl.u32 %v2191_v35, 16  ;;  %v6117_v1 = vld [vmem:[%s9330_s3 + $0x68] sm:$0xff]  }
 0x125   : > { %v1978_v48 = vrot.slane %v1977_v33, 4  ;;  %v1746_v23 = vsel %vm6455_vm10, %v1738_v52, %v1745_v37  ;;  %v1983_v62 = vrot.slane %v1982_v42, 4  ;;  %v5698_v58 = vpack.c.bf16 %v599_v38, %v599_v38  ;;  %v6836_v30 = vld [vmem:[#allocation2 + $0xb0] sm:$0xf]  ;;  %5733 = vmatprep.subr.bf16.mxu1 %v6117_v1  ;;  %v6854_v1 = vld [vmem:[#allocation2 + $0xb4] sm:$0xf] }
 0x126   : > { %v1099_v59 = vrot.slane %v9550_v16, 7  ;;  %v5531_v13 = vcombine.low %v1737_v57, %v1746_v23  ;;  %v2274_v53 = vshll.u32 %v2191_v35, 16  ;;  %v2616_v38 = vrot.slane %v2262_v56, 4  ;;  %v6002_v23 = vpop.f32.mrf.mxu0  ;;  %5734 = vmatpush3.bf16.msra.mxu1 %v6118_v12 }
 0x127   : > { %v1980_v52 = vsel %vm6714_vm13, %v1978_v48, %v1979_v14  ;;  %v1988_v37 = vsel %vm6714_vm13, %v1983_v62, %v6386_v49  ;;  %888 = vst.msk [vmem:[#allocation2 + $0x110] sm:$0xf] %vm611_vm8, %v5698_v58  ;;  %v2617_v42 = vrot.slane %v2265_v28, 5  ;;  %v2273_v57 = vrot.slane %v2271_v17, 7  ;;  %v6120_v14 = vld [vmem:[%s9330_s3 + $0xf8] sm:$0xff]  }
 0x128   : > { %3094 = vrot.lane.b32.xlu0 %v5531_v13, %s6205_s7  ;;  %v5558_v33 = vcombine.low %v1980_v52, %v1988_v37  ;;  %v2620_v36 = vrot.slane %v2274_v53, 5  ;;  %v2622_v16 = vrot.slane %v2271_v17, 4  ;;  %v6121_v49 = vld [vmem:[%s9330_s3 + $0xb8] sm:$0xff]   ;;  %v9551_v56 = vshll.u32 %v6724_v44, 16  ;;  %5841 = vmatprep.subr.bf16.mxu0 %v6120_v14  ;;  %v6124_v44 = vld [vmem:[%s9330_s3 + $0x20] sm:$0xff]  }
 0x129   : > { %v9553_v62 = vshll.u32 %v6749_v11, 16  ;;  %v2618_v13 = vor.u32 %v2617_v42, %v2616_v38  ;;  %v544_v17 = vadd.f32 %v6002_v23, %v6349_v61  ;;  %v9557_v40 = vshrl.u32 %v6749_v11, 16  ;;  %v6123_v38 = vld [vmem:[%s9330_s3 + $0x60] sm:$0xff]   ;;  %5842 = vmatpush3.bf16.msra.mxu0 %v6121_v49  ;;  %v6892_v49 = vld [vmem:[#allocation2 + $0xcc] sm:$0xf] }
 0x12a   : > { %v6847_v48 = vrot.slane %v9551_v56, 5  ;;  %v9555_v52 = vmov %v9551_v56  ;;  %3244 = vrot.lane.b32.xlu1 %v5558_v33, %s6205_s7  ;;  %v2623_v56 = vor.u32 %v2622_v16, %v2620_v36  ;;  %v9559_v12 = vshll.u32 %v6749_v11, 16  ;;  %5735 = vmatprep.subr.bf16.mxu1 %v6123_v38 }
 0x12b   : > { %v6851_v58 = vrot.slane %v9553_v62, 5  ;;  %v6859_v37 = vor.u32 %v9555_v52, %v6779_v47  ;;  %v6863_v0 = vrot.slane %v9557_v40, 4  ;;  %v5590_v62 = vcombine.low %v6797_v22, %v2191_v35  ;;  %v535_v52 = vpop.f32.mrf.mxu0  ;;  %5736 = vmatpush3.bf16.msra.mxu1 %v6124_v44  ;;  %v2194_v44 = vld [vmem:[#allocation2 + $0x6c] sm:$0xf] }
 0x12c   : > { %9552 = vst [vmem:[#allocation49_spill] sm:$0xff] %v6847_v48  ;;  %v6875_v42 = vor.u32 %v9559_v12, %v1099_v59  ;;  %v2619_v40 = vrot.slane %v2618_v13, 4  ;;  %v602_v23 = vmax.f32 %v544_v17, 0.0  ;;  %v1110_v33 = vshrl.u32 %v6836_v30, 16  ;;  %v6908_v12 = vld [vmem:[#allocation2 + $0x68] sm:$0xf] }
 0x12d   : > { %9554 = vst [vmem:[#allocation50_spill] sm:$0xff] %v6851_v58  ;;  %9556 = vst [vmem:[#allocation51_spill] sm:$0xff] %v6859_v37  ;;  %v6879_v35 = vor.u32 %v2265_v28, %v6822_v8  ;;  %v6881_v22 = vor.u32 %v2274_v53, %v2273_v57  ;;  %v2624_v16 = vrot.slane %v2623_v56, 4  ;;  %3404 = vrot.lane.b32.xlu0 %v5590_v62, %s6205_s7  ;;  %v9370_v14 = vshrl.u32 %v6854_v1, 16  ;;  %v6885_v37 = vld [vmem:[#allocation2 + $0xc8] sm:$0xf] }
 0x12e   : > { %9558 = vst [vmem:[#allocation52_spill] sm:$0xff] %v6863_v0  ;;  %9560 = vst [vmem:[#allocation53_spill] sm:$0xff] %v6875_v42  ;;  %v2621_v11 = vsel %vm6714_vm13, %v2619_v40, %v2620_v36  ;;  %v5701_v59 = vpack.c.bf16 %v602_v23, %v602_v23  ;;  %v6889_v13 = vrot.slane %v1110_v33, 7  ;;  %v1113_v28 = vshll.u32 %v6836_v30, 16 }
 0x12f   : > { %9561 = vst [vmem:[#allocation54_spill] sm:$0xff] %v6879_v35  ;;  %v2629_v53 = vsel %vm6714_vm13, %v2624_v16, %v6405_v24  ;;  %v1121_v57 = vrot.slane %v9370_v14, 7  ;;  %v1122_v17 = vshll.u32 %v6854_v1, 16  ;;  %v5500_v36 = vcombine.low %v6836_v30, %v6854_v1 }
 0x130   : > { %9562 = vst [vmem:[#allocation55_spill] sm:$0xff] %v6889_v13  ;;  %v6902_v56 = vcombine.low %v2621_v11, %v2629_v53  ;;  %891 = vst.msk [vmem:[#allocation2 + $0x12c] sm:$0xf] %vm611_vm8, %v5701_v59  ;;  %v536_v62 = vadd.f32 %v6349_v61, %v535_v52  ;;  %v9371_v38 = vshrl.u32 %v6885_v37, 16  ;;  %v9374_v24 = vshrl.u32 %v6892_v49, 16 }
 0x131   : > { %2968 = vrot.lane.b32.xlu1 %v5500_v36, %s6205_s7  ;;  %v9564_v30 = vshrl.u32 %v6514_v7, 16  ;;  %v9565_v16 = vshll.u32 %v6514_v7, 16  ;;  %v9566_v52 = vshll.u32 %v6521_v19, 16  ;;  %v9567_v14 = vshrl.u32 %v6521_v19, 16 }
 0x132   : > { %9563 = vst [vmem:[#allocation56_spill] sm:$0xff] %v6902_v56  ;;  %v600_v59 = vmax.f32 %v536_v62, 0.0  ;;  %v1755_v61 = vrot.slane %v9371_v38, 7  ;;  %v1764_v40 = vrot.slane %v9374_v24, 7  ;;  %v2287_v7 = vshll.u32 %v6908_v12, 16 }
 0x133   : > { %v1989_v23 = vrot.slane %v9564_v30, 4  ;;  %v1990_v11 = vrot.slane %v9565_v16, 5  ;;  %v1993_v53 = vrot.slane %v9566_v52, 5  ;;  %v1995_v36 = vrot.slane %v9567_v14, 4 }
 0x134   : > { %v2284_v30 = vshrl.u32 %v6908_v12, 16  ;;  %v5699_v16 = vpack.c.bf16 %v600_v59, %v600_v59  ;;  %v9568_v62 = vshll.u32 %v6885_v37, 16  ;;  %v1760_v38 = vrot.slane %v1755_v61, 4 }
 0x135   : > { %v1991_v56 = vor.u32 %v1990_v11, %v1989_v23  ;;  %v1996_v47 = vor.u32 %v1995_v36, %v1993_v53  ;;  %v6929_v0 = vrot.slane %v1110_v33, 4  ;;  %v9570_v19 = vshll.u32 %v6892_v49, 16  ;;  %v6125_v23 = vld [vmem:[%s9330_s3 + $0x58] sm:$0xff]  }
 0x136   : > { %v1758_v42 = vor.u32 %v9568_v62, %v1755_v61  ;;  %v2293_v58 = vshrl.u32 %v2194_v44, 16  ;;  %v6126_v11 = vld [vmem:[%s9330_s3 + $0x18] sm:$0xff]   ;;  %889 = vst.msk [vmem:[#allocation2 + $0x114] sm:$0xf] %vm611_vm8, %v5699_v16  ;;  %v2296_v61 = vshll.u32 %v2194_v44, 16  ;;  %v6943_v36 = vrot.slane %v2284_v30, 4  ;;  %5737 = vmatprep.subr.bf16.mxu1 %v6125_v23 }
 0x137   : > { %9569 = vst [vmem:[#allocation57_spill] sm:$0xff] %v6929_v0  ;;  %v1767_v14 = vor.u32 %v9570_v19, %v1764_v40  ;;  %v1992_v52 = vrot.slane %v1991_v56, 4  ;;  %v1997_v59 = vrot.slane %v1996_v47, 4  ;;  %v6949_v62 = vrot.slane %v2284_v30, 7  ;;  %v6128_v16 = vld [vmem:[%s9330_s3 + $0xf0] sm:$0xff]   ;;  %5738 = vmatpush3.bf16.msra.mxu1 %v6126_v11 }
 0x138   : > { %v1759_v33 = vsel %vm6455_vm10, %v6416_v43, %v1758_v42  ;;  %9571 = vst [vmem:[#allocation58_spill] sm:$0xff] %v6943_v36  ;;  %v2295_v19 = vrot.slane %v2293_v58, 7  ;;  %v6957_v47 = vrot.slane %v2287_v7, 5  ;;  %v6959_v42 = vrot.slane %v2296_v61, 5  ;;  %5843 = vmatprep.subr.bf16.mxu0 %v6128_v16 }
 0x139   : > { %v1768_v56 = vsel %vm6455_vm10, %v1760_v38, %v1767_v14  ;;  %v1994_v40 = vsel %vm6714_vm13, %v1992_v52, %v1993_v53  ;;  %9572 = vst [vmem:[#allocation59_spill] sm:$0xff] %v6949_v62  ;;  %v2002_v43 = vsel %vm6714_vm13, %v1997_v59, %v6409_v29  ;;  %v6961_v38 = vld [vmem:[#allocation2 + $0xe0] sm:$0xf]  ;;  %v6129_v53 = vld [vmem:[%s9330_s3 + $0xb0] sm:$0xff]   ;;  %v6967_v30 = vor.u32 %v1113_v28, %v6889_v13  ;;  %v6973_v29 = vld [vmem:[#allocation2 + $0xc8] sm:$0xf] }
 0x13a   : > { %v5532_v24 = vcombine.low %v1759_v33, %v1768_v56  ;;  %9573 = vst [vmem:[#allocation60_spill] sm:$0xff] %v6957_v47  ;;  %9574 = vst [vmem:[#allocation61_spill] sm:$0xff] %v6959_v42  ;;  %v6969_v14 = vrot.slane %v1113_v28, 5  ;;  %v5559_v52 = vcombine.low %v1994_v40, %v2002_v43  ;;  %v6971_v23 = vrot.slane %v2293_v58, 4  ;;  %v6975_v33 = vld [vmem:[#allocation2 + $0xcc] sm:$0xf]  ;;  %5844 = vmatpush3.bf16.msra.mxu0 %v6129_v53 }
 0x13b   : > { %9575 = vst [vmem:[#allocation62_spill] sm:$0xff] %v6967_v30  ;;  %v6977_v59 = vor.u32 %v1122_v17, %v1121_v57  ;;  %v6979_v11 = vrot.slane %v1122_v17, 5  ;;  %v9580_v56 = vshrl.u32 %v6854_v1, 16  ;;  %v6990_v58 = vor.u32 %v2287_v7, %v6949_v62  ;;  %v6996_v17 = vld [vmem:[#allocation2 + $0xe4] sm:$0xf]  ;;  %v6130_v28 = vld [vmem:[%s9330_s3 + $0x50] sm:$0xff]  }
 0x13c   : > { %9576 = vst [vmem:[#allocation63_spill] sm:$0xff] %v6969_v14  ;;  %9577 = vst [vmem:[#allocation64_spill] sm:$0xff] %v6971_v23  ;;  %3096 = vrot.lane.b32.xlu0 %v5532_v24, %s6205_s7  ;;  %3246 = vrot.lane.b32.xlu1 %v5559_v52, %s6205_s7  ;;  %v6992_v40 = vor.u32 %v2296_v61, %v2295_v19  ;;  %v9375_v1 = vshrl.u32 %v6961_v38, 16  ;;  %v5591_v24 = vcombine.low %v6908_v12, %v2194_v44  ;;  %v6005_v52 = vpop.f32.mrf.mxu0  ;;  %v7018_v7 = vld [vmem:[#allocation2 + $0x80] sm:$0xf] }
 0x13d   : > { %9578 = vst [vmem:[#allocation65_spill] sm:$0xff] %v6977_v59  ;;  %9579 = vst [vmem:[#allocation66_spill] sm:$0xff] %v6979_v11  ;;  %v6983_v0 = vrot.slane %v9580_v56, 4  ;;  %v1132_v16 = vshrl.u32 %v6973_v29, 16  ;;  %v9376_v53 = vshrl.u32 %v6975_v33, 16  ;;  %v5501_v61 = vcombine.low %v6973_v29, %v6975_v33  ;;  %5739 = vmatprep.subr.bf16.mxu1 %v6130_v28 }
 0x13e   : > { %9582 = vst [vmem:[#allocation68_spill] sm:$0xff] %v6990_v58  ;;  %9583 = vst [vmem:[#allocation69_spill] sm:$0xff] %v6992_v40  ;;  %v1777_v19 = vrot.slane %v9375_v1, 7  ;;  %v9379_v56 = vshll.u32 %v6961_v38, 16  ;;  %v9585_v42 = vshrl.u32 %v6555_v54, 16  ;;  %v9587_v23 = vshll.u32 %v6555_v54, 16  ;;  %v548_v59 = vpop.f32.mrf.mxu0 }
 0x13f   : > { %9581 = vst [vmem:[#allocation67_spill] sm:$0xff] %v6983_v0  ;;  %v7010_v44 = vrot.slane %v1132_v16, 7  ;;  %v7014_v12 = vrot.slane %v9376_v53, 7  ;;  %v9588_v47 = vshll.u32 %v6563_v63, 16  ;;  %v9589_v30 = vshrl.u32 %v6563_v63, 16 }
 0x140   : > { %3406 = vrot.lane.b32.xlu0 %v5591_v24, %s6205_s7  ;;  %2970 = vrot.lane.b32.xlu1 %v5501_v61, %s6205_s7  ;;  %v1780_v1 = vor.u32 %v9379_v56, %v1777_v19  ;;  %v1782_v43 = vrot.slane %v1777_v19, 4  ;;  %v7026_v24 = vld [vmem:[%s9329_s2] ss:$0 sm:$0xff]  ;;  %v2003_v57 = vrot.slane %v9585_v42, 4  ;;  %v6131_v61 = vld [vmem:[%s9330_s3 + $0x10] sm:$0xff]   ;;  %v9586_v19 = vshrl.u32 %v6996_v17, 16 }
 0x141   : > { %9584 = vst [vmem:[#allocation70_spill] sm:$0xff] %v7010_v44  ;;  %v557_v53 = vadd.f32 %v7026_v24, %v6005_v52  ;;  %v2004_v36 = vrot.slane %v9587_v23, 5  ;;  %v2007_v52 = vrot.slane %v9588_v47, 5  ;;  %v2009_v42 = vrot.slane %v9589_v30, 4  ;;  %v2197_v13 = vld [vmem:[#allocation2 + $0x84] sm:$0xf]  ;;  %5740 = vmatpush3.bf16.msra.mxu1 %v6131_v61 }
 0x142   : > { %v1786_v56 = vrot.slane %v9586_v19, 7  ;;  %v1781_v0 = vsel %vm6455_vm10, %v6418_v45, %v1780_v1  ;;  %v549_v14 = vadd.f32 %v7026_v24, %v548_v59  ;;  %v2306_v19 = vshrl.u32 %v7018_v7, 16  ;;  %v7078_v61 = vld [vmem:[#allocation2 + $0xe0] sm:$0xf] }
 0x143   : > { %v605_v11 = vmax.f32 %v557_v53, 0.0  ;;  %v9590_v54 = vshll.u32 %v6996_v17, 16  ;;  %v2005_v58 = vor.u32 %v2004_v36, %v2003_v57  ;;  %v2010_v47 = vor.u32 %v2009_v42, %v2007_v52  ;;  %v6137_v42 = vld [vmem:[%s9330_s3 + $0xa8] sm:$0xff]  }
 0x144   : > { %v2309_v63 = vshll.u32 %v7018_v7, 16  ;;  %v7053_v30 = vrot.slane %v1132_v16, 4  ;;  %v603_v40 = vmax.f32 %v549_v14, 0.0  ;;  %v2315_v62 = vshrl.u32 %v2197_v13, 16  ;;  %v6133_v14 = vld [vmem:[%s9330_s3 + $0x48] sm:$0xff]  }
 0x145   : > { %v1789_v23 = vor.u32 %v9590_v54, %v1786_v56  ;;  %v5704_v48 = vpack.c.bf16 %v605_v11, %v605_v11  ;;  %v2006_v59 = vrot.slane %v2005_v58, 4  ;;  %v2011_v1 = vrot.slane %v2010_v47, 4  ;;  %v6134_v11 = vld [vmem:[%s9330_s3 + $0x8] sm:$0xff]   ;;  %5741 = vmatprep.subr.bf16.mxu1 %v6133_v14 }
 0x146   : > { %9591 = vst [vmem:[#allocation71_spill] sm:$0xff] %v7053_v30  ;;  %v2318_v53 = vshll.u32 %v2197_v13, 16  ;;  %v9592_v28 = vshll.u32 %v6973_v29, 16  ;;  %v5702_v57 = vpack.c.bf16 %v603_v40, %v603_v40  ;;  %v7062_v56 = vrot.slane %v2306_v19, 7  ;;  %v6136_v58 = vld [vmem:[%s9330_s3 + $0xe8] sm:$0xff]   ;;  %5742 = vmatpush3.bf16.msra.mxu1 %v6134_v11 }
 0x147   : > { %v1790_v45 = vsel %vm6455_vm10, %v1782_v43, %v1789_v23  ;;  %894 = vst.msk [vmem:[#allocation2 + $0x158] sm:$0xf] %vm611_vm8, %v5704_v48  ;;  %v2016_v48 = vsel %vm6714_vm13, %v2011_v1, %v6420_v46  ;;  %v2644_v40 = vrot.slane %v2306_v19, 4  ;;  %v2645_v16 = vrot.slane %v2309_v63, 5  ;;  %v6006_v43 = vpop.f32.mrf.mxu0  ;;  %5845 = vmatprep.subr.bf16.mxu0 %v6136_v58 }
 0x148   : > { %v7059_v35 = vrot.slane %v9592_v28, 5  ;;  %v5533_v36 = vcombine.low %v1781_v0, %v1790_v45  ;;  %9594 = vst [vmem:[#allocation73_spill] sm:$0xff] %v7062_v56  ;;  %v2008_v0 = vsel %vm6714_vm13, %v2006_v59, %v2007_v52  ;;  %892 = vst.msk [vmem:[#allocation2 + $0x140] sm:$0xf] %vm611_vm8, %v5702_v57  ;;  %v2317_v23 = vrot.slane %v2315_v62, 7  ;;  %5846 = vmatpush3.bf16.msra.mxu0 %v6137_v42 }
 0x149   : > { %v5560_v54 = vcombine.low %v2008_v0, %v2016_v48  ;;  %v2648_v52 = vrot.slane %v2318_v53, 5  ;;  %v2650_v47 = vrot.slane %v2315_v62, 4  ;;  %v9595_v46 = vshll.u32 %v6975_v33, 16 }
 0x14a   : > { %9593 = vst [vmem:[#allocation72_spill] sm:$0xff] %v7059_v35  ;;  %3098 = vrot.lane.b32.xlu0 %v5533_v36, %s6205_s7  ;;  %v9597_v45 = vshrl.u32 %v6975_v33, 16  ;;  %v2646_v1 = vor.u32 %v2645_v16, %v2644_v40  ;;  %v560_v28 = vadd.f32 %v7026_v24, %v6006_v43  ;;  %v7094_v35 = vld [vmem:[#allocation2 + $0xe4] sm:$0xf]  ;;  %v9599_v36 = vshll.u32 %v6973_v29, 16  ;;  %v551_v16 = vpop.f32.mrf.mxu0 }
 0x14b   : > { %v7087_v19 = vrot.slane %v9595_v46, 5  ;;  %3248 = vrot.lane.b32.xlu1 %v5560_v54, %s6205_s7  ;;  %v2651_v57 = vor.u32 %v2650_v47, %v2648_v52  ;;  %v5592_v14 = vcombine.low %v7018_v7, %v2197_v13  ;;  %v1154_v0 = vshrl.u32 %v7078_v61, 16  ;;  %v7112_v43 = vld [vmem:[#allocation2 + $0xf8] sm:$0xf]  ;;  %v7119_v33 = vld [vmem:[#allocation2 + $0xfc] sm:$0xf] }
 0x14c   : > { %v7091_v59 = vrot.slane %v9597_v45, 4  ;;  %v7099_v62 = vor.u32 %v9599_v36, %v7010_v44  ;;  %v9601_v48 = vmov %v9595_v46  ;;  %v7110_v11 = vor.u32 %v2309_v63, %v7062_v56  ;;  %v2200_v13 = vld [vmem:[#allocation2 + $0x9c] sm:$0xf] }
 0x14d   : > { %9596 = vst [vmem:[#allocation74_spill] sm:$0xff] %v7087_v19  ;;  %v7107_v40 = vor.u32 %v9601_v48, %v7014_v12  ;;  %v2647_v58 = vrot.slane %v2646_v1, 4  ;;  %v606_v29 = vmax.f32 %v560_v28, 0.0  ;;  %v7114_v54 = vor.u32 %v2318_v53, %v2317_v23  ;;  %v6138_v53 = vld [vmem:[%s9330_s3 + $0x40] sm:$0xff]  }
 0x14e   : > { %9598 = vst [vmem:[#allocation75_spill] sm:$0xff] %v7091_v59  ;;  %9600 = vst [vmem:[#allocation76_spill] sm:$0xff] %v7099_v62  ;;  %v2652_v47 = vrot.slane %v2651_v57, 4  ;;  %3408 = vrot.lane.b32.xlu0 %v5592_v14, %s6205_s7  ;;  %v7123_v42 = vrot.slane %v1154_v0, 7  ;;  %v7132_v45 = vrot.slane %v1154_v0, 4  ;;  %v5502_v1 = vcombine.low %v7078_v61, %v7094_v35  ;;  %v6139_v28 = vld [vmem:[%s9330_s3] sm:$0xff]   ;;  %5743 = vmatprep.subr.bf16.mxu1 %v6138_v53 }
 0x14f   : > { %9602 = vst [vmem:[#allocation77_spill] sm:$0xff] %v7107_v40  ;;  %9603 = vst [vmem:[#allocation78_spill] sm:$0xff] %v7110_v11  ;;  %v2649_v12 = vsel %vm6714_vm13, %v2647_v58, %v2648_v52  ;;  %v5705_v63 = vpack.c.bf16 %v606_v29, %v606_v29  ;;  %v552_v52 = vadd.f32 %v7026_v24, %v551_v16  ;;  %v9386_v57 = vshrl.u32 %v7112_v43, 16  ;;  %v7146_v0 = vld [vmem:[#allocation2 + $0x98] sm:$0xf] }
 0x150   : > { %9604 = vst [vmem:[#allocation79_spill] sm:$0xff] %v7114_v54  ;;  %9605 = vst [vmem:[#allocation80_spill] sm:$0xff] %v7123_v42  ;;  %v2657_v23 = vsel %vm6714_vm13, %v2652_v47, %v6422_v50  ;;  %v9388_v14 = vshll.u32 %v7112_v43, 16  ;;  %v9387_v50 = vshrl.u32 %v7119_v33, 16  ;;  %2972 = vrot.lane.b32.xlu1 %v5502_v1, %s6205_s7  ;;  %v9608_v29 = vshrl.u32 %v6609_v5, 16  ;;  %5744 = vmatpush3.bf16.msra.mxu1 %v6139_v28 }
 0x151   : > { %9606 = vst [vmem:[#allocation81_spill] sm:$0xff] %v7132_v45  ;;  %v7140_v36 = vcombine.low %v2649_v12, %v2657_v23  ;;  %895 = vst.msk [vmem:[#allocation2 + $0x15c] sm:$0xf] %vm611_vm8, %v5705_v63  ;;  %v604_v48 = vmax.f32 %v552_v52, 0.0  ;;  %v9609_v47 = vshll.u32 %v6609_v5, 16  ;;  %v1799_v63 = vrot.slane %v9386_v57, 7 }
 0x152   : > { %v2017_v16 = vrot.slane %v9608_v29, 4  ;;  %v1808_v23 = vrot.slane %v9387_v50, 7  ;;  %v9610_v53 = vshll.u32 %v6613_v41, 16  ;;  %v9611_v1 = vshrl.u32 %v6613_v41, 16  ;;  %v938_v59 = vld [vmem:[#allocation2 + $0x12c] sm:$0xf] }
 0x153   : > { %9607 = vst [vmem:[#allocation82_spill] sm:$0xff] %v7140_v36  ;;  %v2018_v12 = vrot.slane %v9609_v47, 5  ;;  %v5703_v7 = vpack.c.bf16 %v604_v48, %v604_v48  ;;  %v2328_v29 = vshrl.u32 %v7146_v0, 16  ;;  %v2331_v5 = vshll.u32 %v7146_v0, 16 }
 0x154   : > { %v2021_v46 = vrot.slane %v9610_v53, 5  ;;  %v2023_v52 = vrot.slane %v9611_v1, 4  ;;  %v1802_v28 = vor.u32 %v9388_v14, %v1799_v63  ;;  %v1804_v47 = vrot.slane %v1799_v63, 4 }
 0x155   : > { %v2019_v58 = vor.u32 %v2018_v12, %v2017_v16  ;;  %v9612_v57 = vshll.u32 %v7119_v33, 16  ;;  %v9613_v53 = vshrl.u32 %v7094_v35, 16  ;;  %893 = vst.msk [vmem:[#allocation2 + $0x144] sm:$0xf] %vm611_vm8, %v5703_v7  ;;  %v2337_v48 = vshrl.u32 %v2200_v13, 16 }
 0x156   : > { %v2024_v36 = vor.u32 %v2023_v52, %v2021_v46  ;;  %v2340_v16 = vshll.u32 %v2200_v13, 16  ;;  %v1803_v12 = vsel %vm6455_vm10, %v6433_v2, %v1802_v28  ;;  %v7176_v14 = vrot.slane %v2328_v29, 4 }
 0x157   : > { %v1811_v50 = vor.u32 %v9612_v57, %v1808_v23  ;;  %v1165_v62 = vrot.slane %v9613_v53, 7  ;;  %v2020_v41 = vrot.slane %v2019_v58, 4  ;;  %v7178_v57 = vld [vmem:[#allocation2 + $0xf8] sm:$0xf]  ;;  %v7182_v7 = vrot.slane %v2328_v29, 7 }
 0x158   : > { %v2025_v63 = vrot.slane %v2024_v36, 4  ;;  %9614 = vst [vmem:[#allocation83_spill] sm:$0xff] %v7176_v14  ;;  %v2339_v58 = vrot.slane %v2337_v48, 7  ;;  %v7187_v53 = vld [vmem:[%s9330_s3 + $0x118] sm:$0xff]   ;;  %v7192_v36 = vrot.slane %v2331_v5, 5  ;;  %v7196_v28 = vrot.slane %v2337_v48, 4 }
 0x159   : > { %v1812_v1 = vsel %vm6455_vm10, %v1804_v47, %v1811_v50  ;;  %v2022_v52 = vsel %vm6714_vm13, %v2020_v41, %v2021_v46  ;;  %9615 = vst [vmem:[#allocation84_spill] sm:$0xff] %v7182_v7  ;;  %v7194_v50 = vrot.slane %v2340_v16, 5  ;;  %v9619_v46 = vshll.u32 %v7078_v61, 16  ;;  %6051 = vmatprep.subr.bf16.mxu1 %v7187_v53 }
 0x15a   : > { %v5534_v23 = vcombine.low %v1803_v12, %v1812_v1  ;;  %v2030_v2 = vsel %vm6714_vm13, %v2025_v63, %v6435_v3  ;;  %9616 = vst [vmem:[#allocation85_spill] sm:$0xff] %v7192_v36  ;;  %9618 = vst [vmem:[#allocation87_spill] sm:$0xff] %v7196_v28  ;;  %v9621_v47 = vshll.u32 %v7094_v35, 16  ;;  %v7207_v1 = vld [vmem:[#allocation2 + $0xfc] sm:$0xf]  ;;  %v1176_v3 = vshrl.u32 %v7178_v57, 16 }
 0x15b   : > { %9617 = vst [vmem:[#allocation86_spill] sm:$0xff] %v7194_v50  ;;  %v7200_v29 = vrot.slane %v9619_v46, 5  ;;  %v5561_v12 = vcombine.low %v2022_v52, %v2030_v2  ;;  %v9623_v48 = vmov %v9619_v46  ;;  %v9625_v46 = vshrl.u32 %v7094_v35, 16  ;;  %v7224_v52 = vld [vmem:[#allocation2 + $0x110] sm:$0xf] }
 0x15c   : > { %v7204_v41 = vrot.slane %v9621_v47, 5  ;;  %3100 = vrot.lane.b32.xlu0 %v5534_v23, %s6205_s7  ;;  %v7214_v63 = vor.u32 %v9623_v48, %v7123_v42  ;;  %v9627_v2 = vmov %v9621_v47  ;;  %v7232_v61 = vor.u32 %v2331_v5, %v7182_v7  ;;  %v6009_v47 = vpop.f32.mrf.mxu0  ;;  %v7256_v35 = vld [vmem:[#allocation2 + $0xb0] sm:$0xf] }
 0x15d   : > { %9620 = vst [vmem:[#allocation88_spill] sm:$0xff] %v7200_v29  ;;  %v7218_v29 = vrot.slane %v9625_v46, 4  ;;  %3250 = vrot.lane.b32.xlu1 %v5561_v12, %s6205_s7  ;;  %v7234_v48 = vor.u32 %v2340_v16, %v2339_v58  ;;  %v5593_v46 = vcombine.low %v7146_v0, %v2200_v13  ;;  %v7239_v14 = vrot.slane %v1176_v3, 7 }
 0x15e   : > { %9622 = vst [vmem:[#allocation89_spill] sm:$0xff] %v7204_v41  ;;  %9624 = vst [vmem:[#allocation90_spill] sm:$0xff] %v7214_v63  ;;  %v7228_v41 = vor.u32 %v9627_v2, %v1165_v62  ;;  %v7237_v63 = vld [vmem:[#allocation2 + $0x114] sm:$0xf]  ;;  %v7245_v12 = vrot.slane %v1176_v3, 4  ;;  %v5503_v5 = vcombine.low %v7178_v57, %v7207_v1  ;;  %v9395_v13 = vshrl.u32 %v7224_v52, 16  ;;  %v564_v50 = vpop.f32.mrf.mxu0 }
 0x15f   : > { %9626 = vst [vmem:[#allocation91_spill] sm:$0xff] %v7218_v29  ;;  %9629 = vst [vmem:[#allocation93_spill] sm:$0xff] %v7232_v61  ;;  %v9633_v16 = vshrl.u32 %v6428_v55, 16  ;;  %v573_v62 = vadd.f32 %v7026_v24, %v6009_v47  ;;  %v9635_v0 = vshll.u32 %v6654_v51, 16  ;;  %v9637_v23 = vshrl.u32 %v7237_v63, 16 }
 0x160   : > { %9628 = vst [vmem:[#allocation92_spill] sm:$0xff] %v7228_v41  ;;  %9630 = vst [vmem:[#allocation94_spill] sm:$0xff] %v7234_v48  ;;  %3410 = vrot.lane.b32.xlu0 %v5593_v46, %s6205_s7  ;;  %v1821_v3 = vrot.slane %v9395_v13, 7  ;;  %v9634_v46 = vshrl.u32 %v6654_v51, 16  ;;  %v565_v41 = vadd.f32 %v7026_v24, %v564_v50  ;;  %v9639_v13 = vshll.u32 %v7224_v52, 16 }
 0x161   : > { %9631 = vst [vmem:[#allocation95_spill] sm:$0xff] %v7239_v14  ;;  %9632 = vst [vmem:[#allocation96_spill] sm:$0xff] %v7245_v12  ;;  %v5455_v58 = vrot.slane %v9633_v16, 11  ;;  %2974 = vrot.lane.b32.xlu1 %v5503_v5, %s6205_s7  ;;  %v2032_v55 = vrot.slane %v9635_v0, 5  ;;  %v9636_v16 = vshll.u32 %v6656_v6, 16  ;;  %v1830_v47 = vrot.slane %v9637_v23, 7 }
 0x162   : > { %v2031_v28 = vrot.slane %v9634_v46, 4  ;;  %v609_v36 = vmax.f32 %v573_v62, 0.0  ;;  %v9638_v12 = vshrl.u32 %v6656_v6, 16  ;;  %v1824_v42 = vor.u32 %v9639_v13, %v1821_v3  ;;  %v2203_v51 = vld [vmem:[#allocation2 + $0xb4] sm:$0xf]  ;;  %v6144_v23 = vld [vmem:[%s9330_s3 + $0xa0] sm:$0xff]  }
 0x163   : > { %v2035_v2 = vrot.slane %v9636_v16, 5  ;;  %v1826_v46 = vrot.slane %v1821_v3, 4  ;;  %v2350_v0 = vshrl.u32 %v7256_v35, 16  ;;  %v6143_v16 = vld [vmem:[%s9330_s3 + $0xe0] sm:$0xff]   ;;  %v9640_v6 = vshll.u32 %v7237_v63, 16 }
 0x164   : > { %v2037_v5 = vrot.slane %v9638_v12, 4  ;;  %v2033_v29 = vor.u32 %v2032_v55, %v2031_v28  ;;  %v5708_v50 = vpack.c.bf16 %v609_v36, %v609_v36  ;;  %v607_v45 = vmax.f32 %v565_v41, 0.0  ;;  %v6145_v28 = vld [vmem:[%s9330_s3 + $0xd8] sm:$0xff]   ;;  %5847 = vmatprep.subr.bf16.mxu0 %v6143_v16 }
 0x165   : > { %v1833_v62 = vor.u32 %v9640_v6, %v1830_v47  ;;  %v9641_v13 = vshrl.u32 %v7207_v1, 16  ;;  %v1825_v55 = vsel %vm6455_vm10, %v5455_v58, %v1824_v42  ;;  %v2353_v44 = vshll.u32 %v7256_v35, 16  ;;  %5848 = vmatpush3.bf16.msra.mxu0 %v6144_v23  ;;  %v6146_v6 = vld [vmem:[%s9330_s3 + $0x98] sm:$0xff]  }
 0x166   : > { %v2038_v12 = vor.u32 %v2037_v5, %v2035_v2  ;;  %v2034_v40 = vrot.slane %v2033_v29, 4  ;;  %898 = vst.msk [vmem:[#allocation2 + $0x188] sm:$0xf] %vm611_vm8, %v5708_v50  ;;  %v5706_v41 = vpack.c.bf16 %v607_v45, %v607_v45  ;;  %v2359_v5 = vshrl.u32 %v2203_v51, 16  ;;  %5849 = vmatprep.subr.bf16.mxu0 %v6145_v28 }
 0x167   : > { %v1187_v3 = vrot.slane %v9641_v13, 7  ;;  %v1834_v47 = vsel %vm6455_vm10, %v1826_v46, %v1833_v62  ;;  %v9642_v13 = vshll.u32 %v7178_v57, 16  ;;  %v2362_v16 = vshll.u32 %v2203_v51, 16  ;;  %v6010_v46 = vpop.f32.mrf.mxu0 }
 0x168   : > { %v2039_v36 = vrot.slane %v2038_v12, 4  ;;  %v5535_v29 = vcombine.low %v1825_v55, %v1834_v47  ;;  %v2036_v58 = vsel %vm6714_vm13, %v2034_v40, %v2035_v2  ;;  %896 = vst.msk [vmem:[#allocation2 + $0x170] sm:$0xf] %vm611_vm8, %v5706_v41  ;;  %v7307_v23 = vrot.slane %v2350_v0, 7  ;;  %v7313_v12 = vld [vmem:[#allocation2 + $0x110] sm:$0xf] }
 0x169   : > { %v7299_v42 = vrot.slane %v9642_v13, 5  ;;  %v7309_v62 = vrot.slane %v2350_v0, 4  ;;  %v7311_v50 = vrot.slane %v2353_v44, 5  ;;  %v2361_v2 = vrot.slane %v2359_v5, 7  ;;  %5850 = vmatpush3.bf16.msra.mxu0 %v6146_v6  ;;  %v567_v41 = vpop.f32.mrf.mxu0  ;;  %v6148_v6 = vld [vmem:[%s9330_s3 + $0x90] sm:$0xff]   ;;  %v7639_v19 = vpop.permute.xlu0 %3082 }
 0x16a   : > { %v2044_v45 = vsel %vm6714_vm13, %v2039_v36, %v6437_v4  ;;  %9644 = vst [vmem:[#allocation98_spill] sm:$0xff] %v7307_v23  ;;  %3102 = vrot.lane.b32.xlu0 %v5535_v29, %s6205_s7  ;;  %v7316_v55 = vrot.slane %v2362_v16, 5  ;;  %v7318_v28 = vrot.slane %v2359_v5, 4  ;;  %v9649_v4 = vmov %v9642_v13  ;;  %v7332_v29 = vld [vmem:[#allocation2 + $0x114] sm:$0xf] }
 0x16b   : > { %9643 = vst [vmem:[#allocation97_spill] sm:$0xff] %v7299_v42  ;;  %9645 = vst [vmem:[#allocation99_spill] sm:$0xff] %v7309_v62  ;;  %v5562_v40 = vcombine.low %v2036_v58, %v2044_v45  ;;  %v7323_v47 = vor.u32 %v9649_v4, %v7239_v14  ;;  %v9651_v0 = vshrl.u32 %v7207_v1, 16  ;;  %v576_v13 = vadd.f32 %v7026_v24, %v6010_v46  ;;  %v664_v58 = vld [vmem:[#allocation2 + $0x124] sm:$0x8]  ;;  %v6147_v46 = vld [vmem:[%s9330_s3 + $0xd0] sm:$0xff]  }
 0x16c   : > { %9646 = vst [vmem:[#allocation100_spill] sm:$0xff] %v7311_v50  ;;  %9647 = vst [vmem:[#allocation101_spill] sm:$0xff] %v7316_v55  ;;  %v9653_v5 = vshll.u32 %v7207_v1, 16  ;;  %v5594_v4 = vcombine.low %v7256_v35, %v2203_v51  ;;  %v7357_v35 = vor.u32 %v2353_v44, %v7307_v23  ;;  %v5504_v55 = vcombine.low %v7313_v12, %v7332_v29  ;;  %v7363_v62 = vld [vmem:[#allocation2 + $0x12c] sm:$0xf] }
 0x16d   : > { %9648 = vst [vmem:[#allocation102_spill] sm:$0xff] %v7318_v28  ;;  %9650 = vst [vmem:[#allocation103_spill] sm:$0xff] %v7323_v47  ;;  %v7327_v36 = vrot.slane %v9651_v0, 4  ;;  %3252 = vrot.lane.b32.xlu1 %v5562_v40, %s6205_s7  ;;  %v1198_v0 = vshrl.u32 %v7313_v12, 16  ;;  %v6149_v40 = vld [vmem:[%s9330_s3 + $0xc8] sm:$0xff]   ;;  %v610_v51 = vmax.f32 %v576_v13, 0.0  ;;  %v7365_v50 = vor.u32 %v2362_v16, %v2361_v2  ;;  %5851 = vmatprep.subr.bf16.mxu0 %v6147_v46 }
 0x16e   : > { %v7336_v45 = vrot.slane %v9653_v5, 5  ;;  %v7354_v57 = vor.u32 %v9653_v5, %v1187_v3  ;;  %9656 = vst [vmem:[#allocation107_spill] sm:$0xff] %v7357_v35  ;;  %v7361_v28 = vld [vmem:[#allocation2 + $0x128] sm:$0xf]  ;;  %3412 = vrot.lane.b32.xlu0 %v5594_v4, %s6205_s7  ;;  %v568_v5 = vadd.f32 %v7026_v24, %v567_v41  ;;  %v1951_v14 = vld [vmem:[#allocation2 + $0xb8] sm:$0x1]  ;;  %5852 = vmatpush3.bf16.msra.mxu0 %v6148_v6 }
 0x16f   : > { %9652 = vst [vmem:[#allocation104_spill] sm:$0xff] %v7327_v36  ;;  %9657 = vst [vmem:[#allocation108_spill] sm:$0xff] %v7365_v50  ;;  %v5709_v44 = vpack.c.bf16 %v610_v51, %v610_v51  ;;  %v7371_v13 = vrot.slane %v1198_v0, 7  ;;  %v6150_v16 = vld [vmem:[%s9330_s3 + $0x88] sm:$0xff]   ;;  %v7379_v2 = vrot.slane %v1198_v0, 4  ;;  %v9404_v4 = vshrl.u32 %v7361_v28, 16  ;;  %5853 = vmatprep.subr.bf16.mxu0 %v6149_v40 }
 0x170   : > { %9654 = vst [vmem:[#allocation105_spill] sm:$0xff] %v7336_v45  ;;  %9655 = vst [vmem:[#allocation106_spill] sm:$0xff] %v7354_v57  ;;  %v665_v57 = vsel %vm6293_vm4, 0, %v664_v58  ;;  %v9405_v24 = vshrl.u32 %v7363_v62, 16  ;;  %v7385_v41 = vld [vmem:[#allocation2 + $0xc8] sm:$0xf] }
 0x171   : > { %9658 = vst [vmem:[#allocation109_spill] sm:$0xff] %v7371_v13  ;;  %9659 = vst [vmem:[#allocation110_spill] sm:$0xff] %v7379_v2  ;;  %2976 = vrot.lane.b32.xlu1 %v5504_v55, %s6205_s7  ;;  %v608_v58 = vmax.f32 %v568_v5, 0.0  ;;  %v9660_v0 = vshrl.u32 %v6751_v32, 16  ;;  %v9661_v55 = vshll.u32 %v6751_v32, 16  ;;  %v1843_v3 = vrot.slane %v9404_v4, 7 }
 0x172   : > { %666 = vst [vmem:[#allocation2 + $0x124] sm:$0x8] %v665_v57  ;;  %899 = vst.msk [vmem:[#allocation2 + $0x18c] sm:$0xf] %vm611_vm8, %v5709_v44  ;;  %v1852_v46 = vrot.slane %v9405_v24, 7  ;;  %v9662_v47 = vshll.u32 %v6762_v18, 16  ;;  %5854 = vmatpush3.bf16.msra.mxu0 %v6150_v16 }
 0x173   : > { %v2045_v51 = vrot.slane %v9660_v0, 4  ;;  %v2046_v57 = vrot.slane %v9661_v55, 5  ;;  %v9663_v44 = vshrl.u32 %v6762_v18, 16  ;;  %v5707_v1 = vpack.c.bf16 %v608_v58, %v608_v58  ;;  %v7401_v36 = vld [vmem:[#allocation2 + $0xcc] sm:$0xf]  ;;  %v6152_v58 = vld [vmem:[%s9330_s3 + $0x80] sm:$0xff]  }
 0x174   : > { %v2049_v40 = vrot.slane %v9662_v47, 5  ;;  %v2055_v2 = vshll.u32 %v1951_v14, 16  ;;  %v2372_v32 = vshrl.u32 %v7385_v41, 16  ;;  %v9664_v0 = vshrl.u32 %v7332_v29, 16  ;;  %v6151_v14 = vld [vmem:[%s9330_s3 + $0xc0] sm:$0xff]  }
 0x175   : > { %v2051_v5 = vrot.slane %v9663_v44, 4  ;;  %v2047_v6 = vor.u32 %v2046_v57, %v2045_v51  ;;  %v9665_v4 = vshll.u32 %v7313_v12, 16  ;;  %v9667_v47 = vshll.u32 %v7361_v28, 16  ;;  %897 = vst.msk [vmem:[#allocation2 + $0x174] sm:$0xf] %vm611_vm8, %v5707_v1  ;;  %5855 = vmatprep.subr.bf16.mxu0 %v6151_v14 }
 0x176   : > { %v1209_v55 = vrot.slane %v9664_v0, 7  ;;  %v1848_v16 = vrot.slane %v1843_v3, 4  ;;  %v2057_v57 = vrot.slane %v2055_v2, 5  ;;  %v9668_v44 = vshll.u32 %v7363_v62, 16  ;;  %v7424_v42 = vld [vmem:[#allocation2 + $0x128] sm:$0xf]  ;;  %5856 = vmatpush3.bf16.msra.mxu0 %v6152_v58 }
 0x177   : > { %v7408_v24 = vrot.slane %v9665_v4, 5  ;;  %v1846_v45 = vor.u32 %v9667_v47, %v1843_v3  ;;  %v2052_v18 = vor.u32 %v2051_v5, %v2049_v40  ;;  %v2048_v51 = vrot.slane %v2047_v6, 4  ;;  %6011 = vmatprep.subr.bf16.mxu0 %v7187_v53 }
 0x178   : > { %v2375_v4 = vshll.u32 %v7385_v41, 16  ;;  %v1855_v0 = vor.u32 %v9668_v44, %v1852_v46  ;;  %v2381_v5 = vshrl.u32 %v7401_v36, 16  ;;  %v7428_v3 = vrot.slane %v2372_v32, 7 }
 0x179   : > { %9666 = vst [vmem:[#allocation111_spill] sm:$0xff] %v7408_v24  ;;  %v2053_v47 = vrot.slane %v2052_v18, 4  ;;  %v2384_v24 = vshll.u32 %v7401_v36, 16  ;;  %v1578_v50 = vld [vmem:[#allocation2 + $0x124] sm:$0x8]  ;;  %v2050_v1 = vsel %vm6714_vm13, %v2048_v51, %v2049_v40  ;;  %v7430_v2 = vrot.slane %v2372_v32, 4 }
 0x17a   : > { %9669 = vst [vmem:[#allocation112_spill] sm:$0xff] %v7428_v3  ;;  %v7432_v6 = vrot.slane %v2375_v4, 5  ;;  %v1836_v46 = vshrl.u32 %v1578_v50, 16  ;;  %v2383_v44 = vrot.slane %v2381_v5, 7  ;;  %v9673_v14 = vshll.u32 %v7332_v29, 16 }
 0x17b   : > { %9670 = vst [vmem:[#allocation113_spill] sm:$0xff] %v7430_v2  ;;  %v2058_v18 = vsel %vm6714_vm13, %v2053_v47, %v2057_v57  ;;  %v7436_v35 = vrot.slane %v2384_v24, 5  ;;  %v7445_v51 = vrot.slane %v2381_v5, 4  ;;  %v9676_v50 = vshrl.u32 %v7332_v29, 16 }
 0x17c   : > { %9671 = vst [vmem:[#allocation114_spill] sm:$0xff] %v7432_v6  ;;  %v7441_v23 = vrot.slane %v9673_v14, 5  ;;  %v5563_v40 = vcombine.low %v2050_v1, %v2058_v18  ;;  %v5456_v57 = vrot.slane %v1836_v46, 11  ;;  %v1856_v47 = vsel %vm6455_vm10, %v1848_v16, %v1855_v0  ;;  %v667_v16 = vld [vmem:[#allocation2 + $0x13c] sm:$0x8] }
 0x17d   : > { %9672 = vst [vmem:[#allocation115_spill] sm:$0xff] %v7436_v35  ;;  %9675 = vst [vmem:[#allocation117_spill] sm:$0xff] %v7445_v51  ;;  %v7449_v58 = vrot.slane %v9676_v50, 4  ;;  %v1220_v53 = vshrl.u32 %v7424_v42, 16  ;;  %v9678_v14 = vshll.u32 %v7313_v12, 16  ;;  %v9680_v18 = vshll.u32 %v7332_v29, 16 }
 0x17e   : > { %9674 = vst [vmem:[#allocation116_spill] sm:$0xff] %v7441_v23  ;;  %3254 = vrot.lane.b32.xlu1 %v5563_v40, %s6205_s7  ;;  %v1223_v50 = vshll.u32 %v7424_v42, 16  ;;  %v7467_v0 = vld [vmem:[#allocation2 + $0x140] sm:$0xf]  ;;  %v1847_v32 = vsel %vm6455_vm10, %v5456_v57, %v1846_v45  ;;  %v7472_v12 = vor.u32 %v2375_v4, %v7428_v3  ;;  %v5595_v29 = vcombine.low %v7385_v41, %v7401_v36  ;;  %v709_v40 = vld [vmem:[#allocation2 + $0xd0] sm:$0x1] }
 0x17f   : > { %9677 = vst [vmem:[#allocation118_spill] sm:$0xff] %v7449_v58  ;;  %v7457_v1 = vor.u32 %v9678_v14, %v7371_v13  ;;  %v7461_v5 = vor.u32 %v9680_v18, %v1209_v55  ;;  %v7474_v14 = vor.u32 %v2384_v24, %v2383_v44  ;;  %v7478_v55 = vld [vmem:[#allocation2 + $0x144] sm:$0xf]  ;;  %v5536_v18 = vcombine.low %v1847_v32, %v1856_v47  ;;  %v7488_v4 = vld [vmem:[#allocation2 + $0xe0] sm:$0xf] }
 0x180   : > { %9682 = vst [vmem:[#allocation121_spill] sm:$0xff] %v7472_v12  ;;  %v1229_v46 = vshrl.u32 %v938_v59, 16  ;;  %v1232_v35 = vshll.u32 %v938_v59, 16  ;;  %v5505_v51 = vcombine.low %v7424_v42, %v938_v59  ;;  %v7481_v2 = vrot.slane %v1220_v53, 7  ;;  %v7498_v44 = vld [vmem:[#allocation2 + $0xe4] sm:$0xf] }
 0x181   : > { %9679 = vst [vmem:[#allocation119_spill] sm:$0xff] %v7457_v1  ;;  %9681 = vst [vmem:[#allocation120_spill] sm:$0xff] %v7461_v5  ;;  %v7483_v6 = vrot.slane %v1220_v53, 4  ;;  %v668_v45 = vsel %vm6293_vm4, 0, %v667_v16  ;;  %v9413_v24 = vshrl.u32 %v7467_v0, 16  ;;  %3104 = vrot.lane.b32.xlu0 %v5536_v18, %s6205_s7  ;;  %v7491_v36 = vrot.slane %v1223_v50, 5 }
 0x182   : > { %9683 = vst [vmem:[#allocation122_spill] sm:$0xff] %v7474_v14  ;;  %9684 = vst [vmem:[#allocation123_spill] sm:$0xff] %v7481_v2  ;;  %2978 = vrot.lane.b32.xlu1 %v5505_v51, %s6205_s7  ;;  %v9414_v59 = vshrl.u32 %v7478_v55, 16  ;;  %v710_v41 = vsel %vm6302_vm7, 0, %v709_v40  ;;  %v9687_v57 = vshrl.u32 %v6885_v37, 16  ;;  %v9688_v53 = vshll.u32 %v6885_v37, 16 }
 0x183   : > { %9685 = vst [vmem:[#allocation124_spill] sm:$0xff] %v7483_v6  ;;  %9686 = vst [vmem:[#allocation125_spill] sm:$0xff] %v7491_v36  ;;  %v1865_v32 = vrot.slane %v9413_v24, 7  ;;  %v9689_v16 = vshll.u32 %v6892_v49, 16  ;;  %v9690_v40 = vshrl.u32 %v6892_v49, 16  ;;  %v2394_v1 = vshrl.u32 %v7488_v4, 16 }
 0x184   : > { %669 = vst [vmem:[#allocation2 + $0x13c] sm:$0x8] %v668_v45  ;;  %711 = vst [vmem:[#allocation2 + $0xd0] sm:$0x1] %v710_v41  ;;  %v2059_v47 = vrot.slane %v9687_v57, 4  ;;  %v2060_v51 = vrot.slane %v9688_v53, 5  ;;  %v7535_v23 = vor.u32 %v1223_v50, %v7481_v2 }
 0x185   : > { %v2063_v18 = vrot.slane %v9689_v16, 5  ;;  %v1874_v45 = vrot.slane %v9414_v59, 7  ;;  %v2065_v42 = vrot.slane %v9690_v40, 4  ;;  %v2397_v24 = vshll.u32 %v7488_v4, 16  ;;  %3414 = vrot.lane.b32.xlu0 %v5595_v29, %s6205_s7  ;;  %v7547_v3 = vld [vmem:[#allocation2 + $0x144] sm:$0xf] }
 0x186   : > { %v1231_v41 = vrot.slane %v1229_v46, 7  ;;  %v7514_v36 = vrot.slane %v1232_v35, 5  ;;  %v2061_v57 = vor.u32 %v2060_v51, %v2059_v47  ;;  %v2403_v37 = vshrl.u32 %v7498_v44, 16  ;;  %v7528_v47 = vld [vmem:[#allocation2 + $0x140] sm:$0xf]  ;;  %9698 = vst [vmem:[#allocation132_spill] sm:$0xff] %v7535_v23 }
 0x187   : > { %v1870_v16 = vrot.slane %v1865_v32, 4  ;;  %v9692_v59 = vshll.u32 %v7478_v55, 16  ;;  %v2406_v49 = vshll.u32 %v7498_v44, 16  ;;  %v7522_v40 = vrot.slane %v1229_v46, 4 }
 0x188   : > { %9691 = vst [vmem:[#allocation126_spill] sm:$0xff] %v7514_v36  ;;  %v2066_v5 = vor.u32 %v2065_v42, %v2063_v18  ;;  %v7524_v13 = vrot.slane %v2394_v1, 4  ;;  %v7526_v58 = vrot.slane %v2397_v24, 5  ;;  %v2062_v51 = vrot.slane %v2061_v57, 4  ;;  %v670_v42 = vld [vmem:[#allocation2 + $0x154] sm:$0x8] }
 0x189   : > { %v1877_v6 = vor.u32 %v9692_v59, %v1874_v45  ;;  %9693 = vst [vmem:[#allocation127_spill] sm:$0xff] %v7522_v40  ;;  %v7530_v36 = vrot.slane %v2394_v1, 7  ;;  %v2405_v29 = vrot.slane %v2403_v37, 7  ;;  %v7532_v53 = vrot.slane %v2406_v49, 5 }
 0x18a   : > { %9694 = vst [vmem:[#allocation128_spill] sm:$0xff] %v7524_v13  ;;  %9695 = vst [vmem:[#allocation129_spill] sm:$0xff] %v7526_v58  ;;  %v7537_v59 = vor.u32 %v1232_v35, %v1231_v41  ;;  %v7541_v45 = vrot.slane %v2403_v37, 4  ;;  %v9701_v12 = vshll.u32 %v7467_v0, 16  ;;  %v1242_v50 = vshrl.u32 %v7528_v47, 16 }
 0x18b   : > { %9696 = vst [vmem:[#allocation130_spill] sm:$0xff] %v7530_v36  ;;  %9697 = vst [vmem:[#allocation131_spill] sm:$0xff] %v7532_v53  ;;  %v1581_v46 = vld [vmem:[#allocation2 + $0x13c] sm:$0x8]  ;;  %v1878_v1 = vsel %vm6455_vm10, %v1870_v16, %v1877_v6  ;;  %v1952_v14 = vld [vmem:[#allocation2 + $0xd0] sm:$0x1]  ;;  %v7558_v6 = vor.u32 %v2406_v49, %v2405_v29 }
 0x18c   : > { %9699 = vst [vmem:[#allocation133_spill] sm:$0xff] %v7537_v59  ;;  %9700 = vst [vmem:[#allocation134_spill] sm:$0xff] %v7541_v45  ;;  %v1858_v40 = vshrl.u32 %v1581_v46, 16  ;;  %v1868_v57 = vor.u32 %v9701_v12, %v1865_v32  ;;  %v2067_v35 = vrot.slane %v2066_v5, 4  ;;  %v2069_v41 = vshll.u32 %v1952_v14, 16 }
 0x18d   : > { %v2064_v12 = vsel %vm6714_vm13, %v2062_v51, %v2063_v18  ;;  %v7556_v32 = vor.u32 %v2397_v24, %v7530_v36  ;;  %9703 = vst [vmem:[#allocation136_spill] sm:$0xff] %v7558_v6  ;;  %v7560_v16 = vld [vmem:[#allocation2 + $0x158] sm:$0xf]  ;;  %v5596_v5 = vcombine.low %v7488_v4, %v7498_v44  ;;  %v1251_v14 = vshrl.u32 %v7547_v3, 16  ;;  %v7566_v37 = vld [vmem:[#allocation2 + $0x15c] sm:$0xf] }
 0x18e   : > { %v5457_v46 = vrot.slane %v1858_v40, 11  ;;  %v2071_v13 = vrot.slane %v2069_v41, 5  ;;  %v1254_v23 = vshll.u32 %v7547_v3, 16  ;;  %v7570_v40 = vrot.slane %v1242_v50, 7  ;;  %v712_v51 = vld [vmem:[#allocation2 + $0xe8] sm:$0x1] }
 0x18f   : > { %9702 = vst [vmem:[#allocation135_spill] sm:$0xff] %v7556_v32  ;;  %v7572_v24 = vrot.slane %v1242_v50, 4  ;;  %v671_v49 = vsel %vm6293_vm4, 0, %v670_v42  ;;  %v9706_v44 = vshll.u32 %v7528_v47, 16  ;;  %v9422_v53 = vshrl.u32 %v7560_v16, 16 }
 0x190   : > { %v1869_v18 = vsel %vm6455_vm10, %v5457_v46, %v1868_v57  ;;  %9704 = vst [vmem:[#allocation137_spill] sm:$0xff] %v7570_v40  ;;  %v2072_v4 = vsel %vm6714_vm13, %v2067_v35, %v2071_v13  ;;  %672 = vst [vmem:[#allocation2 + $0x154] sm:$0x8] %v671_v49  ;;  %v7583_v57 = vld [vmem:[#allocation2 + $0xf8] sm:$0xf]  ;;  %v5506_v50 = vcombine.low %v7528_v47, %v7547_v3  ;;  %v9425_v42 = vshrl.u32 %v7566_v37, 16 }
 0x191   : > { %9705 = vst [vmem:[#allocation138_spill] sm:$0xff] %v7572_v24  ;;  %v5537_v29 = vcombine.low %v1869_v18, %v1878_v1  ;;  %v7580_v41 = vrot.slane %v9706_v44, 5  ;;  %v5564_v46 = vcombine.low %v2064_v12, %v2072_v4  ;;  %v1887_v13 = vrot.slane %v9422_v53, 7  ;;  %v7598_v44 = vld [vmem:[#allocation2 + $0xfc] sm:$0xf] }
 0x192   : > { %v713_v35 = vsel %vm6302_vm7, 0, %v712_v51  ;;  %v9708_v18 = vshrl.u32 %v6961_v38, 16  ;;  %v9709_v12 = vshll.u32 %v6961_v38, 16  ;;  %v1896_v3 = vrot.slane %v9425_v42, 7 }
 0x193   : > { %9707 = vst [vmem:[#allocation139_spill] sm:$0xff] %v7580_v41  ;;  %3106 = vrot.lane.b32.xlu0 %v5537_v29, %s6205_s7  ;;  %3256 = vrot.lane.b32.xlu1 %v5564_v46, %s6205_s7  ;;  %714 = vst [vmem:[#allocation2 + $0xe8] sm:$0x1] %v713_v35  ;;  %v9710_v29 = vshll.u32 %v6996_v17, 16  ;;  %v9711_v51 = vshrl.u32 %v6996_v17, 16  ;;  %v1253_v45 = vrot.slane %v1251_v14, 7 }
 0x194   : > { %v2073_v49 = vrot.slane %v9708_v18, 4  ;;  %v2074_v4 = vrot.slane %v9709_v12, 5  ;;  %v2416_v18 = vshrl.u32 %v7583_v57, 16  ;;  %v2419_v58 = vshll.u32 %v7583_v57, 16 }
 0x195   : > { %v7605_v53 = vrot.slane %v9710_v29, 5  ;;  %v2079_v1 = vrot.slane %v9711_v51, 4  ;;  %v1892_v46 = vrot.slane %v1887_v13, 4  ;;  %v9712_v41 = vshll.u32 %v7566_v37, 16 }
 0x196   : > { %v2075_v12 = vor.u32 %v2074_v4, %v2073_v49  ;;  %v2425_v29 = vshrl.u32 %v7598_v44, 16  ;;  %v7617_v17 = vrot.slane %v2416_v18, 7  ;;  %v2428_v51 = vshll.u32 %v7598_v44, 16  ;;  %v7624_v49 = vld [vmem:[#allocation2 + $0x158] sm:$0xf] }
 0x197   : > { %v1899_v42 = vor.u32 %v9712_v41, %v1896_v3  ;;  %v2080_v35 = vor.u32 %v2079_v1, %v7605_v53  ;;  %3416 = vrot.lane.b32.xlu0 %v5596_v5, %s6205_s7  ;;  %v7620_v24 = vrot.slane %v2416_v18, 4  ;;  %v7622_v38 = vrot.slane %v2419_v58, 5  ;;  %2980 = vrot.lane.b32.xlu1 %v5506_v50, %s6205_s7  ;;  %v1584_v41 = vld [vmem:[#allocation2 + $0x154] sm:$0x8]  ;;  %v7631_v5 = vpop.permute.xlu1 %3084 }
 0x198   : > { %9713 = vst [vmem:[#allocation140_spill] sm:$0xff] %v7617_v17  ;;  %v7626_v4 = vrot.slane %v1254_v23, 5  ;;  %v7628_v59 = vrot.slane %v1251_v14, 4  ;;  %v2076_v1 = vrot.slane %v2075_v12, 4  ;;  %v2427_v3 = vrot.slane %v2425_v29, 7 }
 0x199   : > { %9714 = vst [vmem:[#allocation141_spill] sm:$0xff] %v7620_v24  ;;  %9715 = vst [vmem:[#allocation142_spill] sm:$0xff] %v7622_v38  ;;  %v1880_v2 = vshrl.u32 %v1584_v41, 16  ;;  %v9718_v6 = vshll.u32 %v7560_v16, 16  ;;  %v7637_v36 = vrot.slane %v2428_v51, 5  ;;  %v9720_v14 = vshll.u32 %v7528_v47, 16 }
 0x19a   : > { %9716 = vst [vmem:[#allocation143_spill] sm:$0xff] %v7626_v4  ;;  %9717 = vst [vmem:[#allocation144_spill] sm:$0xff] %v7628_v59  ;;  %v7646_v12 = vor.u32 %v1254_v23, %v1253_v45  ;;  %v1900_v41 = vsel %vm6455_vm10, %v1892_v46, %v1899_v42  ;;  %v7650_v59 = vrot.slane %v2425_v29, 4  ;;  %v1953_v32 = vld [vmem:[#allocation2 + $0xe8] sm:$0x1]  ;;  %v2081_v24 = vrot.slane %v2080_v35, 4 }
 0x19b   : > { %v1890_v18 = vor.u32 %v9718_v6, %v1887_v13  ;;  %9719 = vst [vmem:[#allocation145_spill] sm:$0xff] %v7637_v36  ;;  %v7644_v50 = vor.u32 %v9720_v14, %v7570_v40  ;;  %v7652_v6 = vld [vmem:[#allocation2 + $0x15c] sm:$0xf]  ;;  %v5458_v13 = vrot.slane %v1880_v2, 11  ;;  %v7655_v38 = vor.u32 %v2419_v58, %v7617_v17  ;;  %v673_v46 = vld [vmem:[#allocation2 + $0x16c] sm:$0x8]  ;;  %v7678_v36 = vpop.permute.xlu1 %2956 }
 0x19c   : > { %9722 = vst [vmem:[#allocation147_spill] sm:$0xff] %v7646_v12  ;;  %9723 = vst [vmem:[#allocation148_spill] sm:$0xff] %v7650_v59  ;;  %v1264_v4 = vshrl.u32 %v7624_v49, 16  ;;  %v2078_v23 = vsel %vm6714_vm13, %v2076_v1, %v7605_v53  ;;  %v2083_v47 = vshll.u32 %v1953_v32, 16  ;;  %v7661_v45 = vor.u32 %v2428_v51, %v2427_v3  ;;  %v7665_v29 = vld [vmem:[#allocation2 + $0x170] sm:$0xf] }
 0x19d   : > { %9721 = vst [vmem:[#allocation146_spill] sm:$0xff] %v7644_v50  ;;  %9724 = vst [vmem:[#allocation149_spill] sm:$0xff] %v7655_v38  ;;  %v1891_v2 = vsel %vm6455_vm10, %v5458_v13, %v1890_v18  ;;  %v5597_v58 = vcombine.low %v7583_v57, %v7598_v44  ;;  %v1267_v35 = vshll.u32 %v7624_v49, 16  ;;  %v1273_v14 = vshrl.u32 %v7652_v6, 16  ;;  %v7673_v53 = vld [vmem:[#allocation2 + $0x174] sm:$0xf]  ;;  %v7685_v13 = vpop.permute.xlu0 %2954 }
 0x19e   : > { %9725 = vst [vmem:[#allocation150_spill] sm:$0xff] %v7661_v45  ;;  %v5538_v32 = vcombine.low %v1891_v2, %v1900_v41  ;;  %v2085_v51 = vrot.slane %v2083_v47, 5  ;;  %v7675_v1 = vrot.slane %v1264_v4, 7  ;;  %v1276_v3 = vshll.u32 %v7652_v6, 16  ;;  %v715_v42 = vld [vmem:[#allocation2 + $0x100] sm:$0x1] }
 0x19f   : > { %v1275_v59 = vrot.slane %v1273_v14, 7  ;;  %v7680_v18 = vrot.slane %v1264_v4, 4  ;;  %v674_v57 = vsel %vm6293_vm4, 0, %v673_v46  ;;  %v9435_v44 = vshrl.u32 %v7665_v29, 16  ;;  %v7694_v50 = vld [vmem:[#allocation2 + $0x110] sm:$0xf] }
 0x1a0   : > { %9726 = vst [vmem:[#allocation151_spill] sm:$0xff] %v7675_v1  ;;  %3108 = vrot.lane.b32.xlu0 %v5538_v32, %s6205_s7  ;;  %v2086_v41 = vsel %vm6714_vm13, %v2081_v24, %v2085_v51  ;;  %v5507_v47 = vcombine.low %v7624_v49, %v7652_v6  ;;  %675 = vst [vmem:[#allocation2 + $0x16c] sm:$0x8] %v674_v57  ;;  %v9437_v2 = vshrl.u32 %v7673_v53, 16  ;;  %v716_v32 = vsel %vm6302_vm7, 0, %v715_v42 }
 0x1a1   : > { %9727 = vst [vmem:[#allocation152_spill] sm:$0xff] %v7680_v18  ;;  %v5565_v46 = vcombine.low %v2078_v23, %v2086_v41  ;;  %v1909_v12 = vrot.slane %v9435_v44, 7  ;;  %v9728_v18 = vshrl.u32 %v7112_v43, 16  ;;  %v7702_v51 = vld [vmem:[#allocation2 + $0x114] sm:$0xf]  ;;  %v9729_v6 = vshll.u32 %v7112_v43, 16  ;;  %v7732_v17 = vpop.permute.xlu0 %3086 }
 0x1a2   : > { %v1918_v49 = vrot.slane %v9437_v2, 7  ;;  %717 = vst [vmem:[#allocation2 + $0x100] sm:$0x1] %v716_v32  ;;  %v9730_v23 = vshll.u32 %v7119_v33, 16  ;;  %v9731_v44 = vshrl.u32 %v7119_v33, 16  ;;  %v2438_v40 = vshrl.u32 %v7694_v50, 16 }
 0x1a3   : > { %v2087_v24 = vrot.slane %v9728_v18, 4  ;;  %v2088_v57 = vrot.slane %v9729_v6, 5  ;;  %3258 = vrot.lane.b32.xlu1 %v5565_v46, %s6205_s7  ;;  %v1914_v18 = vrot.slane %v1909_v12, 4  ;;  %v2441_v2 = vshll.u32 %v7694_v50, 16 }
 0x1a4   : > { %v7710_v41 = vrot.slane %v9730_v23, 5  ;;  %v2093_v4 = vrot.slane %v9731_v44, 4  ;;  %3418 = vrot.lane.b32.xlu0 %v5597_v58, %s6205_s7  ;;  %v9732_v43 = vshll.u32 %v7673_v53, 16  ;;  %v2447_v33 = vshrl.u32 %v7702_v51, 16  ;;  %v7723_v44 = vpop.permute.xlu1 %2958 }
 0x1a5   : > { %v2089_v6 = vor.u32 %v2088_v57, %v2087_v24  ;;  %v7725_v46 = vrot.slane %v2438_v40, 7  ;;  %v2450_v42 = vshll.u32 %v7702_v51, 16  ;;  %v7728_v38 = vrot.slane %v2438_v40, 4  ;;  %v7741_v57 = vld [vmem:[#allocation2 + $0x170] sm:$0xf] }
 0x1a6   : > { %v1921_v32 = vor.u32 %v9732_v43, %v1918_v49  ;;  %v2094_v23 = vor.u32 %v2093_v4, %v7710_v41  ;;  %v7730_v45 = vrot.slane %v2441_v2, 5  ;;  %v7735_v58 = vor.u32 %v1267_v35, %v7675_v1 }
 0x1a7   : > { %9733 = vst [vmem:[#allocation153_spill] sm:$0xff] %v7725_v46  ;;  %9734 = vst [vmem:[#allocation154_spill] sm:$0xff] %v7728_v38  ;;  %v7737_v24 = vrot.slane %v1267_v35, 5  ;;  %v7739_v4 = vrot.slane %v1276_v3, 5  ;;  %v2090_v49 = vrot.slane %v2089_v6, 4  ;;  %2982 = vrot.lane.b32.xlu1 %v5507_v47, %s6205_s7  ;;  %v2449_v30 = vrot.slane %v2447_v33, 7 }
 0x1a8   : > { %9735 = vst [vmem:[#allocation155_spill] sm:$0xff] %v7730_v45  ;;  %9736 = vst [vmem:[#allocation156_spill] sm:$0xff] %v7735_v58  ;;  %v1587_v43 = vld [vmem:[#allocation2 + $0x16c] sm:$0x8]  ;;  %v7746_v61 = vrot.slane %v2450_v42, 5  ;;  %v7748_v48 = vrot.slane %v2447_v33, 4  ;;  %v7750_v1 = vor.u32 %v1276_v3, %v1275_v59  ;;  %v1922_v47 = vsel %vm6455_vm10, %v1914_v18, %v1921_v32 }
 0x1a9   : > { %9737 = vst [vmem:[#allocation157_spill] sm:$0xff] %v7737_v24  ;;  %9738 = vst [vmem:[#allocation158_spill] sm:$0xff] %v7739_v4  ;;  %v7752_v35 = vrot.slane %v1273_v14, 4  ;;  %v1902_v58 = vshrl.u32 %v1587_v43, 16  ;;  %v9743_v6 = vshll.u32 %v7665_v29, 16  ;;  %v2095_v11 = vrot.slane %v2094_v23, 4 }
 0x1aa   : > { %9739 = vst [vmem:[#allocation159_spill] sm:$0xff] %v7746_v61  ;;  %9740 = vst [vmem:[#allocation160_spill] sm:$0xff] %v7748_v48  ;;  %v7756_v24 = vld [vmem:[#allocation2 + $0x174] sm:$0xf]  ;;  %v1954_v7 = vld [vmem:[#allocation2 + $0x100] sm:$0x1]  ;;  %v7761_v40 = vor.u32 %v2441_v2, %v7725_v46  ;;  %v2092_v14 = vsel %vm6714_vm13, %v2090_v49, %v7710_v41  ;;  %v7771_v18 = vor.u32 %v2450_v42, %v2449_v30  ;;  %v7781_v41 = vpop.permute.xlu0 %3088 }
 0x1ab   : > { %9741 = vst [vmem:[#allocation161_spill] sm:$0xff] %v7750_v1  ;;  %9742 = vst [vmem:[#allocation162_spill] sm:$0xff] %v7752_v35  ;;  %v1912_v4 = vor.u32 %v9743_v6, %v1909_v12  ;;  %v5459_v3 = vrot.slane %v1902_v58, 11  ;;  %v2097_v33 = vshll.u32 %v1954_v7, 16  ;;  %v1286_v12 = vshrl.u32 %v7741_v57, 16  ;;  %v7769_v6 = vpop.permute.xlu1 %2960 }
 0x1ac   : > { %9744 = vst [vmem:[#allocation163_spill] sm:$0xff] %v7761_v40  ;;  %v676_v43 = vld [vmem:[#allocation2 + $0x184] sm:$0x8]  ;;  %9745 = vst [vmem:[#allocation164_spill] sm:$0xff] %v7769_v6  ;;  %v5598_v2 = vcombine.low %v7694_v50, %v7702_v51  ;;  %v1289_v32 = vshll.u32 %v7741_v57, 16  ;;  %v1295_v23 = vshrl.u32 %v7756_v24, 16  ;;  %v5508_v42 = vcombine.low %v7741_v57, %v7756_v24 }
 0x1ad   : > { %9746 = vst [vmem:[#allocation165_spill] sm:$0xff] %v7771_v18  ;;  %v7777_v58 = vld [vmem:[#allocation2 + $0x188] sm:$0xf]  ;;  %v7779_v59 = vld [vmem:[#allocation2 + $0x18c] sm:$0xf]  ;;  %v1913_v7 = vsel %vm6455_vm10, %v5459_v3, %v1912_v4  ;;  %v2099_v49 = vrot.slane %v2097_v33, 5 }
 0x1ae   : > { %v718_v50 = vld [vmem:[#allocation2 + $0x118] sm:$0x1]  ;;  %v5539_v51 = vcombine.low %v1913_v7, %v1922_v47  ;;  %v7788_v61 = vrot.slane %v1286_v12, 7  ;;  %v7790_v48 = vrot.slane %v1295_v23, 7  ;;  %v677_v38 = vsel %vm6293_vm4, 0, %v676_v43 }
 0x1af   : > { %v2100_v45 = vsel %vm6714_vm13, %v2095_v11, %v2099_v49  ;;  %v7796_v1 = vrot.slane %v1286_v12, 4  ;;  %678 = vst [vmem:[#allocation2 + $0x184] sm:$0x8] %v677_v38  ;;  %v9447_v4 = vshrl.u32 %v7777_v58, 16  ;;  %v9448_v3 = vshrl.u32 %v7779_v59, 16 }
 0x1b0   : > { %9747 = vst [vmem:[#allocation166_spill] sm:$0xff] %v7788_v61  ;;  %v7800_v57 = vld [vmem:[#allocation2 + $0x128] sm:$0xf]  ;;  %3110 = vrot.lane.b32.xlu0 %v5539_v51, %s6205_s7  ;;  %v5566_v47 = vcombine.low %v2092_v14, %v2100_v45  ;;  %v719_v43 = vsel %vm6302_vm7, 0, %v718_v50  ;;  %v9749_v7 = vshrl.u32 %v7224_v52, 16  ;;  %v9750_v51 = vshll.u32 %v7224_v52, 16  ;;  %v7820_v50 = vpop.permute.xlu1 %2962 }
 0x1b1   : > { %9748 = vst [vmem:[#allocation167_spill] sm:$0xff] %v7796_v1  ;;  %v7808_v12 = vld [vmem:[#allocation2 + $0x12c] sm:$0xf]  ;;  %v1931_v38 = vrot.slane %v9447_v4, 7  ;;  %v1940_v49 = vrot.slane %v9448_v3, 7  ;;  %v9751_v14 = vshll.u32 %v7237_v63, 16  ;;  %v7828_v3 = vpop.permute.xlu0 %3090 }
 0x1b2   : > { %v2101_v11 = vrot.slane %v9749_v7, 4  ;;  %720 = vst [vmem:[#allocation2 + $0x118] sm:$0x1] %v719_v43  ;;  %v2102_v45 = vrot.slane %v9750_v51, 5  ;;  %9752 = vst [vmem:[#allocation168_spill] sm:$0xff] %v7820_v50  ;;  %3260 = vrot.lane.b32.xlu1 %v5566_v47, %s6205_s7  ;;  %v9753_v33 = vshrl.u32 %v7237_v63, 16 }
 0x1b3   : > { %v7818_v30 = vrot.slane %v9751_v14, 5  ;;  %v2460_v1 = vshrl.u32 %v7800_v57, 16  ;;  %9754 = vst [vmem:[#allocation169_spill] sm:$0xff] %v7828_v3  ;;  %v1936_v52 = vrot.slane %v1931_v38, 4  ;;  %v9755_v51 = vshll.u32 %v7779_v59, 16 }
 0x1b4   : > { %v2107_v4 = vrot.slane %v9753_v33, 4  ;;  %v2103_v35 = vor.u32 %v2102_v45, %v2101_v11  ;;  %v2469_v18 = vshrl.u32 %v7808_v12, 16  ;;  %3420 = vrot.lane.b32.xlu0 %v5598_v2, %s6205_s7  ;;  %v7834_v47 = vrot.slane %v1289_v32, 5  ;;  %v721_v2 = vld [vmem:[#allocation2 + $0x130] sm:$0x1] }
 0x1b5   : > { %v1943_v14 = vor.u32 %v9755_v51, %v1940_v49  ;;  %v9757_v63 = vshll.u32 %v7756_v24, 16  ;;  %v9452_v43 = vshll.u32 %v7808_v12, 16  ;;  %v7842_v40 = vrot.slane %v1295_v23, 4 }
 0x1b6   : > { %9756 = vst [vmem:[#allocation170_spill] sm:$0xff] %v7834_v47  ;;  %v2108_v7 = vor.u32 %v2107_v4, %v7818_v30  ;;  %v2104_v46 = vrot.slane %v2103_v35, 4  ;;  %v7844_v54 = vrot.slane %v2460_v1, 4  ;;  %v9761_v11 = vshll.u32 %v7800_v57, 16  ;;  %2984 = vrot.lane.b32.xlu1 %v5508_v42, %s6205_s7  ;;  %v1590_v51 = vld [vmem:[#allocation2 + $0x184] sm:$0x8] }
 0x1b7   : > { %v7838_v33 = vrot.slane %v9757_v63, 5  ;;  %9759 = vst [vmem:[#allocation172_spill] sm:$0xff] %v7842_v40  ;;  %v7851_v45 = vor.u32 %v1289_v32, %v7788_v61  ;;  %v9764_v4 = vshll.u32 %v7777_v58, 16  ;;  %v1944_v23 = vsel %vm6455_vm10, %v1936_v52, %v1943_v14  ;;  %v7862_v40 = vld [vmem:[#allocation2 + $0x140] sm:$0xf]  ;;  %v7870_v61 = vpop.permute.xlu1 %2964 }
 0x1b8   : > { %9760 = vst [vmem:[#allocation173_spill] sm:$0xff] %v7844_v54  ;;  %v7848_v49 = vrot.slane %v9761_v11, 5  ;;  %v7860_v35 = vrot.slane %v9452_v43, 5  ;;  %v1924_v11 = vshrl.u32 %v1590_v51, 16  ;;  %v7868_v42 = vld [vmem:[#allocation2 + $0x144] sm:$0xf]  ;;  %v2106_v52 = vsel %vm6714_vm13, %v2104_v46, %v7818_v30  ;;  %v7881_v43 = vpop.permute.xlu0 %3092 }
 0x1b9   : > { %9758 = vst [vmem:[#allocation171_spill] sm:$0xff] %v7838_v33  ;;  %9763 = vst [vmem:[#allocation175_spill] sm:$0xff] %v7851_v45  ;;  %v1934_v63 = vor.u32 %v9764_v4, %v1931_v38  ;;  %v2109_v33 = vrot.slane %v2108_v7, 4  ;;  %v7866_v45 = vrot.slane %v2469_v18, 4  ;;  %v1955_v38 = vld [vmem:[#allocation2 + $0x118] sm:$0x1] }
 0x1ba   : > { %9762 = vst [vmem:[#allocation174_spill] sm:$0xff] %v7848_v49  ;;  %9765 = vst [vmem:[#allocation176_spill] sm:$0xff] %v7860_v35  ;;  %v722_v14 = vsel %vm6302_vm7, 0, %v721_v2  ;;  %v9768_v51 = vshrl.u32 %v7361_v28, 16  ;;  %v9769_v4 = vshll.u32 %v7361_v28, 16  ;;  %v5460_v54 = vrot.slane %v1924_v11, 11 }
 0x1bb   : > { %9766 = vst [vmem:[#allocation177_spill] sm:$0xff] %v7866_v45  ;;  %9767 = vst [vmem:[#allocation178_spill] sm:$0xff] %v7870_v61  ;;  %v2111_v49 = vshll.u32 %v1955_v38, 16  ;;  %v9771_v61 = vshll.u32 %v7363_v62, 16  ;;  %v9772_v2 = vshrl.u32 %v7363_v62, 16  ;;  %v2485_v28 = vshll.u32 %v7862_v40, 16 }
 0x1bc   : > { %v2115_v7 = vrot.slane %v9768_v51, 4  ;;  %v2116_v32 = vrot.slane %v9769_v4, 5  ;;  %9770 = vst [vmem:[#allocation179_spill] sm:$0xff] %v7881_v43  ;;  %723 = vst [vmem:[#allocation2 + $0x130] sm:$0x1] %v722_v14  ;;  %v2482_v51 = vshrl.u32 %v7862_v40, 16  ;;  %v1935_v11 = vsel %vm6455_vm10, %v5460_v54, %v1934_v63 }
 0x1bd   : > { %v7887_v46 = vrot.slane %v9771_v61, 5  ;;  %v2121_v50 = vrot.slane %v9772_v2, 4  ;;  %v2113_v38 = vrot.slane %v2111_v49, 5  ;;  %v2491_v4 = vshrl.u32 %v7868_v42, 16  ;;  %v724_v54 = vld [vmem:[#allocation2 + $0x148] sm:$0x1]  ;;  %v7906_v49 = vpop.permute.xlu1 %3242 }
 0x1be   : > { %v2117_v30 = vor.u32 %v2116_v32, %v2115_v7  ;;  %v2494_v14 = vshll.u32 %v7868_v42, 16  ;;  %v5540_v47 = vcombine.low %v1935_v11, %v1944_v23  ;;  %v7897_v45 = vrot.slane %v2460_v1, 7 }
 0x1bf   : > { %v2122_v32 = vor.u32 %v2121_v50, %v7887_v46  ;;  %v2114_v62 = vsel %vm6714_vm13, %v2109_v33, %v2113_v38  ;;  %v2471_v7 = vrot.slane %v2469_v18, 7  ;;  %v7902_v2 = vrot.slane %v2482_v51, 4  ;;  %v7916_v18 = vld [vmem:[#allocation2 + $0x158] sm:$0xf]  ;;  %v7918_v33 = vpop.permute.xlu0 %3402 }
 0x1c0   : > { %v2118_v61 = vrot.slane %v2117_v30, 4  ;;  %v7904_v35 = vrot.slane %v2485_v28, 5  ;;  %3112 = vrot.lane.b32.xlu0 %v5540_v47, %s6205_s7  ;;  %v5567_v63 = vcombine.low %v2106_v52, %v2114_v62  ;;  %v5599_v1 = vcombine.low %v7800_v57, %v7808_v12  ;;  %v7926_v52 = vld [vmem:[#allocation2 + $0x15c] sm:$0xf] }
 0x1c1   : > { %9773 = vst [vmem:[#allocation180_spill] sm:$0xff] %v7902_v2  ;;  %v7914_v23 = vrot.slane %v2482_v51, 7  ;;  %v2493_v30 = vrot.slane %v2491_v4, 7  ;;  %v7922_v38 = vrot.slane %v2494_v14, 5  ;;  %v7924_v47 = vrot.slane %v2491_v4, 4 }
 0x1c2   : > { %9774 = vst [vmem:[#allocation181_spill] sm:$0xff] %v7904_v35  ;;  %v2120_v50 = vsel %vm6714_vm13, %v2118_v61, %v7887_v46  ;;  %3262 = vrot.lane.b32.xlu1 %v5567_v63, %s6205_s7  ;;  %v2123_v46 = vrot.slane %v2122_v32, 4  ;;  %v725_v51 = vsel %vm6302_vm7, 0, %v724_v54  ;;  %v9777_v61 = vshrl.u32 %v7467_v0, 16 }
 0x1c3   : > { %9775 = vst [vmem:[#allocation182_spill] sm:$0xff] %v7922_v38  ;;  %9776 = vst [vmem:[#allocation183_spill] sm:$0xff] %v7924_v47  ;;  %v1956_v62 = vld [vmem:[#allocation2 + $0x130] sm:$0x1]  ;;  %v9778_v56 = vshll.u32 %v7467_v0, 16  ;;  %v9779_v2 = vshll.u32 %v7478_v55, 16 }
 0x1c4   : > { %v2129_v43 = vrot.slane %v9777_v61, 4  ;;  %v2125_v11 = vshll.u32 %v1956_v62, 16  ;;  %726 = vst [vmem:[#allocation2 + $0x148] sm:$0x1] %v725_v51  ;;  %v9780_v32 = vshrl.u32 %v7478_v55, 16  ;;  %v9781_v54 = vshll.u32 %v7756_v24, 16  ;;  %3422 = vrot.lane.b32.xlu0 %v5599_v1, %s6205_s7  ;;  %v7961_v24 = vpop.permute.xlu1 %2966 }
 0x1c5   : > { %v2130_v3 = vrot.slane %v9778_v56, 5  ;;  %v7939_v35 = vrot.slane %v9779_v2, 5  ;;  %v9783_v56 = vshll.u32 %v7800_v57, 16  ;;  %v2504_v51 = vshrl.u32 %v7916_v18, 16 }
 0x1c6   : > { %v2135_v63 = vrot.slane %v9780_v32, 4  ;;  %v7946_v6 = vor.u32 %v9781_v54, %v7790_v48  ;;  %v9785_v2 = vshll.u32 %v7808_v12, 16  ;;  %v2127_v55 = vrot.slane %v2125_v11, 5  ;;  %v727_v12 = vld [vmem:[#allocation2 + $0x160] sm:$0x1] }
 0x1c7   : > { %v7951_v0 = vor.u32 %v9783_v56, %v7897_v45  ;;  %v2131_v62 = vor.u32 %v2130_v3, %v2129_v43  ;;  %v2507_v32 = vshll.u32 %v7916_v18, 16  ;;  %v2516_v48 = vshll.u32 %v7926_v52, 16 }
 0x1c8   : > { %9782 = vst [vmem:[#allocation184_spill] sm:$0xff] %v7946_v6  ;;  %v7957_v61 = vor.u32 %v9785_v2, %v2471_v7  ;;  %v7964_v57 = vor.u32 %v2485_v28, %v7914_v23  ;;  %v7966_v54 = vor.u32 %v2494_v14, %v2493_v30  ;;  %v5600_v3 = vcombine.low %v7862_v40, %v7868_v42  ;;  %v7971_v7 = vpop.permute.xlu0 %3094  ;;  %v2226_v30 = vld [vmem:[#allocation2 + $0x170] sm:$0xf] }
 0x1c9   : > { %9784 = vst [vmem:[#allocation185_spill] sm:$0xff] %v7951_v0  ;;  %v2513_v43 = vshrl.u32 %v7926_v52, 16  ;;  %v2128_v1 = vsel %vm6714_vm13, %v2123_v46, %v2127_v55  ;;  %v2132_v11 = vrot.slane %v2131_v62, 4  ;;  %v2136_v56 = vor.u32 %v2135_v63, %v7939_v35  ;;  %v8004_v0 = vpop.permute.xlu1 %3244 }
 0x1ca   : > { %9786 = vst [vmem:[#allocation186_spill] sm:$0xff] %v7964_v57  ;;  %9787 = vst [vmem:[#allocation187_spill] sm:$0xff] %v7966_v54  ;;  %v5601_v28 = vcombine.low %v7916_v18, %v7926_v52  ;;  %v5568_v2 = vcombine.low %v2120_v50, %v2128_v1  ;;  %3424 = vrot.lane.b32.xlu0 %v5600_v3, %s6205_s7  ;;  %v7979_v14 = vrot.slane %v2504_v51, 7  ;;  %v7981_v42 = vrot.slane %v2504_v51, 4  ;;  %v7991_v18 = vld [vmem:[#allocation2 + $0x174] sm:$0xf] }
 0x1cb   : > { %v2515_v40 = vrot.slane %v2513_v43, 7  ;;  %v7983_v4 = vrot.slane %v2507_v32, 5  ;;  %v7985_v38 = vrot.slane %v2516_v48, 5  ;;  %v728_v46 = vsel %vm6302_vm7, 0, %v727_v12  ;;  %v1957_v50 = vld [vmem:[#allocation2 + $0x148] sm:$0x1] }
 0x1cc   : > { %9788 = vst [vmem:[#allocation188_spill] sm:$0xff] %v7981_v42  ;;  %v9791_v63 = vshrl.u32 %v7560_v16, 16  ;;  %3264 = vrot.lane.b32.xlu1 %v5568_v2, %s6205_s7  ;;  %v7994_v52 = vrot.slane %v2513_v43, 4  ;;  %729 = vst [vmem:[#allocation2 + $0x160] sm:$0x1] %v728_v46  ;;  %v9793_v51 = vshll.u32 %v7560_v16, 16  ;;  %v2134_v43 = vsel %vm6714_vm13, %v2132_v11, %v7939_v35 }
 0x1cd   : > { %9789 = vst [vmem:[#allocation189_spill] sm:$0xff] %v7983_v4  ;;  %9790 = vst [vmem:[#allocation190_spill] sm:$0xff] %v7985_v38  ;;  %v9794_v3 = vshll.u32 %v7566_v37, 16  ;;  %v9795_v12 = vshrl.u32 %v7566_v37, 16  ;;  %v2137_v6 = vrot.slane %v2136_v56, 4  ;;  %v2526_v57 = vshrl.u32 %v2226_v30, 16 }
 0x1ce   : > { %v2143_v62 = vrot.slane %v9791_v63, 4  ;;  %9792 = vst [vmem:[#allocation191_spill] sm:$0xff] %v7994_v52  ;;  %v2144_v55 = vrot.slane %v9793_v51, 5  ;;  %v2139_v63 = vshll.u32 %v1957_v50, 16  ;;  %v2529_v54 = vshll.u32 %v2226_v30, 16  ;;  %3426 = vrot.lane.b32.xlu0 %v5601_v28, %s6205_s7  ;;  %v8012_v51 = vpop.permute.xlu0 %3404 }
 0x1cf   : > { %v8000_v1 = vrot.slane %v9794_v3, 5  ;;  %v2149_v47 = vrot.slane %v9795_v12, 4  ;;  %v2535_v46 = vshrl.u32 %v7991_v18, 16  ;;  %v8015_v56 = vor.u32 %v2507_v32, %v7979_v14  ;;  %v685_v12 = vld [vmem:[#allocation2 + $0x10] sm:$0x1] }
 0x1d0   : > { %v2145_v16 = vor.u32 %v2144_v55, %v2143_v62  ;;  %v2141_v37 = vrot.slane %v2139_v63, 5  ;;  %v8017_v50 = vor.u32 %v2516_v48, %v2515_v40  ;;  %v2538_v3 = vshll.u32 %v7991_v18, 16  ;;  %v730_v40 = vld [vmem:[#allocation2 + $0x178] sm:$0x1] }
 0x1d1   : > { %v2150_v2 = vor.u32 %v2149_v47, %v8000_v1  ;;  %9796 = vst [vmem:[#allocation192_spill] sm:$0xff] %v8015_v56  ;;  %v8024_v47 = vrot.slane %v2526_v57, 7  ;;  %v2537_v28 = vrot.slane %v2535_v46, 7  ;;  %v8028_v32 = vrot.slane %v2526_v57, 4 }
 0x1d2   : > { %9797 = vst [vmem:[#allocation193_spill] sm:$0xff] %v8017_v50  ;;  %v2142_v62 = vsel %vm6714_vm13, %v2137_v6, %v2141_v37  ;;  %v2146_v55 = vrot.slane %v2145_v16, 4  ;;  %v8030_v48 = vrot.slane %v2529_v54, 5  ;;  %v5602_v50 = vcombine.low %v2226_v30, %v7991_v18 }
 0x1d3   : > { %9798 = vst [vmem:[#allocation194_spill] sm:$0xff] %v8028_v32  ;;  %v5569_v63 = vcombine.low %v2134_v43, %v2142_v62  ;;  %v2151_v56 = vrot.slane %v2150_v2, 4  ;;  %v686_v35 = vsel %vm6302_vm7, 0, %v685_v12  ;;  %v1958_v11 = vld [vmem:[#allocation2 + $0x160] sm:$0x1]  ;;  %v8035_v38 = vrot.slane %v2538_v3, 5  ;;  %v8045_v43 = vpop.permute.xlu1 %2968 }
 0x1d4   : > { %9799 = vst [vmem:[#allocation195_spill] sm:$0xff] %v8030_v48  ;;  %v8037_v52 = vrot.slane %v2535_v46, 4  ;;  %687 = vst [vmem:[#allocation2 + $0x10] sm:$0x1] %v686_v35  ;;  %v1323_v6 = vor.u32 %v6365_v27, %v6362_v15  ;;  %v9802_v57 = vshll.u32 %v6344_v60, 16  ;;  %v2153_v30 = vshll.u32 %v1958_v11, 16  ;;  %3428 = vrot.lane.b32.xlu0 %v5602_v50, %s6205_s7  ;;  %v8057_v60 = vpop.permute.xlu0 %3096 }
 0x1d5   : > { %9800 = vst [vmem:[#allocation196_spill] sm:$0xff] %v8035_v38  ;;  %3266 = vrot.lane.b32.xlu1 %v5569_v63, %s6205_s7  ;;  %v731_v18 = vsel %vm6302_vm7, 0, %v730_v40  ;;  %v9803_v2 = vshrl.u32 %v7665_v29, 16  ;;  %v9804_v37 = vshll.u32 %v7665_v29, 16  ;;  %v8055_v27 = vld [vmem:[#allocation2 + $0x188] sm:$0xf]  ;;  %v8060_v12 = vor.u32 %v2529_v54, %v8024_v47 }
 0x1d6   : > { %9801 = vst [vmem:[#allocation197_spill] sm:$0xff] %v8037_v52  ;;  %v8043_v16 = vrot.slane %v9802_v57, 5  ;;  %v1324_v35 = vrot.slane %v1323_v6, 4  ;;  %732 = vst [vmem:[#allocation2 + $0x178] sm:$0x1] %v731_v18  ;;  %v9805_v50 = vshll.u32 %v7673_v53, 16  ;;  %v2148_v29 = vsel %vm6714_vm13, %v2146_v55, %v8000_v1 }
 0x1d7   : > { %v2157_v46 = vrot.slane %v9803_v2, 4  ;;  %v2158_v15 = vrot.slane %v9804_v37, 5  ;;  %v9806_v62 = vshrl.u32 %v7673_v53, 16  ;;  %v2155_v63 = vrot.slane %v2153_v30, 5  ;;  %v8073_v54 = vld [vmem:[#allocation2 + $0x18c] sm:$0xf] }
 0x1d8   : > { %v8064_v11 = vrot.slane %v9805_v50, 5  ;;  %v1328_v57 = vor.u32 %v6370_v34, %v8043_v16  ;;  %v8075_v6 = vor.u32 %v2538_v3, %v2537_v28  ;;  %v1326_v18 = vsel %vm6714_vm13, %v1324_v35, %v8043_v16  ;;  %v8091_v35 = vpop.permute.xlu1 %3246  ;;  %v8095_v55 = vpop.permute.xlu0 %3406  ;;  %v9811_v48 = vld [vmem:[#allocation10_spill] sm:$0xff] }
 0x1d9   : > { %v2163_v40 = vrot.slane %v9806_v62, 4  ;;  %v2159_v2 = vor.u32 %v2158_v15, %v2157_v46  ;;  %v2548_v37 = vshrl.u32 %v8055_v27, 16  ;;  %v2156_v1 = vsel %vm6714_vm13, %v2151_v56, %v2155_v63  ;;  %v628_v46 = vld [vmem:[#allocation2 + $0x4] sm:$0x8]  ;;  %v1303_v15 = vld [vmem:[#allocation2 + $0x28] sm:$0x1] }
 0x1da   : > { %v5570_v3 = vcombine.low %v2148_v29, %v2156_v1  ;;  %v9469_v16 = vshrl.u32 %v8073_v54, 16  ;;  %v1329_v62 = vrot.slane %v1328_v57, 4  ;;  %v5603_v34 = vcombine.low %v8055_v27, %v8073_v54  ;;  %v733_v57 = vld [vmem:[#allocation2 + $0x190] sm:$0x1] }
 0x1db   : > { %v2164_v53 = vor.u32 %v2163_v40, %v8064_v11  ;;  %v2160_v30 = vrot.slane %v2159_v2, 4  ;;  %v8088_v28 = vrot.slane %v2548_v37, 7  ;;  %v1302_v50 = vld [vmem:[#allocation2 + $0x10] sm:$0x1]  ;;  %v2551_v40 = vshll.u32 %v8055_v27, 16  ;;  %v9810_v27 = vld [vmem:[#allocation9_spill] sm:$0xff] }
 0x1dc   : > { %3268 = vrot.lane.b32.xlu1 %v5570_v3, %s6205_s7  ;;  %v1331_v29 = vshll.u32 %v1302_v50, 16  ;;  %v8100_v2 = vrot.slane %v9469_v16, 7  ;;  %v8102_v1 = vrot.slane %v2548_v37, 4  ;;  %v629_v38 = vsel %vm6293_vm4, 0, %v628_v46  ;;  %v9808_v50 = vld [vmem:[#allocation14_spill] sm:$0xff]  ;;  %3430 = vrot.lane.b32.xlu0 %v5603_v34, %s6205_s7 }
 0x1dd   : > { %9807 = vst [vmem:[#allocation198_spill] sm:$0xff] %v8088_v28  ;;  %v2165_v56 = vrot.slane %v2164_v53, 4  ;;  %v1959_v53 = vld [vmem:[#allocation2 + $0x178] sm:$0x1]  ;;  %v2162_v63 = vsel %vm6714_vm13, %v2160_v30, %v8064_v11  ;;  %v963_v3 = vrot.slane %v6359_v10, 4  ;;  %v1337_v16 = vor.u32 %v9808_v50, %v6530_v9  ;;  %v9812_v11 = vld [vmem:[#allocation7_spill] sm:$0xff] }
 0x1de   : > { %v1333_v52 = vrot.slane %v1331_v29, 5  ;;  %v2167_v37 = vshll.u32 %v1959_v53, 16  ;;  %v8115_v32 = vor.u32 %v2551_v40, %v8088_v28  ;;  %630 = vst [vmem:[#allocation2 + $0x4] sm:$0x8] %v629_v38  ;;  %v1342_v42 = vor.u32 %v9811_v48, %v9810_v27  ;;  %v903_v29 = vld [vmem:[#allocation2 + $0x1c] sm:$0x8]  ;;  %v8129_v48 = vpop.permute.xlu1 %2970 }
 0x1df   : > { %v971_v30 = vsel %vm6455_vm10, %v963_v3, %v9812_v11  ;;  %v1338_v46 = vrot.slane %v1337_v16, 4  ;;  %v1345_v10 = vshll.u32 %v1303_v15, 16  ;;  %v734_v9 = vsel %vm6302_vm7, 0, %v733_v57  ;;  %v8136_v11 = vpop.permute.xlu0 %3098  ;;  %v9820_v28 = vld [vmem:[#allocation20_spill] sm:$0xff] }
 0x1e0   : > { %9809 = vst [vmem:[#allocation14_spill] sm:$0xff] %v8115_v32  ;;  %v1334_v53 = vsel %vm6714_vm13, %v1329_v62, %v1333_v52  ;;  %v2169_v50 = vrot.slane %v2167_v37, 5  ;;  %v1343_v4 = vrot.slane %v1342_v42, 4  ;;  %735 = vst [vmem:[#allocation2 + $0x190] sm:$0x1] %v734_v9  ;;  %v9813_v38 = vshrl.u32 %v7777_v58, 16 }
 0x1e1   : > { %v5509_v20 = vcombine.low %v1326_v18, %v1334_v53  ;;  %v1340_v16 = vsel %vm6714_vm13, %v1338_v46, %v9810_v27  ;;  %v1347_v15 = vrot.slane %v1345_v10, 5  ;;  %v9814_v57 = vshll.u32 %v7777_v58, 16  ;;  %v1304_v53 = vld [vmem:[#allocation2 + $0x40] sm:$0x1] }
 0x1e2   : > { %v2171_v34 = vrot.slane %v9813_v38, 4  ;;  %v2170_v42 = vsel %vm6714_vm13, %v2165_v56, %v2169_v50  ;;  %v9815_v52 = vshll.u32 %v7779_v59, 16  ;;  %v9816_v37 = vshrl.u32 %v7779_v59, 16  ;;  %v9817_v50 = vld [vmem:[#allocation8_spill] sm:$0xff] }
 0x1e3   : > { %v2172_v3 = vrot.slane %v9814_v57, 5  ;;  %v973_v18 = vshrl.u32 %v903_v29, 16  ;;  %v3549_v27 = vsel %vm3482_vm14, %v5509_v20, %v7639_v19  ;;  %v5571_v46 = vcombine.low %v2162_v63, %v2170_v42  ;;  %v9818_v29 = vld [vmem:[#allocation16_spill] sm:$0xff]  ;;  %v9821_v20 = vld [vmem:[#allocation18_spill] sm:$0xff] }
 0x1e4   : > { %v2175_v62 = vrot.slane %v9815_v52, 5  ;;  %v2177_v9 = vrot.slane %v9816_v37, 4  ;;  %v1348_v58 = vsel %vm6714_vm13, %v1343_v4, %v1347_v15  ;;  %4114 = vmatprep.mubr.bf16.mxu1 %v3549_v27  ;;  %v985_v25 = vrot.slane %v9817_v50, 4  ;;  %v9819_v37 = vld [vmem:[#allocation17_spill] sm:$0xff]  ;;  %v8168_v50 = vpop.permute.xlu0 %3408 }
 0x1e5   : > { %v2173_v10 = vor.u32 %v2172_v3, %v2171_v34  ;;  %v5510_v38 = vcombine.low %v1340_v16, %v1348_v58  ;;  %v5430_v56 = vrot.slane %v973_v18, 11  ;;  %3270 = vrot.lane.b32.xlu1 %v5571_v46, %s6205_s7  ;;  %v900_v59 = vld [vmem:[#allocation2 + $0x4] sm:$0x8]  ;;  %v1351_v32 = vor.u32 %v9819_v37, %v9818_v29  ;;  %v906_v3 = vld [vmem:[#allocation2 + $0x34] sm:$0x8]  ;;  %v9824_v27 = vld [vmem:[#allocation13_spill] sm:$0xff] }
 0x1e6   : > { %v2178_v57 = vor.u32 %v2177_v9, %v2175_v62  ;;  %v1356_v19 = vor.u32 %v9821_v20, %v9820_v28  ;;  %v1359_v63 = vshll.u32 %v1304_v53, 16  ;;  %v8154_v42 = vrot.slane %v2551_v40, 5  ;;  %v8160_v9 = vpop.permute.xlu1 %3248  ;;  %v9825_v58 = vld [vmem:[#allocation12_spill] sm:$0xff] }
 0x1e7   : > { %v2174_v52 = vrot.slane %v2173_v10, 4  ;;  %v9822_v4 = vshll.u32 %v8073_v54, 16  ;;  %v951_v16 = vshrl.u32 %v900_v59, 16  ;;  %v1960_v18 = vld [vmem:[#allocation2 + $0x190] sm:$0x1]  ;;  %v984_v46 = vsel %vm6455_vm10, %v5430_v56, %v9824_v27  ;;  %v9829_v27 = vld [vmem:[#allocation11_spill] sm:$0xff] }
 0x1e8   : > { %v2179_v15 = vrot.slane %v2178_v57, 4  ;;  %v993_v53 = vsel %vm6455_vm10, %v985_v25, %v9825_v58  ;;  %v1352_v40 = vrot.slane %v1351_v32, 4  ;;  %v1357_v10 = vrot.slane %v1356_v19, 4  ;;  %v9828_v19 = vld [vmem:[#allocation6_spill] sm:$0xff] }
 0x1e9   : > { %v8158_v34 = vrot.slane %v9822_v4, 5  ;;  %v5429_v29 = vrot.slane %v951_v16, 11  ;;  %v2181_v37 = vshll.u32 %v1960_v18, 16  ;;  %v5478_v59 = vcombine.low %v984_v46, %v993_v53 }
 0x1ea   : > { %v1361_v57 = vrot.slane %v1359_v63, 5  ;;  %v9826_v20 = vmov %v9822_v4  ;;  %v2176_v56 = vsel %vm6714_vm13, %v2174_v52, %v2175_v62  ;;  %v1354_v25 = vsel %vm6714_vm13, %v1352_v40, %v9820_v28 }
 0x1eb   : > { %9823 = vst [vmem:[#allocation9_spill] sm:$0xff] %v8158_v34  ;;  %v8173_v4 = vor.u32 %v9826_v20, %v8100_v2  ;;  %v995_v32 = vshrl.u32 %v906_v3, 16  ;;  %v962_v16 = vsel %vm6455_vm10, %v5429_v29, %v9828_v19  ;;  %v2183_v18 = vrot.slane %v2181_v37, 5  ;;  %v1305_v20 = vld [vmem:[#allocation2 + $0x58] sm:$0x1]  ;;  %v9832_v3 = vld [vmem:[#allocation19_spill] sm:$0xff] }
 0x1ec   : > { %v1362_v63 = vsel %vm6714_vm13, %v1357_v10, %v1361_v57  ;;  %v1007_v46 = vrot.slane %v9829_v27, 4  ;;  %v9830_v2 = vshrl.u32 %v8073_v54, 16  ;;  %v5477_v62 = vcombine.low %v962_v16, %v971_v30  ;;  %v9833_v29 = vld [vmem:[#allocation22_spill] sm:$0xff]  ;;  %v9834_v37 = vld [vmem:[#allocation23_spill] sm:$0xff]  ;;  %v9835_v57 = vld [vmem:[#allocation25_spill] sm:$0xff] }
 0x1ed   : > { %9827 = vst [vmem:[#allocation10_spill] sm:$0xff] %v8173_v4  ;;  %v5511_v52 = vcombine.low %v1354_v25, %v1362_v63  ;;  %v5431_v53 = vrot.slane %v995_v32, 11  ;;  %v2184_v28 = vsel %vm6714_vm13, %v2179_v15, %v2183_v18  ;;  %v1365_v10 = vor.u32 %v9834_v37, %v9833_v29  ;;  %v9836_v19 = vld [vmem:[#allocation27_spill] sm:$0xff]  ;;  %v2186_v54 = vld [vmem:[#allocation2 + $0x34] sm:$0x8]  ;;  %v8204_v25 = vpop.permute.xlu1 %2972  ;;  %v9844_v4 = vld [vmem:[#allocation33_spill] sm:$0xff] }
 0x1ee   : > { %v8188_v58 = vrot.slane %v9830_v2, 4  ;;  %v1015_v40 = vsel %vm6455_vm10, %v1007_v46, %v9832_v3  ;;  %v1370_v27 = vor.u32 %v9836_v19, %v9835_v57  ;;  %v8202_v30 = vld [vmem:[%s9330_s3 + $0x110] sm:$0xff]   ;;  %v3485_v15 = vsel %vm3482_vm14, %v5477_v62, %v7685_v13  ;;  %v9837_v18 = vld [vmem:[#allocation15_spill] sm:$0xff]  ;;  %v8213_v46 = vpop.permute.xlu0 %3100  ;;  %v2232_v19 = vld [vmem:[#allocation2 + $0x1a0] sm:$0xf] }
 0x1ef   : > { %v3553_v32 = vsel %vm3482_vm14, %v5510_v38, %v7631_v5  ;;  %v5572_v16 = vcombine.low %v2176_v56, %v2184_v28  ;;  %v1006_v63 = vsel %vm6455_vm10, %v5431_v53, %v9837_v18  ;;  %4115 = vmatmul.mubr.bf16.vlgmr.msra.gmra.mxu1 %v3485_v15  ;;  %v1366_v3 = vrot.slane %v1365_v10, 4  ;;  %v8220_v5 = vld [vmem:[%s9330_s3 + $0x118] sm:$0xff]   ;;  %v8224_v56 = vld [vmem:[#allocation2 + $0x1a4] sm:$0xf]  ;;  %v6164_v53 = vld [vmem:[#allocation2 + $0x20] sm:$0xf] }
 0x1f0   : > { %9831 = vst [vmem:[#allocation7_spill] sm:$0xff] %v8188_v58  ;;  %v5479_v2 = vcombine.low %v1006_v63, %v1015_v40  ;;  %v1371_v29 = vrot.slane %v1370_v27, 4  ;;  %v1373_v37 = vshll.u32 %v1305_v20, 16  ;;  %6055 = vmatpush3.bf16.msra.mxu1 %v8220_v5  ;;  %4122 = vmatprep.mubr.bf16.mxu1 %v3553_v32  ;;  %v2235_v13 = vshrl.u32 %v2186_v54, 16  ;;  %9838 = vst [vmem:[#allocation8_spill] sm:$0xff] %v8224_v56  ;;  %v9843_v54 = vld [vmem:[#allocation32_spill] sm:$0xff] }
 0x1f1   : > { %v2247_v38 = vrot.slane %v6722_v21, 4  ;;  %v2570_v62 = vshrl.u32 %v2232_v19, 16  ;;  %3272 = vrot.lane.b32.xlu1 %v5572_v16, %s6205_s7  ;;  %v6165_v20 = vld [vmem:[#allocation2 + $0x24] sm:$0xf]  ;;  %v1368_v40 = vsel %vm6714_vm13, %v1366_v3, %v9835_v57  ;;  %v9478_v27 = vshrl.u32 %v8224_v56, 16  ;;  %6052 = vmatprep.subr.bf16.mxu1 %v8202_v30  ;;  %v8235_v21 = vld [vmem:[%s9330_s3 + $0x108] sm:$0xff]  }
 0x1f2   : > { %v5541_v28 = vcombine.low %v6164_v53, %v6165_v20  ;;  %v1375_v10 = vrot.slane %v1373_v37, 5  ;;  %v3489_v15 = vsel %vm3482_vm14, %v5478_v59, %v7678_v36  ;;  %v5461_v32 = vrot.slane %v2235_v13, 11  ;;  %v909_v37 = vld [vmem:[#allocation2 + $0x4c] sm:$0x8]  ;;  %v8250_v53 = vpop.permute.xlu1 %3250  ;;  %v9839_v13 = vld [vmem:[#allocation46_spill] sm:$0xff] }
 0x1f3   : > { %v2255_v57 = vsel %vm6455_vm10, %v2247_v38, %v6774_v26  ;;  %v8248_v63 = vrot.slane %v2570_v62, 7  ;;  %v2573_v3 = vshll.u32 %v2232_v19, 16  ;;  %v3557_v36 = vsel %vm3482_vm14, %v5511_v52, %v7732_v17  ;;  %v1306_v38 = vld [vmem:[#allocation2 + $0x70] sm:$0x1]  ;;  %v912_v58 = vld [vmem:[#allocation2 + $0x64] sm:$0x8] }
 0x1f4   : > { %v3613_v16 = vsel %vm3482_vm14, %v5541_v28, %v7906_v49  ;;  %v1376_v18 = vsel %vm6714_vm13, %v1371_v29, %v1375_v10  ;;  %v8256_v59 = vsel %vm3482_vm14, %v5479_v2, %v7723_v44  ;;  %v2246_v49 = vsel %vm6455_vm10, %v5461_v32, %v9839_v13  ;;  %6056 = vmatpush3.bf16.msra.mxu1 %v8202_v30  ;;  %v8262_v29 = vpop.permute.xlu0 %3410  ;;  %v2189_v44 = vld [vmem:[#allocation2 + $0x4c] sm:$0x8]  ;;  %v9840_v32 = vld [vmem:[#allocation21_spill] sm:$0xff] }
 0x1f5   : > { %v5512_v26 = vcombine.low %v1368_v40, %v1376_v18  ;;  %v5573_v20 = vcombine.low %v2246_v49, %v2255_v57  ;;  %v8266_v28 = vrot.slane %v9478_v27, 7  ;;  %v8269_v52 = vrot.slane %v2570_v62, 4  ;;  %6053 = vmatprep.subr.bf16.mxu1 %v8235_v21  ;;  %v9841_v49 = vld [vmem:[#allocation30_spill] sm:$0xff]  ;;  %v9842_v62 = vld [vmem:[#allocation31_spill] sm:$0xff] }
 0x1f6   : > { %v8272_v2 = vrot.slane %v2573_v3, 5  ;;  %v5604_v40 = vcombine.low %v2232_v19, %v8224_v56  ;;  %v1017_v10 = vshrl.u32 %v909_v37, 16  ;;  %v1029_v18 = vrot.slane %v9840_v32, 4  ;;  %v9845_v37 = vld [vmem:[#allocation26_spill] sm:$0xff] }
 0x1f7   : > { %4123 = vmatmul.mubr.bf16.gmra.mxu1 %v3489_v15  ;;  %v3677_v57 = vsel %vm3482_vm14, %v5573_v20, %v7918_v33  ;;  %v8279_v13 = vor.u32 %v2573_v3, %v8248_v63  ;;  %v1379_v27 = vor.u32 %v9842_v62, %v9841_v49  ;;  %v1384_v17 = vor.u32 %v9844_v4, %v9843_v54  ;;  %v8291_v33 = vld [vmem:[%s9330_s3 + $0x100] sm:$0xff]  }
 0x1f8   : > { %4130 = vmatprep.mubr.bf16.mxu1 %v3557_v36  ;;  %4275 = vmatprep.mubr.bf16.mxu0 %v3677_v57  ;;  %v5432_v19 = vrot.slane %v1017_v10, 11  ;;  %v1037_v15 = vsel %vm6455_vm10, %v1029_v18, %v9845_v37  ;;  %v1387_v32 = vshll.u32 %v1306_v38, 16  ;;  %v2257_v34 = vshrl.u32 %v2189_v44, 16  ;;  %v8299_v57 = vpop.permute.xlu1 %2974  ;;  %v9848_v38 = vld [vmem:[#allocation24_spill] sm:$0xff] }
 0x1f9   : > { %4276 = vmatmul.mubr.bf16.vlgmr.msra.gmra.mxu0 %v3613_v16  ;;  %v9846_v3 = vshll.u32 %v8224_v56, 16  ;;  %3432 = vrot.lane.b32.xlu0 %v5604_v40, %s6205_s7  ;;  %v1380_v4 = vrot.slane %v1379_v27, 4  ;;  %v1385_v36 = vrot.slane %v1384_v17, 4  ;;  %v2269_v10 = vrot.slane %v6822_v8, 4  ;;  %v8305_v16 = vpop.permute.xlu0 %3102 }
 0x1fa   : > { %v1028_v44 = vsel %vm6455_vm10, %v5432_v19, %v9848_v38  ;;  %v1389_v18 = vrot.slane %v1387_v32, 5  ;;  %v5462_v49 = vrot.slane %v2257_v34, 11  ;;  %v1039_v62 = vshrl.u32 %v912_v58, 16  ;;  %6012 = vmatpush3.bf16.msra.mxu0 %v8220_v5  ;;  %6057 = vmatpush3.bf16.msra.mxu1 %v8235_v21  ;;  %v1307_v34 = vld [vmem:[#allocation2 + $0x88] sm:$0x1]  ;;  %v9849_v5 = vld [vmem:[#allocation54_spill] sm:$0xff] }
 0x1fb   : > { %v8295_v20 = vrot.slane %v9846_v3, 5  ;;  %v3561_v27 = vsel %vm3482_vm14, %v5512_v26, %v7781_v41  ;;  %v5480_v17 = vcombine.low %v1028_v44, %v1037_v15  ;;  %v1382_v8 = vsel %vm6714_vm13, %v1380_v4, %v9843_v54  ;;  %6013 = vmatprep.subr.bf16.mxu0 %v8202_v30  ;;  %v9850_v26 = vld [vmem:[#allocation28_spill] sm:$0xff]  ;;  %6054 = vmatprep.subr.bf16.mxu1 %v8291_v33  ;;  %v6166_v32 = vld [vmem:[#allocation2 + $0x38] sm:$0xf]  ;;  %v2192_v44 = vld [vmem:[#allocation2 + $0x64] sm:$0x8] }
 0x1fc   : > { %v2277_v40 = vsel %vm6455_vm10, %v2269_v10, %v6881_v22  ;;  %v1390_v58 = vsel %vm6714_vm13, %v1385_v36, %v1389_v18  ;;  %v2268_v19 = vsel %vm6455_vm10, %v5462_v49, %v9849_v5  ;;  %v5433_v41 = vrot.slane %v1039_v62, 11  ;;  %v6167_v22 = vld [vmem:[#allocation2 + $0x3c] sm:$0xf]  ;;  %v9851_v4 = vld [vmem:[#allocation36_spill] sm:$0xff]  ;;  %v9854_v49 = vld [vmem:[#allocation34_spill] sm:$0xff] }
 0x1fd   : > { %9847 = vst [vmem:[#allocation16_spill] sm:$0xff] %v8295_v20  ;;  %v1051_v37 = vrot.slane %v9850_v26, 4  ;;  %v8324_v54 = vcombine.low %v1382_v8, %v1390_v58  ;;  %v5574_v15 = vcombine.low %v2268_v19, %v2277_v40  ;;  %v5542_v3 = vcombine.low %v6166_v32, %v6167_v22  ;;  %v9852_v10 = vld [vmem:[#allocation37_spill] sm:$0xff]  ;;  %v9855_v5 = vld [vmem:[#allocation44_spill] sm:$0xff] }
 0x1fe   : > { %v1393_v38 = vor.u32 %v9852_v10, %v9851_v4  ;;  %v9853_v36 = vld [vmem:[#allocation29_spill] sm:$0xff]  ;;  %v1401_v58 = vshll.u32 %v1307_v34, 16  ;;  %6014 = vmatpush3.bf16.msra.mxu0 %v8202_v30  ;;  %6058 = vmatpush3.bf16.msra.mxu1 %v8291_v33  ;;  %v2279_v4 = vshrl.u32 %v2192_v44, 16  ;;  %v9857_v10 = vld [vmem:[#allocation59_spill] sm:$0xff] }
 0x1ff   : > { %v1050_v18 = vsel %vm6455_vm10, %v5433_v41, %v9853_v36  ;;  %v1059_v62 = vsel %vm6455_vm10, %v1051_v37, %v9854_v49  ;;  %v9856_v26 = vld [vmem:[#allocation45_spill] sm:$0xff]  ;;  %4131 = vmatmul.mubr.bf16.gmra.mxu1 %v8256_v59  ;;  %v3681_v19 = vsel %vm3482_vm14, %v5574_v15, %v8012_v51  ;;  %v3617_v41 = vsel %vm3482_vm14, %v5542_v3, %v8004_v0  ;;  %v8343_v37 = vpop.permute.xlu1 %3252  ;;  %v8347_v59 = vpop.permute.xlu0 %3412  ;;  %v918_v0 = vld [vmem:[#allocation2 + $0x94] sm:$0x8] }
 0x200   : > { %v1398_v8 = vor.u32 %v9856_v26, %v9855_v5  ;;  %v915_v40 = vld [vmem:[#allocation2 + $0x7c] sm:$0x8]  ;;  %v5481_v32 = vcombine.low %v1050_v18, %v1059_v62  ;;  %v1394_v22 = vrot.slane %v1393_v38, 4  ;;  %6015 = vmatprep.subr.bf16.mxu0 %v8235_v21  ;;  %4138 = vmatprep.mubr.bf16.mxu1 %v3561_v27  ;;  %v1403_v30 = vrot.slane %v1401_v58, 5  ;;  %v1308_v38 = vld [vmem:[#allocation2 + $0xa0] sm:$0x1] }
 0x201   : > { %4283 = vmatprep.mubr.bf16.mxu0 %v3681_v19  ;;  %v2291_v36 = vrot.slane %v9857_v10, 4  ;;  %v9858_v51 = vshll.u32 %v8224_v56, 16  ;;  %v1061_v3 = vshrl.u32 %v915_v40, 16  ;;  %v5463_v18 = vrot.slane %v2279_v4, 11  ;;  %v9859_v49 = vld [vmem:[#allocation69_spill] sm:$0xff]  ;;  %v9865_v4 = vld [vmem:[#allocation43_spill] sm:$0xff] }
 0x202   : > { %v1399_v34 = vrot.slane %v1398_v8, 4  ;;  %4284 = vmatmul.mubr.bf16.gmra.mxu0 %v3617_v41  ;;  %v1396_v27 = vsel %vm6714_vm13, %v1394_v22, %v9855_v5  ;;  %v9861_v8 = vld [vmem:[#allocation164_spill] sm:$0xff]  ;;  %v9863_v40 = vld [vmem:[#allocation49_spill] sm:$0xff] }
 0x203   : > { %v8352_v15 = vor.u32 %v9858_v51, %v8266_v28  ;;  %v2299_v62 = vsel %vm6455_vm10, %v2291_v36, %v9859_v49  ;;  %v9860_v28 = vld [vmem:[#allocation35_spill] sm:$0xff]  ;;  %6016 = vmatpush3.bf16.msra.mxu0 %v8235_v21  ;;  %v3497_v58 = vsel %vm3482_vm14, %v5480_v17, %v9861_v8  ;;  %v5434_v41 = vrot.slane %v1061_v3, 11  ;;  %v9862_v5 = vld [vmem:[#allocation48_spill] sm:$0xff]  ;;  %v2195_v10 = vld [vmem:[#allocation2 + $0x7c] sm:$0x8]  ;;  %v8382_v20 = vpop.permute.xlu1 %2976 }
 0x204   : > { %v1404_v44 = vsel %vm6714_vm13, %v1399_v34, %v1403_v30  ;;  %v1073_v26 = vrot.slane %v9860_v28, 4  ;;  %v1407_v22 = vor.u32 %v9863_v40, %v9862_v5  ;;  %6017 = vmatprep.subr.bf16.mxu0 %v8291_v33  ;;  %v9864_v34 = vld [vmem:[#allocation68_spill] sm:$0xff]  ;;  %v9866_v21 = vld [vmem:[#allocation50_spill] sm:$0xff]  ;;  %v1415_v17 = vshll.u32 %v1308_v38, 16  ;;  %v9869_v38 = vld [vmem:[#allocation169_spill] sm:$0xff] }
 0x205   : > { %v5514_v19 = vcombine.low %v1396_v27, %v1404_v44  ;;  %v2290_v30 = vsel %vm6455_vm10, %v5463_v18, %v9864_v34  ;;  %v9867_v51 = vld [vmem:[#allocation52_spill] sm:$0xff]  ;;  %v9868_v8 = vld [vmem:[#allocation42_spill] sm:$0xff] }
 0x206   : > { %v1081_v36 = vsel %vm6455_vm10, %v1073_v26, %v9865_v4  ;;  %v1412_v49 = vor.u32 %v9867_v51, %v9866_v21  ;;  %v5575_v27 = vcombine.low %v2290_v30, %v2299_v62  ;;  %v6168_v3 = vld [vmem:[#allocation2 + $0x50] sm:$0xf]  ;;  %v6169_v44 = vld [vmem:[#allocation2 + $0x54] sm:$0xf]  ;;  %v1072_v5 = vsel %vm6455_vm10, %v5434_v41, %v9868_v8  ;;  %v8384_v4 = vpop.permute.xlu0 %3104  ;;  %v9870_v30 = vld [vmem:[#allocation73_spill] sm:$0xff] }
 0x207   : > { %v5543_v28 = vcombine.low %v6168_v3, %v6169_v44  ;;  %v1408_v40 = vrot.slane %v1407_v22, 4  ;;  %v5482_v18 = vcombine.low %v1072_v5, %v1081_v36  ;;  %v1417_v56 = vrot.slane %v1415_v17, 5  ;;  %6018 = vmatpush3.bf16.msra.mxu0 %v8291_v33  ;;  %4139 = vmatmul.mubr.bf16.gmra.mxu1 %v3497_v58  ;;  %v9873_v3 = vld [vmem:[#allocation47_spill] sm:$0xff]  ;;  %v2198_v8 = vld [vmem:[#allocation2 + $0x94] sm:$0x8]  ;;  %v9874_v5 = vld [vmem:[#allocation78_spill] sm:$0xff] }
 0x208   : > { %v1413_v34 = vrot.slane %v1412_v49, 4  ;;  %v2301_v26 = vshrl.u32 %v2195_v10, 16  ;;  %v3565_v62 = vsel %vm3482_vm14, %v8324_v54, %v9869_v38  ;;  %v3685_v41 = vsel %vm3482_vm14, %v5575_v27, %v8095_v55  ;;  %v1309_v54 = vld [vmem:[#allocation2 + $0xb8] sm:$0x1]  ;;  %v9871_v49 = vld [vmem:[#allocation168_spill] sm:$0xff]  ;;  %v9872_v27 = vld [vmem:[#allocation79_spill] sm:$0xff] }
 0x209   : > { %v1410_v22 = vsel %vm6714_vm13, %v1408_v40, %v9866_v21  ;;  %v2313_v36 = vrot.slane %v9870_v30, 4  ;;  %4146 = vmatprep.mubr.bf16.mxu1 %v3565_v62  ;;  %4291 = vmatprep.mubr.bf16.mxu0 %v3685_v41  ;;  %v3621_v10 = vsel %vm3482_vm14, %v5543_v28, %v8091_v35  ;;  %v1083_v51 = vshrl.u32 %v918_v0, 16  ;;  %v9875_v28 = vld [vmem:[#allocation57_spill] sm:$0xff]  ;;  %v9876_v0 = vld [vmem:[#allocation63_spill] sm:$0xff] }
 0x20a   : > { %v1418_v33 = vsel %vm6714_vm13, %v1413_v34, %v1417_v56  ;;  %v5464_v58 = vrot.slane %v2301_v26, 11  ;;  %v3501_v55 = vsel %vm3482_vm14, %v5481_v32, %v9871_v49  ;;  %4292 = vmatmul.mubr.bf16.gmra.mxu0 %v3621_v10  ;;  %v1095_v44 = vrot.slane %v9873_v3, 4  ;;  %v9877_v34 = vld [vmem:[#allocation66_spill] sm:$0xff]  ;;  %v9878_v26 = vld [vmem:[#allocation67_spill] sm:$0xff] }
 0x20b   : > { %v5515_v17 = vcombine.low %v1410_v22, %v1418_v33  ;;  %v2321_v21 = vsel %vm6455_vm10, %v2313_v36, %v9872_v27  ;;  %v5435_v56 = vrot.slane %v1083_v51, 11  ;;  %v1421_v40 = vor.u32 %v9876_v0, %v9875_v28  ;;  %v9879_v38 = vld [vmem:[#allocation179_spill] sm:$0xff]  ;;  %v9880_v22 = vld [vmem:[#allocation53_spill] sm:$0xff]  ;;  %v8418_v33 = vpop.permute.xlu1 %3254  ;;  %v9882_v28 = vld [vmem:[#allocation84_spill] sm:$0xff] }
 0x20c   : > { %v2312_v35 = vsel %vm6455_vm10, %v5464_v58, %v9874_v5  ;;  %v1426_v32 = vor.u32 %v9878_v26, %v9877_v34  ;;  %v3569_v62 = vsel %vm3482_vm14, %v5514_v19, %v9879_v38  ;;  %v1103_v30 = vsel %vm6455_vm10, %v1095_v44, %v9880_v22  ;;  %v921_v10 = vld [vmem:[#allocation2 + $0xac] sm:$0x8]  ;;  %v8423_v5 = vpop.permute.xlu0 %3414 }
 0x20d   : > { %v5576_v41 = vcombine.low %v2312_v35, %v2321_v21  ;;  %v1429_v36 = vshll.u32 %v1309_v54, 16  ;;  %v9881_v58 = vld [vmem:[#allocation51_spill] sm:$0xff]  ;;  %v1422_v49 = vrot.slane %v1421_v40, 4  ;;  %v2323_v3 = vshrl.u32 %v2198_v8, 16  ;;  %v9883_v8 = vld [vmem:[#allocation178_spill] sm:$0xff] }
 0x20e   : > { %v1094_v51 = vsel %vm6455_vm10, %v5435_v56, %v9881_v58  ;;  %v1427_v27 = vrot.slane %v1426_v32, 4  ;;  %v2335_v44 = vrot.slane %v9882_v28, 4  ;;  %v6170_v54 = vld [vmem:[#allocation2 + $0x68] sm:$0xf]  ;;  %v6171_v0 = vld [vmem:[#allocation2 + $0x6c] sm:$0xf]  ;;  %v3505_v38 = vsel %vm3482_vm14, %v5482_v18, %v9883_v8 }
 0x20f   : > { %v3689_v19 = vsel %vm3482_vm14, %v5576_v41, %v8168_v50  ;;  %v5483_v21 = vcombine.low %v1094_v51, %v1103_v30  ;;  %v1431_v35 = vrot.slane %v1429_v36, 5  ;;  %v5544_v26 = vcombine.low %v6170_v54, %v6171_v0  ;;  %4147 = vmatmul.mubr.bf16.gmra.mxu1 %v3501_v55  ;;  %v9884_v41 = vld [vmem:[#allocation94_spill] sm:$0xff]  ;;  %v9885_v30 = vld [vmem:[#allocation55_spill] sm:$0xff]  ;;  %v1310_v58 = vld [vmem:[#allocation2 + $0xd0] sm:$0x1]  ;;  %v8451_v8 = vpop.permute.xlu1 %2978 }
 0x210   : > { %4299 = vmatprep.mubr.bf16.mxu0 %v3689_v19  ;;  %v1424_v56 = vsel %vm6714_vm13, %v1422_v49, %v9877_v34  ;;  %v5465_v40 = vrot.slane %v2323_v3, 11  ;;  %v1105_v32 = vshrl.u32 %v921_v10, 16  ;;  %v2343_v22 = vsel %vm6455_vm10, %v2335_v44, %v9884_v41  ;;  %v2201_v51 = vld [vmem:[#allocation2 + $0xac] sm:$0x8]  ;;  %4154 = vmatprep.mubr.bf16.mxu1 %v3569_v62  ;;  %v9886_v55 = vld [vmem:[#allocation93_spill] sm:$0xff]  ;;  %v9889_v28 = vld [vmem:[#allocation72_spill] sm:$0xff]  ;;  %v8458_v41 = vpop.permute.xlu0 %3106 }
 0x211   : > { %v1432_v50 = vsel %vm6714_vm13, %v1427_v27, %v1431_v35  ;;  %v1117_v36 = vrot.slane %v9885_v30, 4  ;;  %v3625_v34 = vsel %vm3482_vm14, %v5544_v26, %v8160_v9  ;;  %v9887_v3 = vld [vmem:[#allocation65_spill] sm:$0xff]  ;;  %v9888_v35 = vld [vmem:[#allocation71_spill] sm:$0xff]  ;;  %v9890_v54 = vld [vmem:[#allocation74_spill] sm:$0xff]  ;;  %v3573_v9 = vsel %vm3482_vm14, %v5515_v17, %v7971_v7 }
 0x212   : > { %v5516_v10 = vcombine.low %v1424_v56, %v1432_v50  ;;  %v2334_v18 = vsel %vm6455_vm10, %v5465_v40, %v9886_v55  ;;  %v5436_v49 = vrot.slane %v1105_v32, 11  ;;  %4300 = vmatmul.mubr.bf16.gmra.mxu0 %v3625_v34  ;;  %v1435_v44 = vor.u32 %v9889_v28, %v9888_v35  ;;  %v9891_v62 = vld [vmem:[#allocation75_spill] sm:$0xff]  ;;  %v9892_v26 = vld [vmem:[#allocation62_spill] sm:$0xff] }
 0x213   : > { %v5577_v27 = vcombine.low %v2334_v18, %v2343_v22  ;;  %v1125_v19 = vsel %vm6455_vm10, %v1117_v36, %v9887_v3  ;;  %v1440_v0 = vor.u32 %v9891_v62, %v9890_v54  ;;  %v1443_v40 = vshll.u32 %v1310_v58, 16  ;;  %v924_v50 = vld [vmem:[#allocation2 + $0xc4] sm:$0x8]  ;;  %v6172_v55 = vld [vmem:[#allocation2 + $0x80] sm:$0xf] }
 0x214   : > { %v1116_v56 = vsel %vm6455_vm10, %v5436_v49, %v9892_v26  ;;  %v2345_v32 = vshrl.u32 %v2201_v51, 16  ;;  %v1436_v36 = vrot.slane %v1435_v44, 4  ;;  %v6173_v18 = vld [vmem:[#allocation2 + $0x84] sm:$0xf]  ;;  %v3509_v58 = vsel %vm3482_vm14, %v5483_v21, %v7961_v24  ;;  %v9895_v26 = vld [vmem:[#allocation107_spill] sm:$0xff]  ;;  %v9896_v24 = vld [vmem:[#allocation108_spill] sm:$0xff] }
 0x215   : > { %v3693_v22 = vsel %vm3482_vm14, %v5577_v27, %v8262_v29  ;;  %v5484_v30 = vcombine.low %v1116_v56, %v1125_v19  ;;  %v1441_v34 = vrot.slane %v1440_v0, 4  ;;  %v5545_v3 = vcombine.low %v6172_v55, %v6173_v18  ;;  %v9893_v35 = vld [vmem:[#allocation98_spill] sm:$0xff]  ;;  %v1311_v19 = vld [vmem:[#allocation2 + $0xe8] sm:$0x1]  ;;  %v9900_v18 = vld [vmem:[#allocation89_spill] sm:$0xff] }
 0x216   : > { %4307 = vmatprep.mubr.bf16.mxu0 %v3693_v22  ;;  %v1445_v7 = vrot.slane %v1443_v40, 5  ;;  %v5466_v17 = vrot.slane %v2345_v32, 11  ;;  %v2357_v28 = vrot.slane %v9893_v35, 4  ;;  %v1438_v51 = vsel %vm6714_vm13, %v1436_v36, %v9890_v54  ;;  %v9894_v29 = vld [vmem:[#allocation70_spill] sm:$0xff]  ;;  %v9898_v36 = vld [vmem:[#allocation81_spill] sm:$0xff] }
 0x217   : > { %v1127_v49 = vshrl.u32 %v924_v50, 16  ;;  %v1139_v27 = vrot.slane %v9894_v29, 4  ;;  %v2204_v44 = vld [vmem:[#allocation2 + $0xc4] sm:$0x8]  ;;  %v3629_v62 = vsel %vm3482_vm14, %v5545_v3, %v8250_v53  ;;  %4155 = vmatmul.mubr.bf16.gmra.mxu1 %v3505_v38  ;;  %v9897_v50 = vld [vmem:[#allocation77_spill] sm:$0xff]  ;;  %v8482_v53 = vpop.permute.xlu1 %3256  ;;  %v9901_v3 = vld [vmem:[#allocation91_spill] sm:$0xff]  ;;  %v8488_v38 = vpop.permute.xlu0 %3416 }
 0x218   : > { %v1446_v0 = vsel %vm6714_vm13, %v1441_v34, %v1445_v7  ;;  %v2356_v56 = vsel %vm6455_vm10, %v5466_v17, %v9895_v26  ;;  %v2365_v21 = vsel %vm6455_vm10, %v2357_v28, %v9896_v24  ;;  %4162 = vmatprep.mubr.bf16.mxu1 %v3573_v9  ;;  %v9899_v34 = vld [vmem:[#allocation88_spill] sm:$0xff]  ;;  %v1454_v7 = vor.u32 %v9901_v3, %v9900_v18  ;;  %v927_v28 = vld [vmem:[#allocation2 + $0xdc] sm:$0x8]  ;;  %v6174_v24 = vld [vmem:[#allocation2 + $0x98] sm:$0xf] }
 0x219   : > { %v5517_v54 = vcombine.low %v1438_v51, %v1446_v0  ;;  %v5578_v40 = vcombine.low %v2356_v56, %v2365_v21  ;;  %v5437_v32 = vrot.slane %v1127_v49, 11  ;;  %v1147_v22 = vsel %vm6455_vm10, %v1139_v27, %v9897_v50  ;;  %v9902_v29 = vld [vmem:[#allocation76_spill] sm:$0xff]  ;;  %v6175_v21 = vld [vmem:[#allocation2 + $0x9c] sm:$0xf] }
 0x21a   : > { %v1449_v55 = vor.u32 %v9899_v34, %v9898_v36  ;;  %v1457_v17 = vshll.u32 %v1311_v19, 16  ;;  %v2367_v35 = vshrl.u32 %v2204_v44, 16  ;;  %v3577_v51 = vsel %vm3482_vm14, %v5516_v10, %v8057_v60  ;;  %4308 = vmatmul.mubr.bf16.gmra.mxu0 %v3629_v62  ;;  %v9903_v27 = vld [vmem:[#allocation112_spill] sm:$0xff]  ;;  %v9904_v60 = vld [vmem:[#allocation122_spill] sm:$0xff]  ;;  %v2207_v3 = vld [vmem:[#allocation2 + $0xdc] sm:$0x8] }
 0x21b   : > { %v3697_v49 = vsel %vm3482_vm14, %v5578_v40, %v8347_v59  ;;  %v1138_v9 = vsel %vm6455_vm10, %v5437_v32, %v9902_v29  ;;  %v2379_v0 = vrot.slane %v9903_v27, 4  ;;  %v1455_v44 = vrot.slane %v1454_v7, 4  ;;  %v9909_v27 = vld [vmem:[#allocation97_spill] sm:$0xff] }
 0x21c   : > { %4315 = vmatprep.mubr.bf16.mxu0 %v3697_v49  ;;  %v5485_v26 = vcombine.low %v1138_v9, %v1147_v22  ;;  %v1450_v19 = vrot.slane %v1449_v55, 4  ;;  %v1459_v56 = vrot.slane %v1457_v17, 5  ;;  %v5546_v50 = vcombine.low %v6174_v24, %v6175_v21  ;;  %v9905_v22 = vld [vmem:[#allocation80_spill] sm:$0xff]  ;;  %v1312_v55 = vld [vmem:[#allocation2 + $0x100] sm:$0x1] }
 0x21d   : > { %v5467_v36 = vrot.slane %v2367_v35, 11  ;;  %v2387_v10 = vsel %vm6455_vm10, %v2379_v0, %v9904_v60  ;;  %v1149_v59 = vshrl.u32 %v927_v28, 16  ;;  %v3513_v62 = vsel %vm3482_vm14, %v5484_v30, %v8045_v43  ;;  %v9906_v35 = vld [vmem:[#allocation121_spill] sm:$0xff]  ;;  %v8514_v30 = vpop.permute.xlu1 %2980  ;;  %v9908_v9 = vld [vmem:[#allocation96_spill] sm:$0xff]  ;;  %v9912_v21 = vld [vmem:[#allocation90_spill] sm:$0xff] }
 0x21e   : > { %v1452_v40 = vsel %vm6714_vm13, %v1450_v19, %v9900_v18  ;;  %v1460_v32 = vsel %vm6714_vm13, %v1455_v44, %v1459_v56  ;;  %v1161_v34 = vrot.slane %v9905_v22, 4  ;;  %v3633_v7 = vsel %vm3482_vm14, %v5546_v50, %v8343_v37  ;;  %v9907_v18 = vld [vmem:[#allocation92_spill] sm:$0xff]  ;;  %v9910_v19 = vld [vmem:[#allocation105_spill] sm:$0xff]  ;;  %v8523_v37 = vpop.permute.xlu0 %3108 }
 0x21f   : > { %v5518_v17 = vcombine.low %v1452_v40, %v1460_v32  ;;  %v2378_v28 = vsel %vm6455_vm10, %v5467_v36, %v9906_v35  ;;  %v5438_v43 = vrot.slane %v1149_v59, 11  ;;  %v1463_v0 = vor.u32 %v9909_v27, %v9908_v9  ;;  %v9911_v44 = vld [vmem:[#allocation104_spill] sm:$0xff]  ;;  %4163 = vmatmul.mubr.bf16.gmra.mxu1 %v3509_v58  ;;  %v9915_v27 = vld [vmem:[#allocation135_spill] sm:$0xff] }
 0x220   : > { %v5579_v49 = vcombine.low %v2378_v28, %v2387_v10  ;;  %v1169_v29 = vsel %vm6455_vm10, %v1161_v34, %v9907_v18  ;;  %v1468_v56 = vor.u32 %v9911_v44, %v9910_v19  ;;  %v3581_v24 = vsel %vm3482_vm14, %v5517_v54, %v8136_v11  ;;  %v930_v10 = vld [vmem:[#allocation2 + $0xf4] sm:$0x8]  ;;  %4170 = vmatprep.mubr.bf16.mxu1 %v3577_v51  ;;  %v6176_v34 = vld [vmem:[#allocation2 + $0xb0] sm:$0xf]  ;;  %v9913_v54 = vld [vmem:[#allocation130_spill] sm:$0xff] }
 0x221   : > { %v1160_v50 = vsel %vm6455_vm10, %v5438_v43, %v9912_v21  ;;  %v1471_v36 = vshll.u32 %v1312_v55, 16  ;;  %v2389_v60 = vshrl.u32 %v2207_v3, 16  ;;  %v1464_v32 = vrot.slane %v1463_v0, 4  ;;  %v6177_v58 = vld [vmem:[#allocation2 + $0xb4] sm:$0xf]  ;;  %v9914_v3 = vld [vmem:[#allocation95_spill] sm:$0xff] }
 0x222   : > { %v3701_v59 = vsel %vm3482_vm14, %v5579_v49, %v8423_v5  ;;  %v5486_v40 = vcombine.low %v1160_v50, %v1169_v29  ;;  %v1469_v22 = vrot.slane %v1468_v56, 4  ;;  %4316 = vmatmul.mubr.bf16.gmra.mxu0 %v3633_v7  ;;  %v5547_v35 = vcombine.low %v6176_v34, %v6177_v58  ;;  %v1313_v7 = vld [vmem:[#allocation2 + $0x118] sm:$0x1]  ;;  %v2210_v49 = vld [vmem:[#allocation2 + $0xf4] sm:$0x8]  ;;  %v9917_v50 = vld [vmem:[#allocation106_spill] sm:$0xff] }
 0x223   : > { %v1473_v28 = vrot.slane %v1471_v36, 5  ;;  %v5468_v11 = vrot.slane %v2389_v60, 11  ;;  %v2401_v18 = vrot.slane %v9913_v54, 4  ;;  %v8535_v55 = vsel %vm3482_vm14, %v5485_v26, %v8129_v48  ;;  %4323 = vmatprep.mubr.bf16.mxu0 %v3701_v59  ;;  %v9916_v26 = vld [vmem:[#allocation136_spill] sm:$0xff]  ;;  %v3419_v36 = vpop.permute.xlu0 %3418  ;;  %v9918_v60 = vld [vmem:[#allocation110_spill] sm:$0xff] }
 0x224   : > { %v1466_v5 = vsel %vm6714_vm13, %v1464_v32, %v9910_v19  ;;  %v1171_v51 = vshrl.u32 %v930_v10, 16  ;;  %v1183_v43 = vrot.slane %v9914_v3, 4  ;;  %v3637_v29 = vsel %vm3482_vm14, %v5547_v35, %v8418_v33  ;;  %v8551_v19 = vpop.permute.xlu1 %3258  ;;  %v9919_v10 = vld [vmem:[#allocation111_spill] sm:$0xff]  ;;  %v9920_v32 = vld [vmem:[#allocation116_spill] sm:$0xff] }
 0x225   : > { %v1474_v9 = vsel %vm6714_vm13, %v1469_v22, %v1473_v28  ;;  %v2400_v48 = vsel %vm6455_vm10, %v5468_v11, %v9915_v27  ;;  %v2409_v0 = vsel %vm6455_vm10, %v2401_v18, %v9916_v26  ;;  %v1477_v59 = vor.u32 %v9919_v10, %v9918_v60  ;;  %v9921_v22 = vld [vmem:[#allocation118_spill] sm:$0xff]  ;;  %v933_v28 = vld [vmem:[#allocation2 + $0x10c] sm:$0x8]  ;;  %v1314_v60 = vld [vmem:[#allocation2 + $0x130] sm:$0x1] }
 0x226   : > { %v5519_v44 = vcombine.low %v1466_v5, %v1474_v9  ;;  %v5580_v56 = vcombine.low %v2400_v48, %v2409_v0  ;;  %v5439_v21 = vrot.slane %v1171_v51, 11  ;;  %v1191_v33 = vsel %vm6455_vm10, %v1183_v43, %v9917_v50  ;;  %v9922_v18 = vld [vmem:[#allocation103_spill] sm:$0xff]  ;;  %v9923_v51 = vld [vmem:[#allocation140_spill] sm:$0xff]  ;;  %v9925_v50 = vld [vmem:[#allocation109_spill] sm:$0xff] }
 0x227   : > { %v1482_v34 = vor.u32 %v9921_v22, %v9920_v32  ;;  %v1485_v58 = vshll.u32 %v1313_v7, 16  ;;  %v2411_v35 = vshrl.u32 %v2210_v49, 16  ;;  %v3585_v11 = vsel %vm3482_vm14, %v5518_v17, %v8213_v46  ;;  %4171 = vmatmul.mubr.bf16.gmra.mxu1 %v3513_v62  ;;  %v6178_v7 = vld [vmem:[#allocation2 + $0xc8] sm:$0xf]  ;;  %v6179_v49 = vld [vmem:[#allocation2 + $0xcc] sm:$0xf]  ;;  %v8588_v22 = vpop.permute.xlu0 %3110 }
 0x228   : > { %v3705_v54 = vsel %vm3482_vm14, %v5580_v56, %v8488_v38  ;;  %v1182_v5 = vsel %vm6455_vm10, %v5439_v21, %v9922_v18  ;;  %v2423_v3 = vrot.slane %v9923_v51, 4  ;;  %v1478_v9 = vrot.slane %v1477_v59, 4  ;;  %4178 = vmatprep.mubr.bf16.mxu1 %v3581_v24  ;;  %v9924_v46 = vld [vmem:[#allocation150_spill] sm:$0xff]  ;;  %v8580_v21 = vpop.permute.xlu1 %2982  ;;  %v2213_v10 = vld [vmem:[#allocation2 + $0x10c] sm:$0x8]  ;;  %v9929_v18 = vld [vmem:[#allocation125_spill] sm:$0xff] }
 0x229   : > { %v5487_v43 = vcombine.low %v1182_v5, %v1191_v33  ;;  %v1483_v27 = vrot.slane %v1482_v34, 4  ;;  %v1487_v48 = vrot.slane %v1485_v58, 5  ;;  %v5548_v26 = vcombine.low %v6178_v7, %v6179_v49  ;;  %v9927_v58 = vld [vmem:[#allocation120_spill] sm:$0xff]  ;;  %v9931_v51 = vld [vmem:[#allocation127_spill] sm:$0xff]  ;;  %v936_v49 = vld [vmem:[#allocation2 + $0x124] sm:$0x8] }
 0x22a   : > { %v5469_v0 = vrot.slane %v2411_v35, 11  ;;  %v2431_v38 = vsel %vm6455_vm10, %v2423_v3, %v9924_v46  ;;  %v1193_v17 = vshrl.u32 %v933_v28, 16  ;;  %4324 = vmatmul.mubr.bf16.gmra.mxu0 %v3637_v29  ;;  %v8573_v56 = vsel %vm3482_vm14, %v5486_v40, %v8204_v25  ;;  %v9926_v25 = vld [vmem:[#allocation149_spill] sm:$0xff]  ;;  %v9928_v28 = vld [vmem:[#allocation124_spill] sm:$0xff] }
 0x22b   : > { %v1480_v62 = vsel %vm6714_vm13, %v1478_v9, %v9920_v32  ;;  %v1488_v24 = vsel %vm6714_vm13, %v1483_v27, %v1487_v48  ;;  %v1205_v33 = vrot.slane %v9925_v50, 4  ;;  %4331 = vmatprep.mubr.bf16.mxu0 %v3705_v54  ;;  %v3641_v29 = vsel %vm3482_vm14, %v5548_v26, %v8482_v53  ;;  %v9930_v54 = vld [vmem:[#allocation126_spill] sm:$0xff]  ;;  %v9932_v9 = vld [vmem:[#allocation119_spill] sm:$0xff] }
 0x22c   : > { %v5520_v59 = vcombine.low %v1480_v62, %v1488_v24  ;;  %v2422_v40 = vsel %vm6455_vm10, %v5469_v0, %v9926_v25  ;;  %v5440_v32 = vrot.slane %v1193_v17, 11  ;;  %v1491_v5 = vor.u32 %v9929_v18, %v9928_v28  ;;  %v6180_v26 = vld [vmem:[#allocation2 + $0xe0] sm:$0xf]  ;;  %v6181_v0 = vld [vmem:[#allocation2 + $0xe4] sm:$0xf]  ;;  %v9935_v18 = vld [vmem:[#allocation163_spill] sm:$0xff] }
 0x22d   : > { %v5581_v34 = vcombine.low %v2422_v40, %v2431_v38  ;;  %v1213_v35 = vsel %vm6455_vm10, %v1205_v33, %v9927_v58  ;;  %v1496_v3 = vor.u32 %v9931_v51, %v9930_v54  ;;  %v8599_v53 = vsel %vm3482_vm14, %v5519_v44, %v8305_v16  ;;  %v9933_v44 = vld [vmem:[#allocation153_spill] sm:$0xff]  ;;  %v2216_v28 = vld [vmem:[#allocation2 + $0x124] sm:$0x8] }
 0x22e   : > { %v1204_v27 = vsel %vm6455_vm10, %v5440_v32, %v9932_v9  ;;  %v1499_v48 = vshll.u32 %v1314_v60, 16  ;;  %v2433_v7 = vshrl.u32 %v2213_v10, 16  ;;  %v5549_v46 = vcombine.low %v6180_v26, %v6181_v0  ;;  %v3261_v10 = vpop.permute.xlu1 %3260  ;;  %v9934_v32 = vld [vmem:[#allocation123_spill] sm:$0xff]  ;;  %v9938_v9 = vld [vmem:[#allocation138_spill] sm:$0xff] }
 0x22f   : > { %v5488_v38 = vcombine.low %v1204_v27, %v1213_v35  ;;  %v1492_v17 = vrot.slane %v1491_v5, 4  ;;  %v1497_v62 = vrot.slane %v1496_v3, 4  ;;  %v8606_v24 = vsel %vm3482_vm14, %v5487_v43, %v8299_v57  ;;  %4179 = vmatmul.mubr.bf16.gmra.mxu1 %v8535_v55  ;;  %v1315_v35 = vld [vmem:[#allocation2 + $0x148] sm:$0x1]  ;;  %v3421_v55 = vpop.permute.xlu0 %3420 }
 0x230   : > { %v1501_v50 = vrot.slane %v1499_v48, 5  ;;  %v5470_v16 = vrot.slane %v2433_v7, 11  ;;  %v2445_v33 = vrot.slane %v9933_v44, 4  ;;  %v3709_v60 = vsel %vm3482_vm14, %v5581_v34, %v3419_v36  ;;  %4186 = vmatprep.mubr.bf16.mxu1 %v3585_v11  ;;  %v9936_v34 = vld [vmem:[#allocation165_spill] sm:$0xff]  ;;  %v9939_v27 = vld [vmem:[#allocation139_spill] sm:$0xff]  ;;  %v9942_v44 = vld [vmem:[#allocation132_spill] sm:$0xff] }
 0x231   : > { %v1494_v25 = vsel %vm6714_vm13, %v1492_v17, %v9930_v54  ;;  %v1215_v40 = vshrl.u32 %v936_v49, 16  ;;  %v1227_v58 = vrot.slane %v9934_v32, 4  ;;  %v3645_v57 = vsel %vm3482_vm14, %v5549_v46, %v8551_v19  ;;  %v9937_v11 = vld [vmem:[#allocation133_spill] sm:$0xff]  ;;  %v9940_v7 = vld [vmem:[#allocation143_spill] sm:$0xff]  ;;  %v9941_v49 = vld [vmem:[#allocation144_spill] sm:$0xff] }
 0x232   : > { %v1502_v43 = vsel %vm6714_vm13, %v1497_v62, %v1501_v50  ;;  %v2444_v36 = vsel %vm6455_vm10, %v5470_v16, %v9935_v18  ;;  %v2453_v5 = vsel %vm6455_vm10, %v2445_v33, %v9936_v34  ;;  %4332 = vmatmul.mubr.bf16.gmra.mxu0 %v3641_v29  ;;  %v1505_v48 = vor.u32 %v9939_v27, %v9938_v9  ;;  %v2219_v17 = vld [vmem:[#allocation2 + $0x13c] sm:$0x8]  ;;  %v6182_v62 = vld [vmem:[#allocation2 + $0xf8] sm:$0xf] }
 0x233   : > { %v5521_v54 = vcombine.low %v1494_v25, %v1502_v43  ;;  %v5582_v51 = vcombine.low %v2444_v36, %v2453_v5  ;;  %v5441_v3 = vrot.slane %v1215_v40, 11  ;;  %v1235_v19 = vsel %vm6455_vm10, %v1227_v58, %v9937_v11  ;;  %4339 = vmatprep.mubr.bf16.mxu0 %v3709_v60  ;;  %v6183_v50 = vld [vmem:[#allocation2 + $0xfc] sm:$0xf] }
 0x234   : > { %v1510_v26 = vor.u32 %v9941_v49, %v9940_v7  ;;  %v1513_v0 = vshll.u32 %v1315_v35, 16  ;;  %v2455_v46 = vshrl.u32 %v2216_v28, 16  ;;  %v8634_v29 = vsel %vm3482_vm14, %v5520_v59, %v8384_v4  ;;  %v939_v35 = vld [vmem:[#allocation2 + $0x13c] sm:$0x8]  ;;  %v8644_v4 = vpop.permute.xlu1 %2984 }
 0x235   : > { %v5550_v16 = vcombine.low %v6182_v62, %v6183_v50  ;;  %v1226_v33 = vsel %vm6455_vm10, %v5441_v3, %v9942_v44  ;;  %v2467_v60 = vrot.slane %v7897_v45, 4  ;;  %v1506_v40 = vrot.slane %v1505_v48, 4  ;;  %v8650_v45 = vpop.permute.xlu0 %3112  ;;  %v9943_v3 = vld [vmem:[#allocation185_spill] sm:$0xff]  ;;  %v2222_v62 = vld [vmem:[#allocation2 + $0x154] sm:$0x8] }
 0x236   : > { %v5489_v25 = vcombine.low %v1226_v33, %v1235_v19  ;;  %v1511_v32 = vrot.slane %v1510_v26, 4  ;;  %v1515_v58 = vrot.slane %v1513_v0, 5  ;;  %v8642_v28 = vsel %vm3482_vm14, %v5488_v38, %v8382_v20  ;;  %v9944_v19 = vld [vmem:[#allocation187_spill] sm:$0xff]  ;;  %v9945_v27 = vld [vmem:[#allocation137_spill] sm:$0xff] }
 0x237   : > { %v5471_v59 = vrot.slane %v2455_v46, 11  ;;  %v2475_v43 = vsel %vm6455_vm10, %v2467_v60, %v7957_v61  ;;  %v2477_v18 = vshrl.u32 %v2219_v17, 16  ;;  %v3713_v36 = vsel %vm3482_vm14, %v5582_v51, %v3421_v55  ;;  %4187 = vmatmul.mubr.bf16.gmra.mxu1 %v8573_v56  ;;  %v9947_v49 = vld [vmem:[#allocation157_spill] sm:$0xff]  ;;  %v9948_v46 = vld [vmem:[#allocation186_spill] sm:$0xff]  ;;  %v9949_v33 = vld [vmem:[#allocation147_spill] sm:$0xff] }
 0x238   : > { %v1508_v34 = vsel %vm6714_vm13, %v1506_v40, %v9940_v7  ;;  %v1516_v20 = vsel %vm6714_vm13, %v1511_v32, %v1515_v58  ;;  %v2489_v38 = vrot.slane %v7914_v23, 4  ;;  %v1237_v55 = vshrl.u32 %v939_v35, 16  ;;  %4194 = vmatprep.mubr.bf16.mxu1 %v8599_v53  ;;  %v1316_v7 = vld [vmem:[#allocation2 + $0x160] sm:$0x1]  ;;  %v9946_v23 = vld [vmem:[#allocation152_spill] sm:$0xff]  ;;  %v3263_v58 = vpop.permute.xlu1 %3262 }
 0x239   : > { %v5522_v5 = vcombine.low %v1508_v34, %v1516_v20  ;;  %v2466_v61 = vsel %vm6455_vm10, %v5471_v59, %v9943_v3  ;;  %v5472_v11 = vrot.slane %v2477_v18, 11  ;;  %v1249_v48 = vrot.slane %v9945_v27, 4  ;;  %v3423_v50 = vpop.permute.xlu0 %3422  ;;  %v9950_v40 = vld [vmem:[#allocation158_spill] sm:$0xff]  ;;  %v6185_v35 = vld [vmem:[#allocation2 + $0x114] sm:$0xf]  ;;  %v9954_v27 = vld [vmem:[#allocation167_spill] sm:$0xff] }
 0x23a   : > { %v5583_v51 = vcombine.low %v2466_v61, %v2475_v43  ;;  %v2497_v9 = vsel %vm6455_vm10, %v2489_v38, %v9944_v19  ;;  %v1519_v56 = vor.u32 %v9947_v49, %v9946_v23  ;;  %4340 = vmatmul.mubr.bf16.gmra.mxu0 %v3645_v57  ;;  %v8671_v26 = vsel %vm3482_vm14, %v5521_v54, %v8458_v41  ;;  %v9951_v32 = vld [vmem:[#allocation162_spill] sm:$0xff]  ;;  %v942_v54 = vld [vmem:[#allocation2 + $0x154] sm:$0x8]  ;;  %v9956_v23 = vld [vmem:[#allocation171_spill] sm:$0xff] }
 0x23b   : > { %v3649_v0 = vsel %vm3482_vm14, %v5550_v16, %v3261_v10  ;;  %v2488_v53 = vsel %vm6455_vm10, %v5472_v11, %v9948_v46  ;;  %v5442_v17 = vrot.slane %v1237_v55, 11  ;;  %4347 = vmatprep.mubr.bf16.mxu0 %v3713_v36  ;;  %v1257_v60 = vsel %vm6455_vm10, %v1249_v48, %v9949_v33  ;;  %v6184_v16 = vld [vmem:[#allocation2 + $0x110] sm:$0xf]  ;;  %v9952_v43 = vld [vmem:[#allocation146_spill] sm:$0xff] }
 0x23c   : > { %v5584_v44 = vcombine.low %v2488_v53, %v2497_v9  ;;  %v1520_v57 = vrot.slane %v1519_v56, 4  ;;  %v1524_v41 = vor.u32 %v9951_v32, %v9950_v40  ;;  %v8684_v10 = vsel %vm3482_vm14, %v5489_v25, %v8451_v8  ;;  %v9953_v25 = vld [vmem:[#allocation151_spill] sm:$0xff]  ;;  %v9955_v48 = vld [vmem:[#allocation170_spill] sm:$0xff]  ;;  %v9957_v49 = vld [vmem:[#allocation172_spill] sm:$0xff] }
 0x23d   : > { %v5551_v59 = vcombine.low %v6184_v16, %v6185_v35  ;;  %v1248_v18 = vsel %vm6455_vm10, %v5442_v17, %v9952_v43  ;;  %v1527_v36 = vshll.u32 %v1316_v7, 16  ;;  %v2499_v3 = vshrl.u32 %v2222_v62, 16  ;;  %v9958_v53 = vld [vmem:[#allocation193_spill] sm:$0xff]  ;;  %v3425_v62 = vpop.permute.xlu0 %3424  ;;  %v6187_v16 = vld [vmem:[#allocation2 + $0x12c] sm:$0xf]  ;;  %v9961_v43 = vld [vmem:[#allocation156_spill] sm:$0xff] }
 0x23e   : > { %v5490_v34 = vcombine.low %v1248_v18, %v1257_v60  ;;  %v1522_v20 = vsel %vm6714_vm13, %v1520_v57, %v9950_v40  ;;  %v1525_v38 = vrot.slane %v1524_v41, 4  ;;  %v2511_v11 = vrot.slane %v7979_v14, 4  ;;  %v9959_v60 = vld [vmem:[#allocation192_spill] sm:$0xff]  ;;  %v2225_v40 = vld [vmem:[#allocation2 + $0x16c] sm:$0x8]  ;;  %v3265_v32 = vpop.permute.xlu1 %3264 }
 0x23f   : > { %v1529_v61 = vrot.slane %v1527_v36, 5  ;;  %v1259_v8 = vshrl.u32 %v942_v54, 16  ;;  %v1271_v55 = vrot.slane %v9953_v25, 4  ;;  %v8696_v19 = vsel %vm3482_vm14, %v5522_v5, %v8523_v37  ;;  %4195 = vmatmul.mubr.bf16.gmra.mxu1 %v8606_v24  ;;  %v1317_v5 = vld [vmem:[#allocation2 + $0x178] sm:$0x1] }
 0x240   : > { %v5473_v9 = vrot.slane %v2499_v3, 11  ;;  %v1533_v7 = vor.u32 %v9955_v48, %v9954_v27  ;;  %v1538_v56 = vor.u32 %v9957_v49, %v9956_v23  ;;  %v3717_v46 = vsel %vm3482_vm14, %v5583_v51, %v3423_v50  ;;  %4202 = vmatprep.mubr.bf16.mxu1 %v8634_v29  ;;  %v9960_v24 = vld [vmem:[#allocation161_spill] sm:$0xff]  ;;  %v6186_v54 = vld [vmem:[#allocation2 + $0x128] sm:$0xf]  ;;  %v945_v36 = vld [vmem:[#allocation2 + $0x16c] sm:$0x8] }
 0x241   : > { %v1530_v14 = vsel %vm6714_vm13, %v1525_v38, %v1529_v61  ;;  %v2519_v17 = vsel %vm6455_vm10, %v2511_v11, %v9958_v53  ;;  %v5443_v37 = vrot.slane %v1259_v8, 11  ;;  %v1279_v51 = vsel %vm6455_vm10, %v1271_v55, %v9960_v24  ;;  %v2588_v8 = vld [vmem:[#allocation2 + $0x70] sm:$0x1]  ;;  %v9962_v27 = vld [vmem:[#allocation166_spill] sm:$0xff] }
 0x242   : > { %v5523_v33 = vcombine.low %v1522_v20, %v1530_v14  ;;  %v2510_v57 = vsel %vm6455_vm10, %v5473_v9, %v9959_v60  ;;  %v1534_v50 = vrot.slane %v1533_v7, 4  ;;  %4348 = vmatmul.mubr.bf16.gmra.mxu0 %v3649_v0  ;;  %v3653_v41 = vsel %vm3482_vm14, %v5551_v59, %v3263_v58  ;;  %v9964_v49 = vld [vmem:[#allocation58_spill] sm:$0xff] }
 0x243   : > { %v5552_v35 = vcombine.low %v6186_v54, %v6187_v16  ;;  %v5585_v29 = vcombine.low %v2510_v57, %v2519_v17  ;;  %v1270_v18 = vsel %vm6455_vm10, %v5443_v37, %v9961_v43  ;;  %4355 = vmatprep.mubr.bf16.mxu0 %v3717_v46  ;;  %v1539_v3 = vrot.slane %v1538_v56, 4  ;;  %v9966_v56 = vld [vmem:[#allocation64_spill] sm:$0xff]  ;;  %v9967_v46 = vld [vmem:[#allocation61_spill] sm:$0xff]  ;;  %v2228_v53 = vld [vmem:[#allocation2 + $0x184] sm:$0x8]  ;;  %v3427_v17 = vpop.permute.xlu0 %3426 }
 0x244   : > { %v5491_v20 = vcombine.low %v1270_v18, %v1279_v51  ;;  %v1536_v38 = vsel %vm6714_vm13, %v1534_v50, %v9956_v23  ;;  %v1541_v0 = vshll.u32 %v1317_v5, 16  ;;  %v3721_v61 = vsel %vm3482_vm14, %v5584_v44, %v3425_v62  ;;  %v9963_v23 = vld [vmem:[#allocation60_spill] sm:$0xff]  ;;  %v6189_v43 = vld [vmem:[#allocation2 + $0x144] sm:$0xf] }
 0x245   : > { %v8726_v58 = vsel %vm3482_vm14, %v5490_v34, %v8514_v30  ;;  %v2521_v59 = vshrl.u32 %v2225_v40, 16  ;;  %v2533_v11 = vrot.slane %v8024_v47, 4  ;;  %v8730_v25 = vsel %vm3482_vm14, %v5552_v35, %v3265_v32  ;;  %v9969_v62 = vld [vmem:[#allocation184_spill] sm:$0xff]  ;;  %v9970_v32 = vld [vmem:[#allocation175_spill] sm:$0xff]  ;;  %v6188_v35 = vld [vmem:[#allocation2 + $0x140] sm:$0xf] }
 0x246   : > { %v1543_v55 = vrot.slane %v1541_v0, 5  ;;  %v1281_v9 = vshrl.u32 %v945_v36, 16  ;;  %v1293_v48 = vrot.slane %v9962_v27, 4  ;;  %v9965_v30 = vor.u32 %v9963_v23, %v9964_v49  ;;  %v9971_v36 = vld [vmem:[#allocation198_spill] sm:$0xff] }
 0x247   : > { %v5474_v7 = vrot.slane %v2521_v59, 11  ;;  %v2541_v44 = vsel %vm6455_vm10, %v2533_v11, %v8075_v6  ;;  %v9968_v47 = vor.u32 %v9966_v56, %v9967_v46  ;;  %v2640_v57 = vshll.u32 %v2588_v8, 16  ;;  %4203 = vmatmul.mubr.bf16.gmra.mxu1 %v8642_v28  ;;  %v9972_v59 = vld [vmem:[#allocation85_spill] sm:$0xff]  ;;  %v9973_v11 = vld [vmem:[#allocation83_spill] sm:$0xff]  ;;  %v9976_v23 = vld [vmem:[#allocation14_spill] sm:$0xff] }
 0x248   : > { %v2633_v34 = vrot.slane %v9965_v30, 4  ;;  %v1544_v37 = vsel %vm6714_vm13, %v1539_v3, %v1543_v55  ;;  %v5444_v5 = vrot.slane %v1281_v9, 11  ;;  %v1301_v60 = vsel %vm6455_vm10, %v1293_v48, %v9969_v62  ;;  %4210 = vmatprep.mubr.bf16.mxu1 %v8671_v26  ;;  %v2590_v3 = vld [vmem:[#allocation2 + $0xa0] sm:$0x1]  ;;  %v2591_v55 = vld [vmem:[#allocation2 + $0xb8] sm:$0x1] }
 0x249   : > { %v2638_v14 = vrot.slane %v9968_v47, 4  ;;  %v8750_v6 = vsel %vm3482_vm14, %v5523_v33, %v8588_v22  ;;  %v5524_v24 = vcombine.low %v1536_v38, %v1544_v37  ;;  %v2532_v51 = vsel %vm6455_vm10, %v5474_v7, %v8060_v12  ;;  %v3267_v22 = vpop.permute.xlu1 %3266  ;;  %v6191_v48 = vld [vmem:[#allocation2 + $0x15c] sm:$0xf]  ;;  %v9977_v30 = vld [vmem:[#allocation86_spill] sm:$0xff]  ;;  %v9981_v37 = vld [vmem:[#allocation99_spill] sm:$0xff] }
 0x24a   : > { %v2635_v50 = vsel %vm6714_vm13, %v2633_v34, %v9967_v46  ;;  %v5586_v40 = vcombine.low %v2532_v51, %v2541_v44  ;;  %v1292_v28 = vsel %vm6455_vm10, %v5444_v5, %v9970_v32  ;;  %v2642_v54 = vrot.slane %v2640_v57, 5  ;;  %4356 = vmatmul.mubr.bf16.gmra.mxu0 %v3653_v41  ;;  %v2592_v44 = vld [vmem:[#allocation2 + $0xd0] sm:$0x1]  ;;  %v9984_v57 = vld [vmem:[#allocation101_spill] sm:$0xff]  ;;  %v3429_v32 = vpop.permute.xlu0 %3428 }
 0x24b   : > { %v2543_v16 = vshrl.u32 %v2228_v53, 16  ;;  %v3725_v33 = vsel %vm3482_vm14, %v5585_v29, %v3427_v17  ;;  %v5553_v12 = vcombine.low %v6188_v35, %v6189_v43  ;;  %v8763_v18 = vcombine.low %v1292_v28, %v1301_v60  ;;  %4363 = vmatprep.mubr.bf16.mxu0 %v3721_v61  ;;  %v6190_v61 = vld [vmem:[#allocation2 + $0x158] sm:$0xf]  ;;  %v9980_v17 = vld [vmem:[#allocation100_spill] sm:$0xff]  ;;  %v9983_v60 = vld [vmem:[#allocation102_spill] sm:$0xff] }
 0x24c   : > { %v2555_v38 = vrot.slane %v9971_v36, 4  ;;  %v8768_v26 = vsel %vm3482_vm14, %v5491_v20, %v8580_v21  ;;  %v2643_v0 = vsel %vm6714_vm13, %v2638_v14, %v2642_v54  ;;  %v9974_v29 = vor.u32 %v9972_v59, %v9973_v11  ;;  %v9975_v21 = vld [vmem:[#allocation10_spill] sm:$0xff]  ;;  %v679_v14 = vld [vmem:[#allocation2 + $0x19c] sm:$0x8] }
 0x24d   : > { %v5475_v41 = vrot.slane %v2543_v16, 11  ;;  %v8777_v9 = vsel %vm3482_vm14, %v5524_v24, %v8650_v45  ;;  %v8779_v27 = vcombine.low %v2635_v50, %v2643_v0  ;;  %v5554_v7 = vcombine.low %v6190_v61, %v6191_v48  ;;  %v9978_v45 = vld [vmem:[#allocation87_spill] sm:$0xff]  ;;  %v9986_v54 = vld [vmem:[#allocation114_spill] sm:$0xff]  ;;  %v9987_v16 = vld [vmem:[#allocation113_spill] sm:$0xff] }
 0x24e   : > { %v2661_v8 = vrot.slane %v9974_v29, 4  ;;  %v2563_v20 = vsel %vm6455_vm10, %v2555_v38, %v9975_v21  ;;  %v9979_v56 = vor.u32 %v9978_v45, %v9977_v30  ;;  %v2668_v47 = vshll.u32 %v2590_v3, 16  ;;  %v9989_v36 = vld [vmem:[#allocation117_spill] sm:$0xff]  ;;  %v9990_v38 = vld [vmem:[#allocation115_spill] sm:$0xff]  ;;  %v3269_v59 = vpop.permute.xlu1 %3268 }
 0x24f   : > { %v2554_v49 = vsel %vm6455_vm10, %v5475_v41, %v9976_v23  ;;  %v9982_v5 = vor.u32 %v9980_v17, %v9981_v37  ;;  %v9985_v24 = vor.u32 %v9983_v60, %v9984_v57  ;;  %v2682_v50 = vshll.u32 %v2591_v55, 16  ;;  %4211 = vmatmul.mubr.bf16.gmra.mxu1 %v8684_v10  ;;  %v9997_v17 = vld [vmem:[#allocation40_spill] sm:$0xff] }
 0x250   : > { %v2663_v34 = vsel %vm6714_vm13, %v2661_v8, %v9977_v30  ;;  %v2666_v46 = vrot.slane %v9979_v56, 4  ;;  %v8793_v53 = vcombine.low %v2554_v49, %v2563_v20  ;;  %v2670_v28 = vrot.slane %v2668_v47, 5  ;;  %4218 = vmatprep.mubr.bf16.mxu1 %v8696_v19  ;;  %v3431_v8 = vpop.permute.xlu0 %3430 }
 0x251   : > { %v2675_v62 = vrot.slane %v9982_v5, 4  ;;  %v2680_v51 = vrot.slane %v9985_v24, 4  ;;  %v9988_v35 = vor.u32 %v9986_v54, %v9987_v16  ;;  %v9991_v3 = vor.u32 %v9989_v36, %v9990_v38  ;;  %v9999_v5 = vld [vmem:[#allocation129_spill] sm:$0xff]  ;;  %v10002_v24 = vld [vmem:[#allocation134_spill] sm:$0xff] }
 0x252   : > { %v2696_v41 = vshll.u32 %v2592_v44, 16  ;;  %v2684_v29 = vrot.slane %v2682_v50, 5  ;;  %v680_v55 = vsel %vm6293_vm4, 0, %v679_v14  ;;  %v2577_v61 = vrot.slane %v8248_v63, 4  ;;  %v2586_v44 = vld [vmem:[#allocation2 + $0x40] sm:$0x1]  ;;  %4364 = vmatmul.mubr.bf16.gmra.mxu0 %v8730_v25 }
 0x253   : > { %v2689_v43 = vrot.slane %v9988_v35, 4  ;;  %v2694_v0 = vrot.slane %v9991_v3, 4  ;;  %v2677_v11 = vsel %vm6714_vm13, %v2675_v62, %v9984_v57  ;;  %v3661_v48 = vsel %vm3482_vm14, %v5553_v12, %v3267_v22  ;;  %681 = vst [vmem:[#allocation2 + $0x19c] sm:$0x8] %v680_v55  ;;  %v2593_v22 = vld [vmem:[#allocation2 + $0xe8] sm:$0x1]  ;;  %4371 = vmatprep.mubr.bf16.mxu0 %v3725_v33 }
 0x254   : > { %v2671_v21 = vsel %vm6714_vm13, %v2666_v46, %v2670_v28  ;;  %v2698_v20 = vrot.slane %v2696_v41, 5  ;;  %v3729_v23 = vsel %vm3482_vm14, %v5586_v40, %v3429_v32  ;;  %v2685_v63 = vsel %vm6714_vm13, %v2680_v51, %v2684_v29  ;;  %v9993_v40 = vld [vmem:[#allocation39_spill] sm:$0xff]  ;;  %v2594_v46 = vld [vmem:[#allocation2 + $0x100] sm:$0x1]  ;;  %v9996_v14 = vld [vmem:[#allocation41_spill] sm:$0xff] }
 0x255   : > { %v2691_v10 = vsel %vm6714_vm13, %v2689_v43, %v9990_v38  ;;  %v8823_v49 = vcombine.low %v2663_v34, %v2671_v21  ;;  %v2585_v19 = vsel %vm6455_vm10, %v2577_v61, %v8352_v15  ;;  %v8831_v12 = vsel %vm3482_vm14, %v5554_v7, %v3269_v59  ;;  %v9994_v34 = vld [vmem:[#allocation38_spill] sm:$0xff]  ;;  %v10000_v7 = vld [vmem:[#allocation128_spill] sm:$0xff]  ;;  %v10003_v51 = vld [vmem:[#allocation131_spill] sm:$0xff] }
 0x256   : > { %v8833_v30 = vcombine.low %v2677_v11, %v2685_v63  ;;  %v2699_v25 = vsel %vm6714_vm13, %v2694_v0, %v2698_v20  ;;  %v9995_v45 = vor.u32 %v9993_v40, %v9994_v34  ;;  %v9998_v15 = vor.u32 %v9996_v14, %v9997_v17  ;;  %v10005_v54 = vld [vmem:[#allocation142_spill] sm:$0xff]  ;;  %v10006_v16 = vld [vmem:[#allocation141_spill] sm:$0xff]  ;;  %v10008_v0 = vld [vmem:[#allocation148_spill] sm:$0xff] }
 0x257   : > { %v8840_v47 = vcombine.low %v2691_v10, %v2699_v25  ;;  %v2612_v33 = vshll.u32 %v2586_v44, 16  ;;  %v10001_v62 = vor.u32 %v9999_v5, %v10000_v7  ;;  %v10004_v50 = vor.u32 %v10002_v24, %v10003_v51  ;;  %v2595_v36 = vld [vmem:[#allocation2 + $0x118] sm:$0x1]  ;;  %v10011_v21 = vld [vmem:[#allocation155_spill] sm:$0xff]  ;;  %v10012_v10 = vld [vmem:[#allocation154_spill] sm:$0xff]  ;;  %4219 = vmatmul.mubr.bf16.gmra.mxu1 %v8726_v58 }
 0x258   : > { %v2605_v56 = vrot.slane %v9995_v45, 4  ;;  %v2610_v37 = vrot.slane %v9998_v15, 4  ;;  %v2710_v28 = vshll.u32 %v2593_v22, 16  ;;  %v10007_v35 = vor.u32 %v10005_v54, %v10006_v16  ;;  %v10009_v41 = vld [vmem:[#allocation145_spill] sm:$0xff]  ;;  %v10014_v63 = vld [vmem:[#allocation160_spill] sm:$0xff]  ;;  %v10015_v22 = vld [vmem:[#allocation159_spill] sm:$0xff]  ;;  %4226 = vmatprep.mubr.bf16.mxu1 %v8750_v6 }
 0x259   : > { %v2703_v60 = vrot.slane %v10001_v62, 4  ;;  %v2708_v32 = vrot.slane %v10004_v50, 4  ;;  %v2614_v38 = vrot.slane %v2612_v33, 5  ;;  %v10010_v59 = vor.u32 %v10008_v0, %v10009_v41  ;;  %v10017_v14 = vld [vmem:[#allocation174_spill] sm:$0xff]  ;;  %v10021_v16 = vld [vmem:[#allocation177_spill] sm:$0xff] }
 0x25a   : > { %v2607_v57 = vsel %vm6714_vm13, %v2605_v56, %v9997_v17  ;;  %v2717_v43 = vrot.slane %v10007_v35, 4  ;;  %v2724_v29 = vshll.u32 %v2594_v46, 16  ;;  %v2712_v55 = vrot.slane %v2710_v28, 5  ;;  %v2231_v34 = vld [vmem:[#allocation2 + $0x19c] sm:$0x8]  ;;  %4372 = vmatmul.mubr.bf16.gmra.mxu0 %v3661_v48 }
 0x25b   : > { %v2705_v3 = vsel %vm6714_vm13, %v2703_v60, %v10003_v51  ;;  %v2722_v11 = vrot.slane %v10010_v59, 4  ;;  %v10013_v20 = vor.u32 %v10011_v21, %v10012_v10  ;;  %v10016_v25 = vor.u32 %v10014_v63, %v10015_v22  ;;  %v10018_v17 = vld [vmem:[#allocation173_spill] sm:$0xff]  ;;  %v2596_v60 = vld [vmem:[#allocation2 + $0x130] sm:$0x1]  ;;  %4379 = vmatprep.mubr.bf16.mxu0 %v3729_v23  ;;  %v10026_v23 = vld [vmem:[#allocation183_spill] sm:$0xff] }
 0x25c   : > { %v2719_v61 = vsel %vm6714_vm13, %v2717_v43, %v10009_v41  ;;  %v2615_v45 = vsel %vm6714_vm13, %v2610_v37, %v2614_v38  ;;  %v2726_v56 = vrot.slane %v2724_v29, 5  ;;  %v2738_v46 = vshll.u32 %v2595_v36, 16  ;;  %v10023_v36 = vld [vmem:[#allocation181_spill] sm:$0xff]  ;;  %v10024_v38 = vld [vmem:[#allocation180_spill] sm:$0xff]  ;;  %v10027_v41 = vld [vmem:[#allocation182_spill] sm:$0xff] }
 0x25d   : > { %v2731_v44 = vrot.slane %v10013_v20, 4  ;;  %v2736_v40 = vrot.slane %v10016_v25, 4  ;;  %v10019_v15 = vor.u32 %v10017_v14, %v10018_v17  ;;  %v2565_v5 = vshrl.u32 %v2231_v34, 16  ;;  %v2598_v29 = vld [vmem:[#allocation2 + $0x160] sm:$0x1]  ;;  %v10029_v21 = vld [vmem:[#allocation189_spill] sm:$0xff] }
 0x25e   : > { %v8879_v7 = vcombine.low %v2607_v57, %v2615_v45  ;;  %v2713_v62 = vsel %vm6714_vm13, %v2708_v32, %v2712_v55  ;;  %v3733_v37 = vsel %vm3482_vm14, %v8793_v53, %v3431_v8  ;;  %v2727_v6 = vsel %vm6714_vm13, %v2722_v11, %v2726_v56  ;;  %v2597_v57 = vld [vmem:[#allocation2 + $0x148] sm:$0x1]  ;;  %v10020_v32 = vld [vmem:[#allocation176_spill] sm:$0xff]  ;;  %v2599_v63 = vld [vmem:[#allocation2 + $0x178] sm:$0x1] }
 0x25f   : > { %v2745_v33 = vrot.slane %v10019_v15, 4  ;;  %v2733_v58 = vsel %vm6714_vm13, %v2731_v44, %v10015_v22  ;;  %v8888_v24 = vcombine.low %v2705_v3, %v2713_v62  ;;  %v2740_v51 = vrot.slane %v2738_v46, 5  ;;  %v10030_v10 = vld [vmem:[#allocation188_spill] sm:$0xff]  ;;  %v10032_v34 = vld [vmem:[#allocation191_spill] sm:$0xff]  ;;  %v10033_v45 = vld [vmem:[#allocation190_spill] sm:$0xff]  ;;  %4227 = vmatmul.mubr.bf16.gmra.mxu1 %v8768_v26 }
 0x260   : > { %v5476_v50 = vrot.slane %v2565_v5, 11  ;;  %v8892_v28 = vcombine.low %v2719_v61, %v2727_v6  ;;  %v10022_v48 = vor.u32 %v10021_v16, %v10020_v32  ;;  %v2752_v43 = vshll.u32 %v2596_v60, 16  ;;  %v10035_v17 = vld [vmem:[#allocation195_spill] sm:$0xff]  ;;  %v10036_v15 = vld [vmem:[#allocation194_spill] sm:$0xff]  ;;  %v10039_v60 = vld [vmem:[#allocation196_spill] sm:$0xff]  ;;  %4234 = vmatprep.mubr.bf16.mxu1 %v8777_v9 }
 0x261   : > { %v2747_v54 = vsel %vm6714_vm13, %v2745_v33, %v10020_v32  ;;  %v2741_v53 = vsel %vm6714_vm13, %v2736_v40, %v2740_v51  ;;  %v10025_v3 = vor.u32 %v10023_v36, %v10024_v38  ;;  %v10028_v59 = vor.u32 %v10026_v23, %v10027_v41  ;;  %v736_v16 = vld [vmem:[#allocation2 + $0x1a8] sm:$0x1]  ;;  %v10042_v38 = vld [vmem:[#allocation9_spill] sm:$0xff] }
 0x262   : > { %v2750_v35 = vrot.slane %v10022_v48, 4  ;;  %v2576_v8 = vsel %vm6455_vm10, %v5476_v50, %v8279_v13  ;;  %v8911_v55 = vcombine.low %v2733_v58, %v2741_v53  ;;  %v2766_v61 = vshll.u32 %v2597_v57, 16  ;;  %v10038_v58 = vld [vmem:[#allocation197_spill] sm:$0xff]  ;;  %4380 = vmatmul.mubr.bf16.gmra.mxu0 %v8831_v12 }
 0x263   : > { %v2759_v0 = vrot.slane %v10025_v3, 4  ;;  %v2764_v11 = vrot.slane %v10028_v59, 4  ;;  %v10031_v20 = vor.u32 %v10029_v21, %v10030_v10  ;;  %v5588_v22 = vcombine.low %v2576_v8, %v2585_v19  ;;  %v2600_v19 = vld [vmem:[#allocation2 + $0x190] sm:$0x1]  ;;  %4387 = vmatprep.mubr.bf16.mxu0 %v3733_v37 }
 0x264   : > { %v2754_v25 = vrot.slane %v2752_v43, 5  ;;  %v10034_v56 = vor.u32 %v10032_v34, %v10033_v45  ;;  %v2768_v31 = vrot.slane %v2766_v61, 5  ;;  %v2780_v14 = vshll.u32 %v2598_v29, 16 }
 0x265   : > { %v2773_v44 = vrot.slane %v10031_v20, 4  ;;  %v2761_v40 = vsel %vm6714_vm13, %v2759_v0, %v10027_v41  ;;  %v10037_v33 = vor.u32 %v10035_v17, %v10036_v15  ;;  %v10040_v6 = vor.u32 %v10038_v58, %v10039_v60  ;;  %v10049_v20 = vld [vmem:[#allocation16_spill] sm:$0xff] }
 0x266   : > { %v2778_v46 = vrot.slane %v10034_v56, 4  ;;  %v2755_v62 = vsel %vm6714_vm13, %v2750_v35, %v2754_v25  ;;  %v2794_v57 = vshll.u32 %v2599_v63, 16  ;;  %v10041_v50 = vor.u32 %v8154_v42, %v8102_v1  ;;  %v10043_v42 = vld [vmem:[#allocation7_spill] sm:$0xff]  ;;  %v3271_v63 = vpop.permute.xlu1 %3270  ;;  %v6193_v25 = vld [vmem:[#allocation2 + $0x174] sm:$0xf] }
 0x267   : > { %v2775_v13 = vsel %vm6714_vm13, %v2773_v44, %v10033_v45  ;;  %v2787_v5 = vrot.slane %v10037_v33, 4  ;;  %v2792_v51 = vrot.slane %v10040_v6, 4  ;;  %v5615_v48 = vcombine.low %v2747_v54, %v2755_v62  ;;  %v6194_v33 = vld [vmem:[#allocation2 + $0x188] sm:$0xf]  ;;  %v10050_v62 = vld [vmem:[#allocation82_spill] sm:$0xff] }
 0x268   : > { %v2801_v32 = vrot.slane %v10041_v50, 4  ;;  %v2769_v53 = vsel %vm6714_vm13, %v2764_v11, %v2768_v31  ;;  %v2782_v26 = vrot.slane %v2780_v14, 5  ;;  %v2796_v36 = vrot.slane %v2794_v57, 5  ;;  %v10047_v11 = vld [vmem:[#allocation8_spill] sm:$0xff] }
 0x269   : > { %v2789_v35 = vsel %vm6714_vm13, %v2787_v5, %v10039_v60  ;;  %v5616_v43 = vcombine.low %v2761_v40, %v2769_v53  ;;  %v10044_v9 = vor.u32 %v10043_v42, %v10042_v38  ;;  %v2808_v0 = vshll.u32 %v2600_v19, 16  ;;  %v6195_v5 = vld [vmem:[#allocation2 + $0x18c] sm:$0xf] }
 0x26a   : > { %v2803_v1 = vsel %vm6714_vm13, %v2801_v32, %v10042_v38  ;;  %v2783_v3 = vsel %vm6714_vm13, %v2778_v46, %v2782_v26  ;;  %v737_v41 = vsel %vm6302_vm7, 0, %v736_v16  ;;  %v10046_v12 = vor.u32 %v8272_v2, %v8269_v52  ;;  %v6192_v2 = vld [vmem:[#allocation2 + $0x170] sm:$0xf]  ;;  %v3273_v17 = vpop.permute.xlu1 %3272 }
 0x26b   : > { %v2806_v54 = vrot.slane %v10044_v9, 4  ;;  %v10048_v29 = vshrl.u32 %v10047_v11, 16  ;;  %v5617_v61 = vcombine.low %v2775_v13, %v2783_v3  ;;  %v2797_v21 = vsel %vm6714_vm13, %v2792_v51, %v2796_v36  ;;  %738 = vst [vmem:[#allocation2 + $0x1a8] sm:$0x1] %v737_v41  ;;  %v3433_v13 = vpop.permute.xlu0 %3432  ;;  %v9004_v3 = vld [vmem:[%s9331_s4] ss:$0 sm:$0xff] }
 0x26c   : > { %v2815_v59 = vrot.slane %v10046_v12, 4  ;;  %v5618_v37 = vcombine.low %v2789_v35, %v2797_v21  ;;  %v2810_v10 = vrot.slane %v2808_v0, 5  ;;  %v3545_v52 = vsel %vm3482_vm14, %v8763_v18, %v8644_v4 }
 0x26d   : > { %v2818_v8 = vrot.slane %v10048_v29, 4  ;;  %v5555_v40 = vcombine.low %v6192_v2, %v6193_v25  ;;  %4235 = vmatmul.mubr.bf16.gmra.mxu1 %v3545_v52  ;;  %v3737_v18 = vsel %vm3482_vm14, %v5588_v22, %v3433_v13  ;;  %v5556_v19 = vcombine.low %v6194_v33, %v6195_v5  ;;  %v10051_v22 = vld [vmem:[#allocation56_spill] sm:$0xff] }
 0x26e   : > { %v2817_v44 = vsel %vm6714_vm13, %v2815_v59, %v10049_v20  ;;  %v2811_v34 = vsel %vm6714_vm13, %v2806_v54, %v2810_v10  ;;  %6023 = vmatprep.mubr.msk.bf16.mxu1 %vm3482_vm14, %v8779_v27  ;;  %vm5158_vm4 = vcmask 1045509  }
 0x26f   : > { %v2819_v45 = vor.u32 %v2818_v8, %v10049_v20  ;;  %v5619_v56 = vcombine.low %v2803_v1, %v2811_v34  ;;  %v3669_v46 = vsel %vm3482_vm14, %v5555_v40, %v3271_v63  ;;  %v3673_v58 = vsel %vm3482_vm14, %v5556_v19, %v3273_v17 }
 0x270   : > { %4388 = vmatmul.mubr.bf16.gmra.mxu0 %v3669_v46 }
 0x271   : > { %v2820_v14 = vrot.slane %v2819_v45, 4  ;;  %4395 = vmatprep.mubr.bf16.mxu0 %v3737_v18 }
 0x272   : > { %v2601_v31 = vld [vmem:[#allocation2 + $0x1a8] sm:$0x1] }
 0x273   : > { %v2822_v4 = vshll.u32 %v2601_v31, 16 }
 0x275   : > { %v2824_v15 = vrot.slane %v2822_v4, 5  ;;  %6024 = vmatmul.mubr.msk.bf16.vlgmr.msra.gmra.mxu1 %vm3482_vm14, %v10050_v62 }
 0x276   : > { %6027 = vmatprep.mubr.msk.bf16.mxu1 %vm3482_vm14, %v8823_v49 }
 0x277   : > { %v2825_v27 = vsel %vm6714_vm13, %v2820_v14, %v2824_v15 }
 0x278   : > { %v5620_v60 = vcombine.low %v2817_v44, %v2825_v27  ;;  %4396 = vmatmul.mubr.bf16.gmra.mxu0 %v3673_v58 }
 0x279   : > { %6019 = vmatprep.mubr.msk.bf16.mxu0 %vm3482_vm14, %v8879_v7 }
 0x27d   : > { %6028 = vmatmul.mubr.msk.bf16.gmra.mxu1 %vm3482_vm14, %v8833_v30 }
 0x27e   : > { %6031 = vmatprep.mubr.msk.bf16.mxu1 %vm3482_vm14, %v8840_v47 }
 0x280   : > { %6020 = vmatmul.mubr.msk.bf16.vlgmr.msra.gmra.mxu0 %vm3482_vm14, %v10051_v22 }
 0x285   : > { %6032 = vmatmul.mubr.msk.bf16.gmra.mxu1 %vm3482_vm14, %v8888_v24 }
 0x286   : > { %6035 = vmatprep.mubr.msk.bf16.mxu1 %vm3482_vm14, %v8892_v28 }
 0x28d   : > { %6036 = vmatmul.mubr.msk.bf16.gmra.mxu1 %vm3482_vm14, %v8911_v55 }
 0x28e   : > { %6039 = vmatprep.mubr.msk.bf16.mxu1 %vm3482_vm14, %v5615_v48 }
 0x295   : > { %6040 = vmatmul.mubr.msk.bf16.gmra.mxu1 %vm3482_vm14, %v5616_v43 }
 0x296   : > { %6043 = vmatprep.mubr.msk.bf16.mxu1 %vm3482_vm14, %v5617_v61 }
 0x29d   : > { %6044 = vmatmul.mubr.msk.bf16.gmra.mxu1 %vm3482_vm14, %v5618_v37 }
 0x29e   : > { %6047 = vmatprep.mubr.msk.bf16.mxu1 %vm3482_vm14, %v5619_v56 }
 0x2a5   : > { %6048 = vmatmul.mubr.msk.bf16.gmra.mxu1 %vm3482_vm14, %v5620_v60 }
 0x2af   : > { %v5745_v39 = vpop.f32.mrf.mxu1 }
 0x2b1   : > { %v5746_v49 = vpop.f32.mrf.mxu1 }
 0x2b2   : > { %v5747_v30 = vadd.f32 %v5746_v49, %v5745_v39 }
 0x2b3   : > { %v5748_v47 = vpop.f32.mrf.mxu1 }
 0x2b4   : > { %v4117_v37 = vadd.f32 %v5747_v30, %v9004_v3 }
 0x2b5   : > { %v5749_v7 = vpop.f32.mrf.mxu1 }
 0x2b6   : > { %v5750_v24 = vadd.f32 %v5749_v7, %v5748_v47 }
 0x2b7   : > { %v5751_v28 = vpop.f32.mrf.mxu1 }
 0x2b8   : > { %v4120_v56 = vadd.f32 %v5750_v24, %v9004_v3 }
 0x2b9   : > { %v5752_v55 = vpop.f32.mrf.mxu1  ;;  %v5857_v6 = vpop.f32.mrf.mxu0 }
 0x2ba   : > { %v5753_v51 = vadd.f32 %v5752_v55, %v5751_v28 }
 0x2bb   : > { %v5754_v57 = vpop.f32.mrf.mxu1  ;;  %v5858_v50 = vpop.f32.mrf.mxu0 }
 0x2bc   : > { %v5859_v32 = vadd.f32 %v5858_v50, %v5857_v6  ;;  %v4125_v41 = vadd.f32 %v5753_v51, %v9004_v3 }
 0x2bd   : > { %v5755_v16 = vpop.f32.mrf.mxu1  ;;  %v5860_v48 = vpop.f32.mrf.mxu0 }
 0x2be   : > { %v5756_v53 = vadd.f32 %v5755_v16, %v5754_v57  ;;  %v9012_v25 = vadd.f32 %v5859_v32, %v4117_v37 }
 0x2bf   : > { %v5757_v26 = vpop.f32.mrf.mxu1  ;;  %v5861_v35 = vpop.f32.mrf.mxu0 }
 0x2c0   : > { %v5862_v43 = vadd.f32 %v5861_v35, %v5860_v48  ;;  %v4128_v10 = vadd.f32 %v5756_v53, %v9004_v3 }
 0x2c1   : > { %v5758_v36 = vpop.f32.mrf.mxu1 }
 0x2c2   : > { %v5863_v38 = vpop.f32.mrf.mxu0  ;;  %v5759_v1 = vadd.f32 %v5758_v36, %v5757_v26  ;;  %v9020_v17 = vadd.f32 %v5862_v43, %v4120_v56 }
 0x2c3   : > { %v5760_v42 = vpop.f32.mrf.mxu1 }
 0x2c4   : > { %v5864_v9 = vpop.f32.mrf.mxu0  ;;  %v4133_v52 = vadd.f32 %v5759_v1, %v9004_v3 }
 0x2c5   : > { %v5865_v54 = vadd.f32 %v5864_v9, %v5863_v38  ;;  %v5761_v0 = vpop.f32.mrf.mxu1 }
 0x2c6   : > { %v5866_v23 = vpop.f32.mrf.mxu0  ;;  %v5762_v12 = vadd.f32 %v5761_v0, %v5760_v42 }
 0x2c7   : > { %v5763_v59 = vpop.f32.mrf.mxu1  ;;  %v9007_v8 = vadd.f32 %v5865_v54, %v4125_v41 }
 0x2c8   : > { %v5867_v11 = vpop.f32.mrf.mxu0  ;;  %v4136_v4 = vadd.f32 %v5762_v12, %v9004_v3 }
 0x2c9   : > { %v5868_v29 = vadd.f32 %v5867_v11, %v5866_v23  ;;  %v5764_v61 = vpop.f32.mrf.mxu1 }
 0x2ca   : > { %v5869_v21 = vpop.f32.mrf.mxu0  ;;  %v5765_v20 = vadd.f32 %v5764_v61, %v5763_v59 }
 0x2cb   : > { %v5766_v44 = vpop.f32.mrf.mxu1  ;;  %v9014_v40 = vadd.f32 %v5868_v29, %v4128_v10 }
 0x2cc   : > { %v5870_v63 = vpop.f32.mrf.mxu0  ;;  %v4141_v58 = vadd.f32 %v5765_v20, %v9004_v3 }
 0x2cd   : > { %v5871_v2 = vadd.f32 %v5870_v63, %v5869_v21  ;;  %v5767_v34 = vpop.f32.mrf.mxu1 }
 0x2ce   : > { %v5872_v45 = vpop.f32.mrf.mxu0  ;;  %v5768_v46 = vadd.f32 %v5767_v34, %v5766_v44 }
 0x2cf   : > { %v9017_v31 = vadd.f32 %v5871_v2, %v4133_v52  ;;  %v5769_v13 = vpop.f32.mrf.mxu1 }
 0x2d0   : > { %v5873_v14 = vpop.f32.mrf.mxu0  ;;  %v4144_v24 = vadd.f32 %v5768_v46, %v9004_v3 }
 0x2d1   : > { %v5874_v18 = vadd.f32 %v5873_v14, %v5872_v45  ;;  %v5770_v15 = vpop.f32.mrf.mxu1 }
 0x2d2   : > { %v5875_v33 = vpop.f32.mrf.mxu0  ;;  %v5771_v5 = vadd.f32 %v5770_v15, %v5769_v13 }
 0x2d3   : > { %v9022_v19 = vadd.f32 %v5874_v18, %v4136_v4  ;;  %v5772_v62 = vpop.f32.mrf.mxu1 }
 0x2d4   : > { %v5876_v27 = vpop.f32.mrf.mxu0  ;;  %v4149_v16 = vadd.f32 %v5771_v5, %v9004_v3 }
 0x2d5   : > { %v5877_v60 = vadd.f32 %v5876_v27, %v5875_v33  ;;  %v5773_v22 = vpop.f32.mrf.mxu1 }
 0x2d6   : > { %v5878_v39 = vpop.f32.mrf.mxu0  ;;  %v5774_v49 = vadd.f32 %v5773_v22, %v5772_v62 }
 0x2d7   : > { %v9025_v30 = vadd.f32 %v5877_v60, %v4141_v58  ;;  %v5775_v47 = vpop.f32.mrf.mxu1 }
 0x2d8   : > { %v5879_v7 = vpop.f32.mrf.mxu0  ;;  %v4152_v1 = vadd.f32 %v5774_v49, %v9004_v3 }
 0x2d9   : > { %v5880_v28 = vadd.f32 %v5879_v7, %v5878_v39  ;;  %v5776_v55 = vpop.f32.mrf.mxu1 }
 0x2da   : > { %v5881_v6 = vpop.f32.mrf.mxu0  ;;  %v5777_v51 = vadd.f32 %v5776_v55, %v5775_v47 }
 0x2db   : > { %v9028_v57 = vadd.f32 %v5880_v28, %v4144_v24  ;;  %v5778_v50 = vpop.f32.mrf.mxu1 }
 0x2dc   : > { %v5882_v32 = vpop.f32.mrf.mxu0  ;;  %v4157_v59 = vadd.f32 %v5777_v51, %v9004_v3 }
 0x2dd   : > { %v5883_v48 = vadd.f32 %v5882_v32, %v5881_v6  ;;  %v5779_v53 = vpop.f32.mrf.mxu1 }
 0x2de   : > { %v5884_v26 = vpop.f32.mrf.mxu0  ;;  %v5780_v35 = vadd.f32 %v5779_v53, %v5778_v50 }
 0x2df   : > { %v9031_v43 = vadd.f32 %v5883_v48, %v4149_v16  ;;  %v5781_v36 = vpop.f32.mrf.mxu1 }
 0x2e0   : > { %v5885_v38 = vpop.f32.mrf.mxu0  ;;  %v4160_v44 = vadd.f32 %v5780_v35, %v9004_v3 }
 0x2e1   : > { %v5886_v42 = vadd.f32 %v5885_v38, %v5884_v26  ;;  %v5782_v9 = vpop.f32.mrf.mxu1 }
 0x2e2   : > { %v5887_v54 = vpop.f32.mrf.mxu0  ;;  %v5783_v0 = vadd.f32 %v5782_v9, %v5781_v36 }
 0x2e3   : > { %v9034_v23 = vadd.f32 %v5886_v42, %v4152_v1  ;;  %v5784_v41 = vpop.f32.mrf.mxu1 }
 0x2e4   : > { %v5888_v12 = vpop.f32.mrf.mxu0  ;;  %v4165_v13 = vadd.f32 %v5783_v0, %v9004_v3 }
 0x2e5   : > { %v5889_v11 = vadd.f32 %v5888_v12, %v5887_v54  ;;  %v5785_v29 = vpop.f32.mrf.mxu1 }
 0x2e6   : > { %v5890_v61 = vpop.f32.mrf.mxu0  ;;  %v5786_v21 = vadd.f32 %v5785_v29, %v5784_v41 }
 0x2e7   : > { %v9037_v37 = vadd.f32 %v5889_v11, %v4157_v59  ;;  %v5787_v10 = vpop.f32.mrf.mxu1 }
 0x2e8   : > { %v5891_v20 = vpop.f32.mrf.mxu0  ;;  %v4168_v27 = vadd.f32 %v5786_v21, %v9004_v3 }
 0x2e9   : > { %v5892_v63 = vadd.f32 %v5891_v20, %v5890_v61  ;;  %v5788_v52 = vpop.f32.mrf.mxu1 }
 0x2ea   : > { %v5893_v2 = vpop.f32.mrf.mxu0  ;;  %v5789_v34 = vadd.f32 %v5788_v52, %v5787_v10 }
 0x2eb   : > { %v9040_v45 = vadd.f32 %v5892_v63, %v4160_v44  ;;  %v5790_v56 = vpop.f32.mrf.mxu1 }
 0x2ec   : > { %v5894_v46 = vpop.f32.mrf.mxu0  ;;  %v4173_v24 = vadd.f32 %v5789_v34, %v9004_v3 }
 0x2ed   : > { %v5895_v14 = vadd.f32 %v5894_v46, %v5893_v2  ;;  %v5791_v4 = vpop.f32.mrf.mxu1 }
 0x2ee   : > { %v5896_v18 = vpop.f32.mrf.mxu0  ;;  %v5792_v15 = vadd.f32 %v5791_v4, %v5790_v56 }
 0x2ef   : > { %v9043_v33 = vadd.f32 %v5895_v14, %v4165_v13  ;;  %v5793_v5 = vpop.f32.mrf.mxu1 }
 0x2f0   : > { %v5897_v62 = vpop.f32.mrf.mxu0  ;;  %v4176_v48 = vadd.f32 %v5792_v15, %v9004_v3 }
 0x2f1   : > { %v5898_v58 = vadd.f32 %v5897_v62, %v5896_v18  ;;  %v5794_v60 = vpop.f32.mrf.mxu1 }
 0x2f2   : > { %v5899_v22 = vpop.f32.mrf.mxu0  ;;  %v5795_v39 = vadd.f32 %v5794_v60, %v5793_v5 }
 0x2f3   : > { %v9046_v49 = vadd.f32 %v5898_v58, %v4168_v27  ;;  %v5796_v47 = vpop.f32.mrf.mxu1 }
 0x2f4   : > { %v5900_v7 = vpop.f32.mrf.mxu0  ;;  %v4181_v9 = vadd.f32 %v5795_v39, %v9004_v3 }
 0x2f5   : > { %v5901_v28 = vadd.f32 %v5900_v7, %v5899_v22  ;;  %v5797_v55 = vpop.f32.mrf.mxu1 }
 0x2f6   : > { %v5902_v6 = vpop.f32.mrf.mxu0  ;;  %v5798_v51 = vadd.f32 %v5797_v55, %v5796_v47 }
 0x2f7   : > { %v9049_v50 = vadd.f32 %v5901_v28, %v4173_v24  ;;  %v5799_v32 = vpop.f32.mrf.mxu1 }
 0x2f8   : > { %v5903_v16 = vpop.f32.mrf.mxu0  ;;  %v4184_v61 = vadd.f32 %v5798_v51, %v9004_v3 }
 0x2f9   : > { %v5904_v53 = vadd.f32 %v5903_v16, %v5902_v6  ;;  %v5800_v26 = vpop.f32.mrf.mxu1 }
 0x2fa   : > { %v5905_v35 = vpop.f32.mrf.mxu0  ;;  %v5801_v36 = vadd.f32 %v5800_v26, %v5799_v32 }
 0x2fb   : > { %v9052_v38 = vadd.f32 %v5904_v53, %v4176_v48  ;;  %v5802_v1 = vpop.f32.mrf.mxu1 }
 0x2fc   : > { %v5906_v42 = vpop.f32.mrf.mxu0  ;;  %v4189_v34 = vadd.f32 %v5801_v36, %v9004_v3 }
 0x2fd   : > { %v5907_v54 = vadd.f32 %v5906_v42, %v5905_v35  ;;  %v5803_v0 = vpop.f32.mrf.mxu1 }
 0x2fe   : > { %v5908_v41 = vpop.f32.mrf.mxu0  ;;  %v5804_v12 = vadd.f32 %v5803_v0, %v5802_v1 }
 0x2ff   : > { %v9055_v59 = vadd.f32 %v5907_v54, %v4181_v9  ;;  %v5805_v11 = vpop.f32.mrf.mxu1 }
 0x300   : > { %v5909_v29 = vpop.f32.mrf.mxu0  ;;  %v4192_v5 = vadd.f32 %v5804_v12, %v9004_v3 }
 0x301   : > { %10052 = vst [vmem:[#allocation17_spill] sm:$0xff] %v9055_v59  ;;  %v5910_v21 = vadd.f32 %v5909_v29, %v5908_v41  ;;  %v5806_v10 = vpop.f32.mrf.mxu1 }
 0x302   : > { %v5911_v20 = vpop.f32.mrf.mxu0  ;;  %v5807_v44 = vadd.f32 %v5806_v10, %v5805_v11 }
 0x303   : > { %v9058_v63 = vadd.f32 %v5910_v21, %v4184_v61  ;;  %v5808_v52 = vpop.f32.mrf.mxu1 }
 0x304   : > { %v5912_v2 = vpop.f32.mrf.mxu0  ;;  %v4197_v7 = vadd.f32 %v5807_v44, %v9004_v3 }
 0x305   : > { %10053 = vst [vmem:[#allocation20_spill] sm:$0xff] %v9058_v63  ;;  %v5913_v56 = vadd.f32 %v5912_v2, %v5911_v20  ;;  %v5809_v46 = vpop.f32.mrf.mxu1 }
 0x306   : > { %v5914_v13 = vpop.f32.mrf.mxu0  ;;  %v5810_v14 = vadd.f32 %v5809_v46, %v5808_v52 }
 0x307   : > { %v9061_v4 = vadd.f32 %v5913_v56, %v4189_v34  ;;  %v5811_v18 = vpop.f32.mrf.mxu1 }
 0x308   : > { %v5915_v15 = vpop.f32.mrf.mxu0  ;;  %v4200_v48 = vadd.f32 %v5810_v14, %v9004_v3 }
 0x309   : > { %10054 = vst [vmem:[#allocation18_spill] sm:$0xff] %v9061_v4  ;;  %v5916_v62 = vadd.f32 %v5915_v15, %v5914_v13  ;;  %v5812_v27 = vpop.f32.mrf.mxu1 }
 0x30a   : > { %v5917_v58 = vpop.f32.mrf.mxu0  ;;  %v5813_v60 = vadd.f32 %v5812_v27, %v5811_v18 }
 0x30b   : > { %v9064_v22 = vadd.f32 %v5916_v62, %v4192_v5  ;;  %v5814_v39 = vpop.f32.mrf.mxu1 }
 0x30c   : > { %v5918_v47 = vpop.f32.mrf.mxu0 }
 0x30d   : > { %10055 = vst [vmem:[#allocation13_spill] sm:$0xff] %v9064_v22  ;;  %v5919_v24 = vadd.f32 %v5918_v47, %v5917_v58  ;;  %v5815_v28 = vpop.f32.mrf.mxu1 }
 0x30e   : > { %v5920_v55 = vpop.f32.mrf.mxu0  ;;  %v5816_v6 = vadd.f32 %v5815_v28, %v5814_v39 }
 0x30f   : > { %v9067_v51 = vadd.f32 %v5919_v24, %v4197_v7  ;;  %v5817_v32 = vpop.f32.mrf.mxu1 }
 0x310   : > { %v5921_v16 = vpop.f32.mrf.mxu0 }
 0x311   : > { %10056 = vst [vmem:[#allocation12_spill] sm:$0xff] %v9067_v51  ;;  %v5922_v53 = vadd.f32 %v5921_v16, %v5920_v55  ;;  %v5818_v26 = vpop.f32.mrf.mxu1 }
 0x312   : > { %v5923_v35 = vpop.f32.mrf.mxu0  ;;  %v5819_v36 = vadd.f32 %v5818_v26, %v5817_v32 }
 0x313   : > { %v9070_v1 = vadd.f32 %v5922_v53, %v4200_v48  ;;  %v5820_v42 = vpop.f32.mrf.mxu1 }
 0x314   : > { %v5924_v9 = vpop.f32.mrf.mxu0 }
 0x315   : > { %10057 = vst [vmem:[#allocation6_spill] sm:$0xff] %v9070_v1  ;;  %v5821_v54 = vpop.f32.mrf.mxu1  ;;  %v5925_v32 = vadd.f32 %v5924_v9, %v5923_v35  ;;  %v4213_v35 = vadd.f32 %v5819_v36, %v9004_v3 }
 0x316   : > { %v5926_v0 = vpop.f32.mrf.mxu0  ;;  %v5822_v41 = vadd.f32 %v5821_v54, %v5820_v42  ;;  %v4205_v42 = vadd.f32 %v5813_v60, %v9004_v3  ;;  %v4208_v54 = vadd.f32 %v5816_v6, %v9004_v3 }
 0x317   : > { %v5823_v12 = vpop.f32.mrf.mxu1 }
 0x318   : > { %v5927_v11 = vpop.f32.mrf.mxu0  ;;  %v4216_v9 = vadd.f32 %v5822_v41, %v9004_v3 }
 0x319   : > { %v5824_v29 = vpop.f32.mrf.mxu1  ;;  %v5928_v53 = vadd.f32 %v5927_v11, %v5926_v0 }
 0x31a   : > { %v5929_v61 = vpop.f32.mrf.mxu0  ;;  %v5825_v1 = vadd.f32 %v5824_v29, %v5823_v12 }
 0x31b   : > { %v5826_v21 = vpop.f32.mrf.mxu1  ;;  %v9092_v29 = vadd.f32 %v5928_v53, %v4208_v54 }
 0x31c   : > { %v5930_v10 = vpop.f32.mrf.mxu0 }
 0x31d   : > { %v5827_v20 = vpop.f32.mrf.mxu1  ;;  %v5931_v22 = vadd.f32 %v5930_v10, %v5929_v61  ;;  %v4221_v61 = vadd.f32 %v5825_v1, %v9004_v3 }
 0x31e   : > { %v5932_v44 = vpop.f32.mrf.mxu0  ;;  %v5828_v60 = vadd.f32 %v5827_v20, %v5826_v21 }
 0x31f   : > { %v5829_v52 = vpop.f32.mrf.mxu1  ;;  %v9097_v21 = vadd.f32 %v5931_v22, %v4213_v35 }
 0x320   : > { %v5933_v2 = vpop.f32.mrf.mxu0  ;;  %v4224_v1 = vadd.f32 %v5828_v60, %v9004_v3 }
 0x321   : > { %v5830_v34 = vpop.f32.mrf.mxu1 }
 0x322   : > { %v5935_v56 = vpop.f32.mrf.mxu0  ;;  %v5831_v10 = vadd.f32 %v5830_v34, %v5829_v52 }
 0x323   : > { %v5832_v46 = vpop.f32.mrf.mxu1 }
 0x324   : > { %v5936_v13 = vpop.f32.mrf.mxu0  ;;  %v4229_v34 = vadd.f32 %v5831_v10, %v9004_v3 }
 0x325   : > { %v5833_v14 = vpop.f32.mrf.mxu1 }
 0x326   : > { %v5938_v18 = vpop.f32.mrf.mxu0 }
 0x328   : > { %v5939_v5 = vpop.f32.mrf.mxu0 }
 0x32d   : > { %v5835_v15 = vpop.f32.mrf.mxu1 }
 0x32f   : > { %v5836_v62 = vpop.f32.mrf.mxu1 }
 0x330   : > { %v5941_v27 = vpop.f32.mrf.mxu0 }
 0x331   : > { %v5838_v58 = vpop.f32.mrf.mxu1 }
 0x332   : > { %v5942_v39 = vpop.f32.mrf.mxu0 }
 0x333   : > { %v5839_v47 = vpop.f32.mrf.mxu1  ;;  %v5943_v20 = vadd.f32 %v5942_v39, %v5941_v27 }
 0x334   : > { %v9072_v7 = vpop.f32.mrf.mxu0 }
 0x335   : > { %v6025_v24 = vpop.f32.mrf.mxu1  ;;  %v9114_v39 = vadd.f32 %v5943_v20, %v4229_v34 }
 0x336   : > { %v9074_v28 = vpop.f32.mrf.mxu0  ;;  %v4463_v55 = vadd.f32 %v6025_v24, %v9025_v30 }
 0x337   : > { %v4454_v16 = vpop.f32.mrf.mxu1 }
 0x338   : > { %v9077_v48 = vpop.f32.mrf.mxu0  ;;  %v4455_v26 = vadd.f32 %v4454_v16, %v9017_v31  ;;  %v4571_v59 = vmax.f32 %v4463_v55, 0.0  ;;  %v9089_v31 = vadd.f32 %v5925_v32, %v4205_v42 }
 0x339   : > { %v6026_v51 = vpop.f32.mrf.mxu1 }
 0x33a   : > { %v9082_v63 = vpop.f32.mrf.mxu0  ;;  %v4569_v4 = vmax.f32 %v4455_v26, 0.0  ;;  %v4466_v30 = vadd.f32 %v6026_v51, %v9028_v57  ;;  %v5934_v57 = vadd.f32 %v5933_v2, %v5932_v44  ;;  %v5937_v51 = vadd.f32 %v5936_v13, %v5935_v56 }
 0x33b   : > { %v4457_v0 = vpop.f32.mrf.mxu1  ;;  %v5840_v56 = vadd.f32 %v5839_v47, %v5838_v58 }
 0x33c   : > { %v9087_v11 = vpop.f32.mrf.mxu0  ;;  %v4599_v6 = vadd.f32 %v4571_v59, %v4569_v4  ;;  %v4458_v12 = vadd.f32 %v4457_v0, %v9022_v19  ;;  %v4572_v41 = vmax.f32 %v4466_v30, 0.0  ;;  %v5834_v59 = vadd.f32 %v5833_v14, %v5832_v46 }
 0x33d   : > { %v6029_v36 = vpop.f32.mrf.mxu1  ;;  %v5837_v19 = vadd.f32 %v5836_v62, %v5835_v15  ;;  %v5940_v4 = vadd.f32 %v5939_v5, %v5938_v18  ;;  %v9103_v22 = vadd.f32 %v5937_v51, %v4221_v61  ;;  %v9105_v46 = vadd.f32 %v5934_v57, %v4216_v9 }
 0x33e   : > { %v5951_v24 = vpop.f32.mrf.mxu0  ;;  %4615 = vst.msk [vmem:[#allocation3 + $0x10] sm:$0xff] %vm3482_vm14, %v4599_v6  ;;  %v4570_v55 = vmax.f32 %v4458_v12, 0.0  ;;  %v4479_v32 = vadd.f32 %v6029_v36, %v9037_v37  ;;  %v4240_v30 = vadd.f32 %v5840_v56, %v9004_v3 }
 0x33f   : > { %v4470_v16 = vpop.f32.mrf.mxu1  ;;  %v9112_v58 = vadd.f32 %v5940_v4, %v4224_v1 }
 0x340   : > { %v6021_v53 = vpop.f32.mrf.mxu0  ;;  %v4600_v44 = vadd.f32 %v4572_v41, %v4570_v55  ;;  %v4471_v52 = vadd.f32 %v4470_v16, %v9031_v43  ;;  %v4575_v14 = vmax.f32 %v4479_v32, 0.0  ;;  %v4232_v43 = vadd.f32 %v5834_v59, %v9004_v3 }
 0x341   : > { %v4447_v2 = vadd.f32 %v6021_v53, %v9007_v8  ;;  %v6030_v13 = vpop.f32.mrf.mxu1  ;;  %v4237_v8 = vadd.f32 %v5837_v19, %v9004_v3  ;;  %v5949_v3 = vadd.f32 %v9082_v63, %v9077_v48 }
 0x342   : > { %v4438_v37 = vpop.f32.mrf.mxu0  ;;  %4616 = vst.msk [vmem:[#allocation3 + $0x18] sm:$0xff] %vm3482_vm14, %v4600_v44  ;;  %v4573_v18 = vmax.f32 %v4471_v52, 0.0  ;;  %v4482_v15 = vadd.f32 %v6030_v13, %v9040_v45 }
 0x343   : > { %v4439_v5 = vadd.f32 %v4438_v37, %v9012_v25  ;;  %v4473_v62 = vpop.f32.mrf.mxu1  ;;  %v4567_v42 = vmax.f32 %v4447_v2, 0.0  ;;  %v5946_v25 = vadd.f32 %v9074_v28, %v9072_v7  ;;  %v9136_v1 = vadd.f32 %v5949_v3, %v4237_v8  ;;  %v10058_v8 = vld [vmem:[#allocation18_spill] sm:$0xff] }
 0x344   : > { %v6022_v27 = vpop.f32.mrf.mxu0  ;;  %v4601_v47 = vadd.f32 %v4575_v14, %v4573_v18  ;;  %v4474_v26 = vadd.f32 %v4473_v62, %v9034_v23  ;;  %v4576_v45 = vmax.f32 %v4482_v15, 0.0 }
 0x345   : > { %v4565_v54 = vmax.f32 %v4439_v5, 0.0  ;;  %v6033_v35 = vpop.f32.mrf.mxu1  ;;  %v4450_v9 = vadd.f32 %v6022_v27, %v9014_v40  ;;  %v4823_v60 = vld [vmem:[#allocation3 + $0x16] sm:$0x3]  ;;  %v4695_v6 = vld [vmem:[#allocation3 + $0x12] sm:$0x3] }
 0x346   : > { %v4441_v0 = vpop.f32.mrf.mxu0  ;;  %4617 = vst.msk [vmem:[#allocation3 + $0x20] sm:$0xff] %vm3482_vm14, %v4601_v47  ;;  %v4574_v12 = vmax.f32 %v4474_v26, 0.0  ;;  %v4495_v61 = vadd.f32 %v6033_v35, %v9049_v50  ;;  %v4837_v28 = vsel %vm4637_vm15, %v4823_v60, 0.0  ;;  %v4709_v40 = vsel %vm4637_vm15, %v4695_v6, 0.0 }
 0x347   : > { %v4597_v23 = vadd.f32 %v4567_v42, %v4565_v54  ;;  %v4442_v10 = vadd.f32 %v4441_v0, %v9020_v17  ;;  %v4486_v57 = vpop.f32.mrf.mxu1  ;;  %v4568_v7 = vmax.f32 %v4450_v9, 0.0  ;;  %v5952_v50 = vadd.f32 %v5951_v24, %v9087_v11  ;;  %v10059_v0 = vld [vmem:[#allocation17_spill] sm:$0xff] }
 0x348   : > { %v4602_v51 = vadd.f32 %v4576_v45, %v4574_v12  ;;  %v4579_v36 = vmax.f32 %v4495_v61, 0.0  ;;  %v4487_v41 = vadd.f32 %v4486_v57, %v9043_v33  ;;  %v9131_v17 = vadd.f32 %v5946_v25, %v4232_v43 }
 0x349   : > { %4613 = vst.msk [vmem:[#allocation3] sm:$0xff] %vm3482_vm14, %v4597_v23  ;;  %v4566_v55 = vmax.f32 %v4442_v10, 0.0  ;;  %v6034_v32 = vpop.f32.mrf.mxu1  ;;  %v4838_v59 = vrot.slane %v4837_v28, 4  ;;  %v4710_v63 = vrot.slane %v4709_v40, 4  ;;  %v5079_v48 = vld [vmem:[#allocation3 + $0x1e] sm:$0x3] }
 0x34a   : > { %v4951_v19 = vld [vmem:[#allocation3 + $0x1a] sm:$0x3]  ;;  %4618 = vst.msk [vmem:[#allocation3 + $0x28] sm:$0xff] %vm3482_vm14, %v4602_v51  ;;  %v4577_v4 = vmax.f32 %v4487_v41, 0.0  ;;  %v4498_v20 = vadd.f32 %v6034_v32, %v9052_v38  ;;  %v5093_v33 = vsel %vm4637_vm15, %v5079_v48, 0.0  ;;  %v9143_v38 = vadd.f32 %v5952_v50, %v4240_v30  ;;  %v10061_v48 = vld [vmem:[#allocation20_spill] sm:$0xff] }
 0x34b   : > { %v4598_v16 = vadd.f32 %v4568_v7, %v4566_v55  ;;  %v4489_v53 = vpop.f32.mrf.mxu1  ;;  %v4839_v44 = vadd.f32 %v4838_v59, %v4837_v28  ;;  %v4711_v11 = vadd.f32 %v4710_v63, %v4709_v40  ;;  %v5094_v24 = vrot.slane %v5093_v33, 4  ;;  %v10060_v7 = vld [vmem:[#allocation13_spill] sm:$0xff] }
 0x34c   : > { %v4603_v52 = vadd.f32 %v4579_v36, %v4577_v4  ;;  %v4580_v2 = vmax.f32 %v4498_v20, 0.0  ;;  %v4490_v34 = vadd.f32 %v4489_v53, %v9046_v49  ;;  %v9141_v56 = vsel %vm4637_vm15, %v4951_v19, 0.0 }
 0x34d   : > { %4614 = vst.msk [vmem:[#allocation3 + $0x8] sm:$0xff] %vm3482_vm14, %v4598_v16  ;;  %v6037_v13 = vpop.f32.mrf.mxu1  ;;  %v4824_v37 = vld [vmem:[#allocation3 + $0x26] sm:$0x3]  ;;  %v4840_v14 = vrot.slane %v4839_v44, 2  ;;  %v4696_v18 = vld [vmem:[#allocation3 + $0x22] sm:$0x3]  ;;  %v9145_v5 = vadd.f32 %v5094_v24, %v5093_v33 }
 0x34e   : > { %v4712_v15 = vrot.slane %v4711_v11, 2  ;;  %4619 = vst.msk [vmem:[#allocation3 + $0x30] sm:$0xff] %vm3482_vm14, %v4603_v52  ;;  %v4578_v43 = vmax.f32 %v4490_v34, 0.0  ;;  %v4511_v62 = vadd.f32 %v6037_v13, %v10058_v8  ;;  %v4844_v49 = vsel %vm4637_vm15, %v4824_v37, 0.0 }
 0x34f   : > { %v4716_v27 = vsel %vm4637_vm15, %v4696_v18, 0.0  ;;  %v4502_v47 = vpop.f32.mrf.mxu1  ;;  %v4841_v42 = vadd.f32 %v4840_v14, %v4839_v44  ;;  %v4845_v54 = vrot.slane %v4844_v49, 4 }
 0x350   : > { %v4822_v26 = vld [vmem:[#allocation3 + $0x6] sm:$0x3]  ;;  %v4694_v30 = vld [vmem:[#allocation3 + $0x2] sm:$0x3]  ;;  %v4713_v25 = vadd.f32 %v4712_v15, %v4711_v11  ;;  %v4717_v45 = vrot.slane %v4716_v27, 4  ;;  %v4604_v35 = vadd.f32 %v4580_v2, %v4578_v43  ;;  %v4583_v9 = vmax.f32 %v4511_v62, 0.0 }
 0x351   : > { %v4503_v60 = vadd.f32 %v4502_v47, %v10059_v0  ;;  %v4830_v6 = vsel %vm4637_vm15, %v4822_v26, 0.0  ;;  %v6038_v12 = vpop.f32.mrf.mxu1  ;;  %v4842_v23 = vrot.slane %v4841_v42, 1  ;;  %v4846_v10 = vadd.f32 %v4845_v54, %v4844_v49  ;;  %v10062_v49 = vld [vmem:[#allocation12_spill] sm:$0xff] }
 0x352   : > { %v4831_v61 = vrot.slane %v4830_v6, 4  ;;  %v4702_v3 = vsel %vm4637_vm15, %v4694_v30, 0.0  ;;  %4620 = vst.msk [vmem:[#allocation3 + $0x38] sm:$0xff] %vm3482_vm14, %v4604_v35  ;;  %v4514_v28 = vadd.f32 %v6038_v12, %v10060_v7  ;;  %v4714_v51 = vrot.slane %v4713_v25, 1 }
 0x353   : > { %v4581_v57 = vmax.f32 %v4503_v60, 0.0  ;;  %v4703_v40 = vrot.slane %v4702_v3, 4  ;;  %v4505_v36 = vpop.f32.mrf.mxu1  ;;  %v4843_v55 = vadd.f32 %v4842_v23, %v4841_v42  ;;  %v4847_v50 = vrot.slane %v4846_v10, 2 }
 0x354   : > { %v4832_v41 = vadd.f32 %v4831_v61, %v4830_v6  ;;  %v4718_v32 = vadd.f32 %v4717_v45, %v4716_v27  ;;  %v4584_v63 = vmax.f32 %v4514_v28, 0.0  ;;  %v4506_v19 = vadd.f32 %v4505_v36, %v10061_v48  ;;  %v5078_v0 = vld [vmem:[#allocation3 + $0xe] sm:$0x3] }
 0x355   : > { %v4605_v59 = vadd.f32 %v4583_v9, %v4581_v57  ;;  %v4704_v4 = vadd.f32 %v4703_v40, %v4702_v3  ;;  %v6041_v20 = vpop.f32.mrf.mxu1  ;;  %v4825_v16 = vld [vmem:[#allocation3 + $0x36] sm:$0x3]  ;;  %v4848_v53 = vadd.f32 %v4847_v50, %v4846_v10  ;;  %v9157_v44 = vadd.f32 %v4714_v51, %v4713_v25  ;;  %v4697_v15 = vld [vmem:[#allocation3 + $0x32] sm:$0x3] }
 0x356   : > { %v4833_v33 = vrot.slane %v4832_v41, 2  ;;  %v4719_v11 = vrot.slane %v4718_v32, 2  ;;  %v4582_v24 = vmax.f32 %v4506_v19, 0.0  ;;  %v4527_v52 = vadd.f32 %v6041_v20, %v9089_v31  ;;  %v10063_v57 = vld [vmem:[#allocation6_spill] sm:$0xff] }
 0x357   : > { %4621 = vst.msk [vmem:[#allocation3 + $0x40] sm:$0xff] %vm3482_vm14, %v4605_v59  ;;  %v4851_v2 = vsel %vm4637_vm15, %v4825_v16, 0.0  ;;  %v4705_v34 = vrot.slane %v4704_v4, 2  ;;  %v4518_v13 = vpop.f32.mrf.mxu1  ;;  %v4849_v14 = vrot.slane %v4848_v53, 1  ;;  %v4723_v9 = vsel %vm4637_vm15, %v4697_v15, 0.0 }
 0x358   : > { %v4834_v37 = vadd.f32 %v4833_v33, %v4832_v41  ;;  %v4852_v18 = vrot.slane %v4851_v2, 4  ;;  %v4720_v43 = vadd.f32 %v4719_v11, %v4718_v32  ;;  %v4606_v8 = vadd.f32 %v4584_v63, %v4582_v24 }
 0x359   : > { %v4587_v62 = vmax.f32 %v4527_v52, 0.0  ;;  %v4519_v27 = vadd.f32 %v4518_v13, %v10062_v49  ;;  %v4706_v47 = vadd.f32 %v4705_v34, %v4704_v4  ;;  %v6042_v26 = vpop.f32.mrf.mxu1  ;;  %v4850_v54 = vadd.f32 %v4849_v14, %v4848_v53 }
 0x35a   : > { %v4835_v42 = vrot.slane %v4834_v37, 1  ;;  %v4853_v30 = vadd.f32 %v4852_v18, %v4851_v2  ;;  %v4721_v31 = vrot.slane %v4720_v43, 1  ;;  %4622 = vst.msk [vmem:[#allocation3 + $0x48] sm:$0xff] %vm3482_vm14, %v4606_v8  ;;  %v4530_v45 = vadd.f32 %v6042_v26, %v9092_v29 }
 0x35b   : > { %v4585_v25 = vmax.f32 %v4519_v27, 0.0  ;;  %v4707_v35 = vrot.slane %v4706_v47, 1  ;;  %v4521_v60 = vpop.f32.mrf.mxu1  ;;  %v4724_v23 = vrot.slane %v4723_v9, 4  ;;  %v5086_v32 = vsel %vm4637_vm15, %v5078_v0, 0.0 }
 0x35c   : > { %v4836_v6 = vadd.f32 %v4835_v42, %v4834_v37  ;;  %v4854_v12 = vrot.slane %v4853_v30, 2  ;;  %v4722_v61 = vadd.f32 %v4721_v31, %v4720_v43  ;;  %v4588_v3 = vmax.f32 %v4530_v45, 0.0 }
 0x35d   : > { %v4607_v10 = vadd.f32 %v4587_v62, %v4585_v25  ;;  %v4522_v7 = vadd.f32 %v4521_v60, %v10063_v57  ;;  %v4708_v28 = vadd.f32 %v4707_v35, %v4706_v47  ;;  %v6045_v40 = vpop.f32.mrf.mxu1  ;;  %v4725_v50 = vadd.f32 %v4724_v23, %v4723_v9 }
 0x35e   : > { %v4826_v51 = vld [vmem:[#allocation3 + $0x46] sm:$0x3]  ;;  %v4855_v36 = vadd.f32 %v4854_v12, %v4853_v30  ;;  %v5207_v41 = vsel %vm5150_vm0, %v4843_v55, %v4836_v6  ;;  %v4698_v29 = vld [vmem:[#allocation3 + $0x42] sm:$0x3]  ;;  %v4543_v63 = vadd.f32 %v6045_v40, %v9103_v22  ;;  %v5087_v27 = vrot.slane %v5086_v32, 4 }
 0x35f   : > { %4623 = vst.msk [vmem:[#allocation3 + $0x50] sm:$0xff] %vm3482_vm14, %v4607_v10  ;;  %v4586_v59 = vmax.f32 %v4522_v7, 0.0  ;;  %v4858_v48 = vsel %vm4637_vm15, %v4826_v51, 0.0  ;;  %v5208_v19 = vsel %vm5152_vm1, %v4850_v54, %v5207_v41  ;;  %v4534_v4 = vpop.f32.mrf.mxu1  ;;  %v4726_v33 = vrot.slane %v4725_v50, 2 }
 0x360   : > { %v4856_v20 = vrot.slane %v4855_v36, 1  ;;  %v4859_v16 = vrot.slane %v4858_v48, 4  ;;  %v4730_v53 = vsel %vm4637_vm15, %v4698_v29, 0.0  ;;  %v4591_v11 = vmax.f32 %v4543_v63, 0.0 }
 0x361   : > { %v4608_v55 = vadd.f32 %v4588_v3, %v4586_v59  ;;  %v4535_v24 = vadd.f32 %v4534_v4, %v9097_v21  ;;  %v4731_v52 = vrot.slane %v4730_v53, 4  ;;  %v6046_v2 = vpop.f32.mrf.mxu1  ;;  %v4727_v22 = vadd.f32 %v4726_v33, %v4725_v50 }
 0x362   : > { %v4857_v34 = vadd.f32 %v4856_v20, %v4855_v36  ;;  %v4860_v13 = vadd.f32 %v4859_v16, %v4858_v48  ;;  %v5173_v37 = vsel %vm5150_vm0, %v9157_v44, %v4708_v28  ;;  %v4546_v18 = vadd.f32 %v6046_v2, %v9112_v58 }
 0x363   : > { %4624 = vst.msk [vmem:[#allocation3 + $0x58] sm:$0xff] %vm3482_vm14, %v4608_v55  ;;  %v4589_v14 = vmax.f32 %v4535_v24, 0.0  ;;  %v4732_v15 = vadd.f32 %v4731_v52, %v4730_v53  ;;  %v5174_v43 = vsel %vm5152_vm1, %v4722_v61, %v5173_v37  ;;  %v4537_v8 = vpop.f32.mrf.mxu1  ;;  %v4728_v49 = vrot.slane %v4727_v22, 1  ;;  %v5080_v55 = vld [vmem:[#allocation3 + $0x2e] sm:$0x3] }
 0x364   : > { %v4861_v62 = vrot.slane %v4860_v13, 2  ;;  %v5209_v21 = vsel %vm5154_vm2, %v4857_v34, %v5208_v19  ;;  %v4592_v26 = vmax.f32 %v4546_v18, 0.0  ;;  %v4538_v42 = vadd.f32 %v4537_v8, %v9105_v46 }
 0x365   : > { %v4609_v47 = vadd.f32 %v4591_v11, %v4589_v14  ;;  %v4733_v54 = vrot.slane %v4732_v15, 2  ;;  %v6049_v44 = vpop.f32.mrf.mxu1  ;;  %v4729_v45 = vadd.f32 %v4728_v49, %v4727_v22  ;;  %v5088_v58 = vadd.f32 %v5087_v27, %v5086_v32  ;;  %v5082_v14 = vld [vmem:[#allocation3 + $0x4e] sm:$0x3] }
 0x366   : > { %v4827_v30 = vld [vmem:[#allocation3 + $0x56] sm:$0x3]  ;;  %v4862_v31 = vadd.f32 %v4861_v62, %v4860_v13  ;;  %v4699_v25 = vld [vmem:[#allocation3 + $0x52] sm:$0x3]  ;;  %v5096_v35 = vrot.slane %v9145_v5, 2  ;;  %v4590_v9 = vmax.f32 %v4538_v42, 0.0  ;;  %v4559_v0 = vadd.f32 %v6049_v44, %v9136_v1 }
 0x367   : > { %4625 = vst.msk [vmem:[#allocation3 + $0x60] sm:$0xff] %vm3482_vm14, %v4609_v47  ;;  %v4865_v60 = vsel %vm4637_vm15, %v4827_v30, 0.0  ;;  %v4734_v6 = vadd.f32 %v4733_v54, %v4732_v15  ;;  %v4550_v12 = vpop.f32.mrf.mxu1  ;;  %v4737_v23 = vsel %vm4637_vm15, %v4699_v25, 0.0  ;;  %v5175_v10 = vsel %vm5154_vm2, %v4729_v45, %v5174_v43 }
 0x368   : > { %v4863_v61 = vrot.slane %v4862_v31, 1  ;;  %v4866_v46 = vrot.slane %v4865_v60, 4  ;;  %v4610_v3 = vadd.f32 %v4592_v26, %v4590_v9  ;;  %v4595_v57 = vmax.f32 %v4559_v0, 0.0 }
 0x369   : > { %v4551_v7 = vadd.f32 %v4550_v12, %v9114_v39  ;;  %v4735_v28 = vrot.slane %v4734_v6, 1  ;;  %v6050_v40 = vpop.f32.mrf.mxu1  ;;  %v4738_v41 = vrot.slane %v4737_v23, 4  ;;  %v5089_v1 = vrot.slane %v5088_v58, 2 }
 0x36a   : > { %v4864_v51 = vadd.f32 %v4863_v61, %v4862_v31  ;;  %v4867_v36 = vadd.f32 %v4866_v46, %v4865_v60  ;;  %4626 = vst.msk [vmem:[#allocation3 + $0x68] sm:$0xff] %vm3482_vm14, %v4610_v3  ;;  %v4562_v50 = vadd.f32 %v6050_v40, %v9143_v38  ;;  %v5097_v59 = vadd.f32 %v5096_v35, %v9145_v5  ;;  %v5081_v5 = vld [vmem:[#allocation3 + $0x3e] sm:$0x3] }
 0x36b   : > { %v4593_v29 = vmax.f32 %v4551_v7, 0.0  ;;  %v4736_v32 = vadd.f32 %v4735_v28, %v4734_v6  ;;  %v4553_v63 = vpop.f32.mrf.mxu1  ;;  %v4739_v19 = vadd.f32 %v4738_v41, %v4737_v23  ;;  %v5090_v4 = vadd.f32 %v5089_v1, %v5088_v58  ;;  %v5083_v62 = vld [vmem:[#allocation3 + $0x5e] sm:$0x3] }
 0x36c   : > { %v4868_v48 = vrot.slane %v4867_v36, 2  ;;  %v4966_v39 = vrot.slane %v9141_v56, 4  ;;  %v4596_v16 = vmax.f32 %v4562_v50, 0.0  ;;  %v4554_v33 = vadd.f32 %v4553_v63, %v9131_v17 }
 0x36d   : > { %v4611_v20 = vadd.f32 %v4595_v57, %v4593_v29  ;;  %v5210_v53 = vsel %vm5156_vm3, %v4864_v51, %v5209_v21  ;;  %v4740_v52 = vrot.slane %v4739_v19, 2  ;;  %v5176_v2 = vsel %vm5156_vm3, %v4736_v32, %v5175_v10 }
 0x36e   : > { %v4828_v11 = vld [vmem:[#allocation3 + $0x66] sm:$0x3]  ;;  %v4869_v24 = vadd.f32 %v4868_v48, %v4867_v36  ;;  %v4700_v38 = vld [vmem:[#allocation3 + $0x62] sm:$0x3]  ;;  %v5091_v34 = vrot.slane %v5090_v4, 1  ;;  %v4594_v13 = vmax.f32 %v4554_v33, 0.0  ;;  %v9203_v47 = vadd.f32 %v4966_v39, %v9141_v56 }
 0x36f   : > { %4627 = vst.msk [vmem:[#allocation3 + $0x70] sm:$0xff] %vm3482_vm14, %v4611_v20  ;;  %v4872_v22 = vsel %vm4637_vm15, %v4828_v11, 0.0  ;;  %v4744_v37 = vsel %vm4637_vm15, %v4700_v38, 0.0  ;;  %v5098_v17 = vrot.slane %v5097_v59, 1  ;;  %v4741_v43 = vadd.f32 %v4740_v52, %v4739_v19 }
 0x370   : > { %v4870_v18 = vrot.slane %v4869_v24, 1  ;;  %v4873_v15 = vrot.slane %v4872_v22, 4  ;;  %v4745_v8 = vrot.slane %v4744_v37, 4  ;;  %v4612_v21 = vadd.f32 %v4596_v16, %v4594_v13 }
 0x371   : > { %v9199_v49 = vadd.f32 %v5091_v34, %v5090_v4  ;;  %v5100_v27 = vsel %vm4637_vm15, %v5080_v55, 0.0  ;;  %v4742_v54 = vrot.slane %v4741_v43, 1  ;;  %v5107_v31 = vsel %vm4637_vm15, %v5081_v5, 0.0  ;;  %v5084_v40 = vld [vmem:[#allocation3 + $0x6e] sm:$0x3] }
 0x372   : > { %v4871_v26 = vadd.f32 %v4870_v18, %v4869_v24  ;;  %v4874_v42 = vadd.f32 %v4873_v15, %v4872_v22  ;;  %v4746_v44 = vadd.f32 %v4745_v8, %v4744_v37  ;;  %4628 = vst.msk [vmem:[#allocation3 + $0x78] sm:$0xff] %vm3482_vm14, %v4612_v21  ;;  %v5101_v30 = vrot.slane %v5100_v27, 4 }
 0x373   : > { %v5114_v25 = vsel %vm4637_vm15, %v5082_v14, 0.0  ;;  %v5121_v45 = vsel %vm4637_vm15, %v5083_v62, 0.0  ;;  %v4743_v35 = vadd.f32 %v4742_v54, %v4741_v43  ;;  %v5099_v0 = vadd.f32 %v5098_v17, %v5097_v59  ;;  %v4950_v54 = vld [vmem:[#allocation3 + $0xa] sm:$0x3] }
 0x374   : > { %v4875_v58 = vrot.slane %v4874_v42, 2  ;;  %v4747_v9 = vrot.slane %v4746_v44, 2  ;;  %v5102_v60 = vadd.f32 %v5101_v30, %v5100_v27  ;;  %v5108_v56 = vrot.slane %v5107_v31, 4 }
 0x375   : > { %v5115_v6 = vrot.slane %v5114_v25, 4  ;;  %v5122_v12 = vrot.slane %v5121_v45, 4  ;;  %v5211_v23 = vsel %vm5158_vm4, %v4871_v26, %v5210_v53  ;;  %v5177_v57 = vsel %vm5158_vm4, %v4743_v35, %v5176_v2 }
 0x376   : > { %v4829_v61 = vld [vmem:[#allocation3 + $0x76] sm:$0x3]  ;;  %v4876_v46 = vadd.f32 %v4875_v58, %v4874_v42  ;;  %v4701_v10 = vld [vmem:[#allocation3 + $0x72] sm:$0x3]  ;;  %v4748_v3 = vadd.f32 %v4747_v9, %v4746_v44  ;;  %v5103_v51 = vrot.slane %v5102_v60, 2  ;;  %v5109_v36 = vadd.f32 %v5108_v56, %v5107_v31 }
 0x377   : > { %v4879_v7 = vsel %vm4637_vm15, %v4829_v61, 0.0  ;;  %v4751_v28 = vsel %vm4637_vm15, %v4701_v10, 0.0  ;;  %v5116_v63 = vadd.f32 %v5115_v6, %v5114_v25  ;;  %v5123_v48 = vadd.f32 %v5122_v12, %v5121_v45  ;;  %v4953_v56 = vld [vmem:[#allocation3 + $0x3a] sm:$0x3]  ;;  %v4954_v61 = vld [vmem:[#allocation3 + $0x4a] sm:$0x3] }
 0x378   : > { %v4877_v41 = vrot.slane %v4876_v46, 1  ;;  %v4880_v1 = vrot.slane %v4879_v7, 4  ;;  %v4749_v29 = vrot.slane %v4748_v3, 1  ;;  %v4752_v50 = vrot.slane %v4751_v28, 4 }
 0x379   : > { %v5104_v32 = vadd.f32 %v5103_v51, %v5102_v60  ;;  %v5110_v59 = vrot.slane %v5109_v36, 2  ;;  %v5128_v20 = vsel %vm4637_vm15, %v5084_v40, 0.0  ;;  %v5085_v16 = vld [vmem:[#allocation3 + $0x7e] sm:$0x3]  ;;  %v5117_v55 = vrot.slane %v5116_v63, 2 }
 0x37a   : > { %v4878_v19 = vadd.f32 %v4877_v41, %v4876_v46  ;;  %v4881_v4 = vadd.f32 %v4880_v1, %v4879_v7  ;;  %v4753_v39 = vadd.f32 %v4752_v50, %v4751_v28  ;;  %v5124_v11 = vrot.slane %v5123_v48, 2  ;;  %v4952_v60 = vld [vmem:[#allocation3 + $0x2a] sm:$0x3]  ;;  %v4955_v7 = vld [vmem:[#allocation3 + $0x5a] sm:$0x3] }
 0x37b   : > { %v5105_v33 = vrot.slane %v5104_v32, 1  ;;  %v5111_v53 = vadd.f32 %v5110_v59, %v5109_v36  ;;  %v4750_v52 = vadd.f32 %v4749_v29, %v4748_v3  ;;  %v5118_v13 = vadd.f32 %v5117_v55, %v5116_v63 }
 0x37c   : > { %v4882_v24 = vrot.slane %v4881_v4, 2  ;;  %v5212_v38 = vsel %vm5160_vm5, %v4878_v19, %v5211_v23  ;;  %v4754_v2 = vrot.slane %v4753_v39, 2  ;;  %v5125_v22 = vadd.f32 %v5124_v11, %v5123_v48  ;;  %v4956_v19 = vld [vmem:[#allocation3 + $0x6a] sm:$0x3]  ;;  %v4957_v11 = vld [vmem:[#allocation3 + $0x7a] sm:$0x3] }
 0x37d   : > { %v5106_v5 = vadd.f32 %v5105_v33, %v5104_v32  ;;  %v5112_v34 = vrot.slane %v5111_v53, 1  ;;  %v5129_v17 = vrot.slane %v5128_v20, 4  ;;  %v5135_v18 = vsel %vm4637_vm15, %v5085_v16, 0.0 }
 0x37e   : > { %v4883_v37 = vadd.f32 %v4882_v24, %v4881_v4  ;;  %v4755_v14 = vadd.f32 %v4754_v2, %v4753_v39  ;;  %v5119_v43 = vrot.slane %v5118_v13, 1  ;;  %v5126_v8 = vrot.slane %v5125_v22, 1 }
 0x37f   : > { %v5113_v15 = vadd.f32 %v5112_v34, %v5111_v53  ;;  %v5136_v62 = vrot.slane %v5135_v18, 4  ;;  %v5130_v26 = vadd.f32 %v5129_v17, %v5128_v20  ;;  %v5275_v42 = vsel %vm5150_vm0, %v5099_v0, %v9199_v49 }
 0x380   : > { %v4884_v21 = vrot.slane %v4883_v37, 1  ;;  %v4756_v27 = vrot.slane %v4755_v14, 1  ;;  %v5178_v44 = vsel %vm5160_vm5, %v4750_v52, %v5177_v57  ;;  %v5120_v30 = vadd.f32 %v5119_v43, %v5118_v13 }
 0x381   : > { %v5137_v31 = vadd.f32 %v5136_v62, %v5135_v18  ;;  %v5276_v25 = vsel %vm5152_vm1, %v5106_v5, %v5275_v42  ;;  %v5131_v35 = vrot.slane %v5130_v26, 2  ;;  %v5127_v6 = vadd.f32 %v5126_v8, %v5125_v22 }
 0x382   : > { %v4885_v45 = vadd.f32 %v4884_v21, %v4883_v37  ;;  %v4757_v58 = vadd.f32 %v4756_v27, %v4755_v14  ;;  %v5277_v9 = vsel %vm5154_vm2, %v5113_v15, %v5276_v25  ;;  %v4958_v46 = vsel %vm4637_vm15, %v4950_v54, 0.0 }
 0x383   : > { %v5138_v12 = vrot.slane %v5137_v31, 2  ;;  %v4968_v49 = vrot.slane %v9203_v47, 2  ;;  %v5132_v10 = vadd.f32 %v5131_v35, %v5130_v26  ;;  %v5278_v3 = vsel %vm5156_vm3, %v5120_v30, %v5277_v9 }
 0x384   : > { %v5213_v0 = vsel %vm5162_vm6, %v4885_v45, %v5212_v38  ;;  %v5179_v23 = vsel %vm5162_vm6, %v4757_v58, %v5178_v44  ;;  %v4959_v28 = vrot.slane %v4958_v46, 4  ;;  %v4972_v51 = vsel %vm4637_vm15, %v4952_v60, 0.0 }
 0x385   : > { %5214 = vrot.lane.b32.xlu1 %v5213_v0, %s6205_s7  ;;  %5180 = vrot.lane.b32.xlu0 %v5179_v23, %s6205_s7  ;;  %v5139_v57 = vadd.f32 %v5138_v12, %v5137_v31  ;;  %v4969_v40 = vadd.f32 %v4968_v49, %v9203_v47  ;;  %v5133_v36 = vrot.slane %v5132_v10, 1  ;;  %v4973_v41 = vrot.slane %v4972_v51, 4 }
 0x386   : > { %v4979_v1 = vsel %vm4637_vm15, %v4953_v56, 0.0  ;;  %v4986_v29 = vsel %vm4637_vm15, %v4954_v61, 0.0  ;;  %v5279_v32 = vsel %vm5158_vm4, %v5127_v6, %v5278_v3  ;;  %v4960_v59 = vadd.f32 %v4959_v28, %v4958_v46 }
 0x387   : > { %v5140_v50 = vrot.slane %v5139_v57, 1  ;;  %v4980_v63 = vrot.slane %v4979_v1, 4  ;;  %v5134_v48 = vadd.f32 %v5133_v36, %v5132_v10  ;;  %v4974_v4 = vadd.f32 %v4973_v41, %v4972_v51  ;;  %v4759_v36 = vld [vmem:[#allocation3 + $0x14] sm:$0x3]  ;;  %v4760_v41 = vld [vmem:[#allocation3 + $0x24] sm:$0x3] }
 0x388   : > { %v4987_v39 = vrot.slane %v4986_v29, 4  ;;  %v4993_v20 = vsel %vm4637_vm15, %v4955_v7, 0.0  ;;  %v4961_v16 = vrot.slane %v4960_v59, 2  ;;  %v4970_v33 = vrot.slane %v4969_v40, 1 }
 0x389   : > { %v5141_v47 = vadd.f32 %v5140_v50, %v5139_v57  ;;  %v4981_v53 = vadd.f32 %v4980_v63, %v4979_v1  ;;  %v5280_v55 = vsel %vm5160_vm5, %v5134_v48, %v5279_v32  ;;  %v4975_v24 = vrot.slane %v4974_v4, 2  ;;  %v4761_v1 = vld [vmem:[#allocation3 + $0x34] sm:$0x3]  ;;  %v4762_v50 = vld [vmem:[#allocation3 + $0x44] sm:$0x3] }
 0x38a   : > { %v4988_v38 = vadd.f32 %v4987_v39, %v4986_v29  ;;  %v4994_v52 = vrot.slane %v4993_v20, 4  ;;  %v4962_v5 = vadd.f32 %v4961_v16, %v4960_v59  ;;  %v5000_v13 = vsel %vm4637_vm15, %v4956_v19, 0.0  ;;  %v4758_v29 = vld [vmem:[#allocation3 + $0x4] sm:$0x3]  ;;  %v4763_v59 = vld [vmem:[#allocation3 + $0x54] sm:$0x3] }
 0x38b   : > { %v5281_v2 = vsel %vm5162_vm6, %v5141_v47, %v5280_v55  ;;  %v4982_v34 = vrot.slane %v4981_v53, 2  ;;  %v4976_v22 = vadd.f32 %v4975_v24, %v4974_v4  ;;  %v5001_v17 = vrot.slane %v5000_v13, 4  ;;  %v4764_v55 = vld [vmem:[#allocation3 + $0x64] sm:$0x3] }
 0x38c   : > { %5282 = vrot.lane.b32.xlu1 %v5281_v2, %s6205_s7  ;;  %v4989_v37 = vrot.slane %v4988_v38, 2  ;;  %v4995_v14 = vadd.f32 %v4994_v52, %v4993_v20  ;;  %v4963_v18 = vrot.slane %v4962_v5, 1  ;;  %v5007_v43 = vsel %vm4637_vm15, %v4957_v11, 0.0 }
 0x38d   : > { %v4983_v15 = vadd.f32 %v4982_v34, %v4981_v53  ;;  %v4977_v8 = vrot.slane %v4976_v22, 1  ;;  %v5002_v27 = vadd.f32 %v5001_v17, %v5000_v13  ;;  %v4971_v42 = vadd.f32 %v4970_v33, %v4969_v40  ;;  %v4630_v34 = vld [vmem:[#allocation3 + $0x10] sm:$0x3] }
 0x38e   : > { %v4990_v62 = vadd.f32 %v4989_v37, %v4988_v38  ;;  %v4996_v21 = vrot.slane %v4995_v14, 2  ;;  %v4964_v26 = vadd.f32 %v4963_v18, %v4962_v5  ;;  %v5008_v44 = vrot.slane %v5007_v43, 4  ;;  %v4765_v38 = vld [vmem:[#allocation3 + $0x74] sm:$0x3] }
 0x38f   : > { %v4984_v54 = vrot.slane %v4983_v15, 1  ;;  %v4978_v30 = vadd.f32 %v4977_v8, %v4976_v22  ;;  %v5003_v45 = vrot.slane %v5002_v27, 2  ;;  %v4773_v32 = vsel %vm4637_vm15, %v4759_v36, 0.0 }
 0x390   : > { %v4991_v31 = vrot.slane %v4990_v62, 1  ;;  %v4997_v25 = vadd.f32 %v4996_v21, %v4995_v14  ;;  %v5009_v58 = vadd.f32 %v5008_v44, %v5007_v43  ;;  %v5241_v35 = vsel %vm5150_vm0, %v4971_v42, %v4964_v26  ;;  %v4631_v43 = vld [vmem:[#allocation3 + $0x20] sm:$0x3]  ;;  %v4632_v42 = vld [vmem:[#allocation3 + $0x30] sm:$0x3] }
 0x391   : > { %v5004_v60 = vadd.f32 %v5003_v45, %v5002_v27  ;;  %v5242_v56 = vsel %vm5152_vm1, %v4978_v30, %v5241_v35  ;;  %v4985_v6 = vadd.f32 %v4984_v54, %v4983_v15  ;;  %v4780_v63 = vsel %vm4637_vm15, %v4760_v41, 0.0  ;;  %v4634_v41 = vld [vmem:[#allocation3 + $0x50] sm:$0x3] }
 0x392   : > { %v4998_v9 = vrot.slane %v4997_v25, 1  ;;  %v5010_v12 = vrot.slane %v5009_v58, 2  ;;  %v4992_v61 = vadd.f32 %v4991_v31, %v4990_v62  ;;  %v4787_v48 = vsel %vm4637_vm15, %v4761_v1, 0.0 }
 0x393   : > { %v5005_v46 = vrot.slane %v5004_v60, 1  ;;  %v5243_v23 = vsel %vm5154_vm2, %v4985_v6, %v5242_v56  ;;  %v4766_v19 = vsel %vm4637_vm15, %v4758_v29, 0.0  ;;  %v4774_v4 = vrot.slane %v4773_v32, 4 }
 0x394   : > { %v4999_v49 = vadd.f32 %v4998_v9, %v4997_v25  ;;  %v5011_v0 = vadd.f32 %v5010_v12, %v5009_v58  ;;  %v5244_v57 = vsel %vm5156_vm3, %v4992_v61, %v5243_v23  ;;  %v4794_v39 = vsel %vm4637_vm15, %v4762_v50, 0.0  ;;  %v4629_v25 = vld [vmem:[#allocation3] sm:$0x3] }
 0x395   : > { %v5006_v10 = vadd.f32 %v5005_v46, %v5004_v60  ;;  %v4781_v20 = vrot.slane %v4780_v63, 4  ;;  %v4788_v47 = vrot.slane %v4787_v48, 4  ;;  %v4801_v16 = vsel %vm4637_vm15, %v4763_v59, 0.0 }
 0x396   : > { %v5012_v3 = vrot.slane %v5011_v0, 1  ;;  %v5245_v28 = vsel %vm5158_vm4, %v4999_v49, %v5244_v57  ;;  %v4767_v33 = vrot.slane %v4766_v19, 4  ;;  %v4795_v53 = vrot.slane %v4794_v39, 4 }
 0x397   : > { %v5246_v40 = vsel %vm5160_vm5, %v5006_v10, %v5245_v28  ;;  %v4775_v11 = vadd.f32 %v4774_v4, %v4773_v32  ;;  %v4802_v24 = vrot.slane %v4801_v16, 4  ;;  %v4782_v52 = vadd.f32 %v4781_v20, %v4780_v63  ;;  %v4633_v28 = vld [vmem:[#allocation3 + $0x40] sm:$0x3] }
 0x398   : > { %v5013_v7 = vadd.f32 %v5012_v3, %v5011_v0  ;;  %v4789_v2 = vadd.f32 %v4788_v47, %v4787_v48  ;;  %v4768_v5 = vadd.f32 %v4767_v33, %v4766_v19  ;;  %v4796_v13 = vadd.f32 %v4795_v53, %v4794_v39  ;;  %v4635_v32 = vld [vmem:[#allocation3 + $0x60] sm:$0x3]  ;;  %v4636_v19 = vld [vmem:[#allocation3 + $0x70] sm:$0x3]  ;;  %v5014_v53 = vld [vmem:[#allocation3 + $0xc] sm:$0x3] }
 0x399   : > { %v4808_v22 = vsel %vm4637_vm15, %v4764_v55, 0.0  ;;  %v4776_v37 = vrot.slane %v4775_v11, 2  ;;  %v4803_v14 = vadd.f32 %v4802_v24, %v4801_v16  ;;  %v4815_v17 = vsel %vm4637_vm15, %v4765_v38, 0.0  ;;  %v5015_v55 = vld [vmem:[#allocation3 + $0x1c] sm:$0x3] }
 0x39a   : > { %v5247_v51 = vsel %vm5162_vm6, %v5013_v7, %v5246_v40  ;;  %v4783_v18 = vrot.slane %v4782_v52, 2  ;;  %v4790_v15 = vrot.slane %v4789_v2, 2  ;;  %v4645_v8 = vsel %vm4637_vm15, %v4630_v34, 0.0 }
 0x39b   : > { %5248 = vrot.lane.b32.xlu0 %v5247_v51, %s6205_s7  ;;  %v4809_v62 = vrot.slane %v4808_v22, 4  ;;  %v4769_v21 = vrot.slane %v4768_v5, 2  ;;  %v4797_v27 = vrot.slane %v4796_v13, 2  ;;  %v4816_v26 = vrot.slane %v4815_v17, 4  ;;  %s5677_s7 = sshll.u32 %s10065_s19, 5 }
 0x39c   : > { %v4777_v54 = vadd.f32 %v4776_v37, %v4775_v11  ;;  %v4804_v44 = vrot.slane %v4803_v14, 2  ;;  %v4646_v30 = vrot.slane %v4645_v8, 4  ;;  %v4652_v31 = vsel %vm4637_vm15, %v4631_v43, 0.0  ;;  %s9302_s19 = scalar_lea.vmem %s9332_s5, %s5677_s7 }
 0x39d   : > { %v4784_v45 = vadd.f32 %v4783_v18, %v4782_v52  ;;  %v4791_v58 = vadd.f32 %v4790_v15, %v4789_v2  ;;  %v4810_v35 = vadd.f32 %v4809_v62, %v4808_v22  ;;  %v4770_v9 = vadd.f32 %v4769_v21, %v4768_v5  ;;  %v5016_v22 = vld [vmem:[#allocation3 + $0x2c] sm:$0x3] }
 0x39e   : > { %v4659_v60 = vsel %vm4637_vm15, %v4632_v42, 0.0  ;;  %v4798_v56 = vadd.f32 %v4797_v27, %v4796_v13  ;;  %v4817_v6 = vadd.f32 %v4816_v26, %v4815_v17  ;;  %v4653_v12 = vrot.slane %v4652_v31, 4  ;;  %v5017_v17 = vld [vmem:[#allocation3 + $0x3c] sm:$0x3] }
 0x39f   : > { %v4638_v61 = vsel %vm4637_vm15, %v4629_v25, 0.0  ;;  %v4778_v46 = vrot.slane %v4777_v54, 1  ;;  %v4805_v49 = vadd.f32 %v4804_v44, %v4803_v14  ;;  %v4647_v0 = vadd.f32 %v4646_v30, %v4645_v8 }
 0x3a0   : > { %v4785_v23 = vrot.slane %v4784_v45, 1  ;;  %v4792_v10 = vrot.slane %v4791_v58, 1  ;;  %v4660_v3 = vrot.slane %v4659_v60, 4  ;;  %v4811_v57 = vrot.slane %v4810_v35, 2 }
 0x3a1   : > { %v4771_v7 = vrot.slane %v4770_v9, 1  ;;  %v4639_v40 = vrot.slane %v4638_v61, 4  ;;  %v4799_v51 = vrot.slane %v4798_v56, 1  ;;  %v4818_v36 = vrot.slane %v4817_v6, 2 }
 0x3a2   : > { %v4654_v1 = vadd.f32 %v4653_v12, %v4652_v31  ;;  %v4779_v29 = vadd.f32 %v4778_v46, %v4777_v54  ;;  %v4806_v50 = vrot.slane %v4805_v49, 1  ;;  %v4648_v59 = vrot.slane %v4647_v0, 2  ;;  %v5018_v54 = vld [vmem:[#allocation3 + $0x4c] sm:$0x3] }
 0x3a3   : > { %v4786_v63 = vadd.f32 %v4785_v23, %v4784_v45  ;;  %v4793_v48 = vadd.f32 %v4792_v10, %v4791_v58  ;;  %v4661_v4 = vadd.f32 %v4660_v3, %v4659_v60  ;;  %v4666_v39 = vsel %vm4637_vm15, %v4633_v28, 0.0 }
 0x3a4   : > { %v4812_v20 = vadd.f32 %v4811_v57, %v4810_v35  ;;  %v4772_v47 = vadd.f32 %v4771_v7, %v4770_v9  ;;  %v4673_v16 = vsel %vm4637_vm15, %v4634_v41, 0.0  ;;  %v4640_v33 = vadd.f32 %v4639_v40, %v4638_v61  ;;  %v5019_v57 = vld [vmem:[#allocation3 + $0x5c] sm:$0x3] }
 0x3a5   : > { %v4800_v11 = vadd.f32 %v4799_v51, %v4798_v56  ;;  %v4819_v24 = vadd.f32 %v4818_v36, %v4817_v6  ;;  %v4655_v38 = vrot.slane %v4654_v1, 2  ;;  %v4680_v52 = vsel %vm4637_vm15, %v4635_v32, 0.0  ;;  %v5020_v32 = vld [vmem:[#allocation3 + $0x6c] sm:$0x3] }
 0x3a6   : > { %v4807_v2 = vadd.f32 %v4806_v50, %v4805_v49  ;;  %v4649_v5 = vadd.f32 %v4648_v59, %v4647_v0  ;;  %v4667_v34 = vrot.slane %v4666_v39, 4  ;;  %v4687_v13 = vsel %vm4637_vm15, %v4636_v19, 0.0 }
 0x3a7   : > { %v4662_v37 = vrot.slane %v4661_v4, 2  ;;  %v4674_v14 = vrot.slane %v4673_v16, 4  ;;  %v5022_v18 = vsel %vm4637_vm15, %v5014_v53, 0.0  ;;  %v5029_v15 = vsel %vm4637_vm15, %v5015_v55, 0.0 }
 0x3a8   : > { %v4813_v43 = vrot.slane %v4812_v20, 1  ;;  %v5191_v8 = vsel %vm5150_vm0, %v4779_v29, %v4772_v47  ;;  %v4681_v62 = vrot.slane %v4680_v52, 4  ;;  %v4641_v21 = vrot.slane %v4640_v33, 2 }
 0x3a9   : > { %v4820_v27 = vrot.slane %v4819_v24, 1  ;;  %v4656_v26 = vadd.f32 %v4655_v38, %v4654_v1  ;;  %v4688_v42 = vrot.slane %v4687_v13, 4  ;;  %v5036_v44 = vsel %vm4637_vm15, %v5016_v22, 0.0 }
 0x3aa   : > { %v4668_v30 = vadd.f32 %v4667_v34, %v4666_v39  ;;  %v5023_v31 = vrot.slane %v5022_v18, 4  ;;  %v5030_v25 = vrot.slane %v5029_v15, 4  ;;  %v5043_v45 = vsel %vm4637_vm15, %v5017_v17, 0.0  ;;  %v4886_v17 = vld [vmem:[#allocation3 + $0x8] sm:$0x3] }
 0x3ab   : > { %v5192_v58 = vsel %vm5152_vm1, %v4786_v63, %v5191_v8  ;;  %v4650_v35 = vrot.slane %v4649_v5, 1  ;;  %v4663_v9 = vadd.f32 %v4662_v37, %v4661_v4  ;;  %v4675_v60 = vadd.f32 %v4674_v14, %v4673_v16  ;;  %v5021_v4 = vld [vmem:[#allocation3 + $0x7c] sm:$0x3] }
 0x3ac   : > { %v4682_v56 = vadd.f32 %v4681_v62, %v4680_v52  ;;  %v4642_v6 = vadd.f32 %v4641_v21, %v4640_v33  ;;  %v5037_v12 = vrot.slane %v5036_v44, 4  ;;  %v5050_v61 = vsel %vm4637_vm15, %v5018_v54, 0.0 }
 0x3ad   : > { %v4814_v46 = vadd.f32 %v4813_v43, %v4812_v20  ;;  %v4657_v49 = vrot.slane %v4656_v26, 1  ;;  %v4689_v0 = vadd.f32 %v4688_v42, %v4687_v13  ;;  %v5044_v23 = vrot.slane %v5043_v45, 4 }
 0x3ae   : > { %v5193_v10 = vsel %vm5154_vm2, %v4793_v48, %v5192_v58  ;;  %v4669_v3 = vrot.slane %v4668_v30, 2  ;;  %v5024_v7 = vadd.f32 %v5023_v31, %v5022_v18  ;;  %v5031_v28 = vadd.f32 %v5030_v25, %v5029_v15 }
 0x3af   : > { %v4821_v40 = vadd.f32 %v4820_v27, %v4819_v24  ;;  %v4651_v51 = vadd.f32 %v4650_v35, %v4649_v5  ;;  %v4676_v36 = vrot.slane %v4675_v60, 2  ;;  %v5051_v41 = vrot.slane %v5050_v61, 4 }
 0x3b0   : > { %v4664_v1 = vrot.slane %v4663_v9, 1  ;;  %v4683_v29 = vrot.slane %v4682_v56, 2  ;;  %v4643_v50 = vrot.slane %v4642_v6, 1  ;;  %v5038_v59 = vadd.f32 %v5037_v12, %v5036_v44 }
 0x3b1   : > { %v5194_v63 = vsel %vm5156_vm3, %v4800_v11, %v5193_v10  ;;  %v4690_v19 = vrot.slane %v4689_v0, 2  ;;  %v5045_v39 = vadd.f32 %v5044_v23, %v5043_v45  ;;  %v5057_v48 = vsel %vm4637_vm15, %v5019_v57, 0.0 }
 0x3b2   : > { %v4658_v20 = vadd.f32 %v4657_v49, %v4656_v26  ;;  %v4670_v47 = vadd.f32 %v4669_v3, %v4668_v30  ;;  %v5025_v16 = vrot.slane %v5024_v7, 2  ;;  %v5032_v33 = vrot.slane %v5031_v28, 2  ;;  %v4887_v26 = vld [vmem:[#allocation3 + $0x18] sm:$0x3] }
 0x3b3   : > { %v5195_v53 = vsel %vm5158_vm4, %v4807_v2, %v5194_v63  ;;  %v4677_v55 = vadd.f32 %v4676_v36, %v4675_v60  ;;  %v5052_v24 = vadd.f32 %v5051_v41, %v5050_v61  ;;  %v5064_v38 = vsel %vm4637_vm15, %v5020_v32, 0.0 }
 0x3b4   : > { %v4644_v52 = vadd.f32 %v4643_v50, %v4642_v6  ;;  %v5039_v5 = vrot.slane %v5038_v59, 2  ;;  %v5058_v34 = vrot.slane %v5057_v48, 4  ;;  %v5071_v11 = vsel %vm4637_vm15, %v5021_v4, 0.0  ;;  %v4890_v50 = vld [vmem:[#allocation3 + $0x48] sm:$0x3] }
 0x3b5   : > { %v4665_v13 = vadd.f32 %v4664_v1, %v4663_v9  ;;  %v4684_v22 = vadd.f32 %v4683_v29, %v4682_v56  ;;  %v4691_v37 = vadd.f32 %v4690_v19, %v4689_v0  ;;  %v5046_v14 = vrot.slane %v5045_v39, 2  ;;  %v4888_v56 = vld [vmem:[#allocation3 + $0x28] sm:$0x3]  ;;  %v4891_v19 = vld [vmem:[#allocation3 + $0x58] sm:$0x3] }
 0x3b6   : > { %v5196_v18 = vsel %vm5160_vm5, %v4814_v46, %v5195_v53  ;;  %v5026_v15 = vadd.f32 %v5025_v16, %v5024_v7  ;;  %v5033_v43 = vadd.f32 %v5032_v33, %v5031_v28  ;;  %v5065_v8 = vrot.slane %v5064_v38, 4  ;;  %v4889_v28 = vld [vmem:[#allocation3 + $0x38] sm:$0x3] }
 0x3b7   : > { %v4671_v2 = vrot.slane %v4670_v47, 1  ;;  %v4678_v62 = vrot.slane %v4677_v55, 1  ;;  %v5053_v21 = vrot.slane %v5052_v24, 2  ;;  %v5072_v27 = vrot.slane %v5071_v11, 4 }
 0x3b8   : > { %v5151_v42 = vsel %vm5150_vm0, %v4651_v51, %v4644_v52  ;;  %v5040_v54 = vadd.f32 %v5039_v5, %v5038_v59  ;;  %v5059_v44 = vadd.f32 %v5058_v34, %v5057_v48  ;;  %v4894_v30 = vsel %vm4637_vm15, %v4886_v17, 0.0 }
 0x3b9   : > { %v9280_v31 = vsel %vm5162_vm6, %v4821_v40, %v5196_v18  ;;  %v4685_v25 = vrot.slane %v4684_v22, 1  ;;  %v4692_v45 = vrot.slane %v4691_v37, 1  ;;  %v5047_v58 = vadd.f32 %v5046_v14, %v5045_v39 }
 0x3ba   : > { %v5027_v35 = vrot.slane %v5026_v15, 1  ;;  %v5034_v9 = vrot.slane %v5033_v43, 1  ;;  %v5066_v60 = vadd.f32 %v5065_v8, %v5064_v38  ;;  %v4901_v6 = vsel %vm4637_vm15, %v4887_v26, 0.0 }
 0x3bb   : > { %v5153_v12 = vsel %vm5152_vm1, %v4658_v20, %v5151_v42  ;;  %v5054_v61 = vadd.f32 %v5053_v21, %v5052_v24  ;;  %v5073_v46 = vadd.f32 %v5072_v27, %v5071_v11  ;;  %v4895_v49 = vrot.slane %v4894_v30, 4  ;;  %v4892_v20 = vld [vmem:[#allocation3 + $0x68] sm:$0x3] }
 0x3bc   : > { %v4672_v0 = vadd.f32 %v4671_v2, %v4670_v47  ;;  %v4679_v23 = vadd.f32 %v4678_v62, %v4677_v55  ;;  %v5041_v10 = vrot.slane %v5040_v54, 1  ;;  %v5060_v3 = vrot.slane %v5059_v44, 2  ;;  %v4893_v55 = vld [vmem:[#allocation3 + $0x78] sm:$0x3] }
 0x3bd   : > { %v4686_v57 = vadd.f32 %v4685_v25, %v4684_v22  ;;  %v5048_v7 = vrot.slane %v5047_v58, 1  ;;  %v4902_v40 = vrot.slane %v4901_v6, 4  ;;  %v4908_v51 = vsel %vm4637_vm15, %v4888_v56, 0.0 }
 0x3be   : > { %v4693_v36 = vadd.f32 %v4692_v45, %v4691_v37  ;;  %v5155_v41 = vsel %vm5154_vm2, %v4665_v13, %v5153_v12  ;;  %v5028_v1 = vadd.f32 %v5027_v35, %v5026_v15  ;;  %v5067_v29 = vrot.slane %v5066_v60, 2 }
 0x3bf   : > { %v5035_v32 = vadd.f32 %v5034_v9, %v5033_v43  ;;  %v5055_v59 = vrot.slane %v5054_v61, 1  ;;  %v5074_v63 = vrot.slane %v5073_v46, 2  ;;  %v4896_v4 = vadd.f32 %v4895_v49, %v4894_v30 }
 0x3c0   : > { %v5042_v39 = vadd.f32 %v5041_v10, %v5040_v54  ;;  %v5061_v48 = vadd.f32 %v5060_v3, %v5059_v44  ;;  %v4909_v47 = vrot.slane %v4908_v51, 4  ;;  %v4915_v16 = vsel %vm4637_vm15, %v4889_v28, 0.0 }
 0x3c1   : > { %v5157_v33 = vsel %vm5156_vm3, %v4672_v0, %v5155_v41  ;;  %v5049_v53 = vadd.f32 %v5048_v7, %v5047_v58  ;;  %v4903_v24 = vadd.f32 %v4902_v40, %v4901_v6  ;;  %v4922_v38 = vsel %vm4637_vm15, %v4890_v50, 0.0 }
 0x3c2   : > { %v5159_v52 = vsel %vm5158_vm4, %v4679_v23, %v5157_v33  ;;  %v5068_v5 = vadd.f32 %v5067_v29, %v5066_v60  ;;  %v5259_v34 = vsel %vm5150_vm0, %v5035_v32, %v5028_v1  ;;  %v4929_v11 = vsel %vm4637_vm15, %v4891_v19, 0.0 }
 0x3c3   : > { %v5075_v13 = vadd.f32 %v5074_v63, %v5073_v46  ;;  %v4897_v22 = vrot.slane %v4896_v4, 2  ;;  %v4916_v37 = vrot.slane %v4915_v16, 4  ;;  %v4936_v14 = vsel %vm4637_vm15, %v4892_v20, 0.0 }
 0x3c4   : > { %v5062_v17 = vrot.slane %v5061_v48, 1  ;;  %v4910_v18 = vadd.f32 %v4909_v47, %v4908_v51  ;;  %v4923_v15 = vrot.slane %v4922_v38, 4  ;;  %v4943_v43 = vsel %vm4637_vm15, %v4893_v55, 0.0 }
 0x3c5   : > { %v5161_v8 = vsel %vm5160_vm5, %v4686_v57, %v5159_v52  ;;  %v5260_v2 = vsel %vm5152_vm1, %v5042_v39, %v5259_v34  ;;  %v4904_v62 = vrot.slane %v4903_v24, 2  ;;  %v4930_v21 = vrot.slane %v4929_v11, 4 }
 0x3c6   : > { %v5163_v27 = vsel %vm5162_vm6, %v4693_v36, %v5161_v8  ;;  %v5056_v26 = vadd.f32 %v5055_v59, %v5054_v61  ;;  %v5069_v42 = vrot.slane %v5068_v5, 1  ;;  %v4937_v54 = vrot.slane %v4936_v14, 4 }
 0x3c7   : > { %v5076_v44 = vrot.slane %v5075_v13, 1  ;;  %v4898_v30 = vadd.f32 %v4897_v22, %v4896_v4  ;;  %v4917_v25 = vadd.f32 %v4916_v37, %v4915_v16  ;;  %v4944_v45 = vrot.slane %v4943_v43, 4 }
 0x3c8   : > { %v5063_v9 = vadd.f32 %v5062_v17, %v5061_v48  ;;  %v5261_v60 = vsel %vm5154_vm2, %v5049_v53, %v5260_v2  ;;  %v4911_v56 = vrot.slane %v4910_v18, 2  ;;  %v4924_v6 = vadd.f32 %v4923_v15, %v4922_v38 }
 0x3c9   : > { %v4905_v46 = vadd.f32 %v4904_v62, %v4903_v24  ;;  %v4931_v49 = vadd.f32 %v4930_v21, %v4929_v11  ;;  %v5070_v10 = vadd.f32 %v5069_v42, %v5068_v5  ;;  %v4938_v3 = vadd.f32 %v4937_v54, %v4936_v14 }
 0x3ca   : > { %v5077_v57 = vadd.f32 %v5076_v44, %v5075_v13  ;;  %v4899_v7 = vrot.slane %v4898_v30, 1  ;;  %v4918_v28 = vrot.slane %v4917_v25, 2  ;;  %v4945_v40 = vadd.f32 %v4944_v45, %v4943_v43 }
 0x3cb   : > { %v5262_v51 = vsel %vm5156_vm3, %v5056_v26, %v5261_v60  ;;  %v4912_v36 = vadd.f32 %v4911_v56, %v4910_v18  ;;  %v4925_v41 = vrot.slane %v4924_v6, 2  ;;  %v4906_v1 = vrot.slane %v4905_v46, 1 }
 0x3cc   : > { %v4932_v29 = vrot.slane %v4931_v49, 2  ;;  %v4939_v32 = vrot.slane %v4938_v3, 2  ;;  %v4900_v19 = vadd.f32 %v4899_v7, %v4898_v30  ;;  %v4919_v4 = vadd.f32 %v4918_v28, %v4917_v25 }
 0x3cd   : > { %v4946_v39 = vrot.slane %v4945_v40, 2  ;;  %v4913_v20 = vrot.slane %v4912_v36, 1  ;;  %v4926_v47 = vadd.f32 %v4925_v41, %v4924_v6  ;;  %v4907_v33 = vadd.f32 %v4906_v1, %v4905_v46 }
 0x3ce   : > { %v4933_v53 = vadd.f32 %v4932_v29, %v4931_v49  ;;  %v4940_v55 = vadd.f32 %v4939_v32, %v4938_v3  ;;  %v4920_v24 = vrot.slane %v4919_v4, 1 }
 0x3cf   : > { %v4947_v38 = vadd.f32 %v4946_v39, %v4945_v40  ;;  %v5225_v52 = vsel %vm5150_vm0, %v4907_v33, %v4900_v19  ;;  %v4914_v5 = vadd.f32 %v4913_v20, %v4912_v36  ;;  %v4927_v34 = vrot.slane %v4926_v47, 1 }
 0x3d0   : > { %v4934_v11 = vrot.slane %v4933_v53, 1  ;;  %v4941_v13 = vrot.slane %v4940_v55, 1  ;;  %v4921_v37 = vadd.f32 %v4920_v24, %v4919_v4 }
 0x3d1   : > { %v5226_v22 = vsel %vm5152_vm1, %v4914_v5, %v5225_v52  ;;  %v4948_v14 = vrot.slane %v4947_v38, 1  ;;  %v4928_v17 = vadd.f32 %v4927_v34, %v4926_v47 }
 0x3d2   : > { %v4935_v18 = vadd.f32 %v4934_v11, %v4933_v53  ;;  %v5227_v15 = vsel %vm5154_vm2, %v4921_v37, %v5226_v22  ;;  %v4942_v43 = vadd.f32 %v4941_v13, %v4940_v55 }
 0x3d3   : > { %v4949_v8 = vadd.f32 %v4948_v14, %v4947_v38  ;;  %v5228_v2 = vsel %vm5156_vm3, %v4928_v17, %v5227_v15 }
 0x3d4   : > { %v5229_v62 = vsel %vm5158_vm4, %v4935_v18, %v5228_v2 }
 0x3d5   : > { %v5230_v21 = vsel %vm5160_vm5, %v4942_v43, %v5229_v62 }
 0x3f7   : > { %v5215_v58 = vpop.permute.xlu1 %5214  ;;  %v5181_v35 = vpop.permute.xlu0 %5180 }
 0x3f8   : > { %v5286_v12 = vsel %vm3482_vm14, %v9280_v31, %v5215_v58  ;;  %v5285_v61 = vsel %vm3482_vm14, %v5163_v27, %v5181_v35  ;;  %v5263_v31 = vsel %vm5158_vm4, %v5063_v9, %v5262_v51  ;;  %v5231_v27 = vsel %vm5162_vm6, %v4949_v8, %v5230_v21 }
 0x3f9   : > { %v5290_v0 = vmul.f32 0.25, %v5286_v12  ;;  %v5289_v23 = vmul.f32 0.25, %v5285_v61  ;;  %v5264_v50 = vsel %vm5160_vm5, %v5070_v10, %v5263_v31 }
 0x3fa   : > { %v5265_v59 = vsel %vm5162_vm6, %v5077_v57, %v5264_v50 }
 0x3fb   : > { %5294 = vst [vmem:[%s9302_s19 + $0x8] sm:$0xff] %v5290_v0  ;;  %5293 = vst [vmem:[%s9302_s19] sm:$0xff] %v5289_v23 }
 0x3fe   : > { %v5283_v63 = vpop.permute.xlu1 %5282 }
 0x3ff   : > { %v5288_v48 = vsel %vm3482_vm14, %v5265_v59, %v5283_v63 }
 0x400   : > { %v5292_v16 = vmul.f32 0.25, %v5288_v48 }
 0x402   : > { %5296 = vst [vmem:[%s9302_s19 + $0x18] sm:$0xff] %v5292_v16 }
 0x40d   : > { %v5249_v26 = vpop.permute.xlu0 %5248 }
 0x40e   : > { %v5287_v42 = vsel %vm3482_vm14, %v5231_v27, %v5249_v26 }
 0x40f   : > { %v5291_v54 = vmul.f32 0.25, %v5287_v42 }
 0x411   : > { %5295 = vst [vmem:[%s9302_s19 + $0x10] sm:$0xff] %v5291_v54 }
 0x412 PF: > { %s15_s18 = sadd.s32 1, %s6202_s18  }
 0x413   : > { %p12_p4 = scmp.ge.s32.totalorder %s15_s18, 4  }
 0x415   :  { %14 = sbr.rel (!%p12_p4) target bundleno = 1 (0x1), region = 73 }

</bundles_post_ra>
